<compile_context>
chip_gen: v6e
topology: v6e:2x2x1
jax: 0.10.0
libtpu: 0.0.40
codegen_flags: <defaults>
</compile_context>

<pallas_src>
import functools

import jax
import jax.numpy as jnp
from jax.experimental import pallas as pl
from jax.experimental.pallas import tpu as pltpu

EMB_DIM = 100
HIDDEN_DIM = 100

E_PAD = 128        # padded embedding dim (lane-aligned)
H_PAD = 128        # padded hidden dim (lane-aligned)
G_PAD = 4 * H_PAD  # padded fused-gate width


def lstm_fc_kernel(adj_idx_ref, x_idx_ref,              # scalar prefetch (SMEM)
                   adj_tab_ref, op_tab_ref, w_ih_ref, w_hh_ref, b_ref,
                   w_fc_ref, b_fc_ref,                  # VMEM inputs
                   out_ref,                             # VMEM output
                   embed_scr):                          # VMEM scratch
  # adj_idx_ref : (B, T_adj) int32   SMEM
  # x_idx_ref   : (B, T_op)  int32   SMEM
  # adj_tab_ref : (8, Ep)            zero-padded adj embedding table
  # op_tab_ref  : (nfeat_pad, Ep)    zero-padded op embedding table
  # w_ih_ref    : (Ep, 4*Hp)         input->gate weights, gate-blocked (i,f,o,g)
  # w_hh_ref    : (Hp, 4*Hp)         hidden->gate weights, same blocking
  # b_ref       : (1, 4*Hp)          combined bias (b_ih + b_hh)
  # w_fc_ref    : (T, 1, Hp)         final Linear weight, per-timestep rows
  # b_fc_ref    : (1, 1)
  # out_ref     : (Bp, 1)
  # embed_scr   : (T*Bp, Ep)         time-major embed slab, row = t*Bp + b
  B, T_adj = adj_idx_ref.shape
  T_op = x_idx_ref.shape[1]
  T = T_adj + T_op
  TB, Ep = embed_scr.shape
  Bp = TB // T
  Hp = w_hh_ref.shape[0]

  # ---- In-kernel embedding gather + concat + zero-pad (tables pre-padded). ---
  embed_scr[...] = jnp.zeros_like(embed_scr)
  for t in range(T_adj):
    for bi in range(B):
      idx = adj_idx_ref[bi, t]
      embed_scr[pl.ds(t * Bp + bi, 1), :] = adj_tab_ref[pl.ds(idx, 1), :]
  for t in range(T_op):
    for bi in range(B):
      idx = x_idx_ref[bi, t]
      embed_scr[pl.ds((T_adj + t) * Bp + bi, 1), :] = op_tab_ref[pl.ds(idx, 1), :]

  # ---- LSTM recurrence, fully unrolled over static T. ----------------------
  h = jnp.zeros((Bp, Hp), jnp.float32)
  c = jnp.zeros((Bp, Hp), jnp.float32)
  acc = jnp.zeros((Bp, Hp), jnp.float32)      # fused-FC vector accumulator

  for t in range(T):
    # Per-step input->gate chunk straight from refs: independent of h, so the
    # MXU pushes hide under the serial EUP/VPU chain of the previous step and
    # nothing large stays live across iterations.
    e_t = embed_scr[pl.ds(t * Bp, Bp), :]                           # (Bp, Ep)
    gates = (jnp.dot(e_t, w_ih_ref[...],
                     preferred_element_type=jnp.float32)
             + b_ref[...]
             + jnp.dot(h, w_hh_ref[...],
                       preferred_element_type=jnp.float32))         # (Bp, 4Hp)
    # Gate blocking is (i, f, o, g): one contiguous sigmoid slab + one tanh.
    sig = jax.nn.sigmoid(gates[:, :3 * Hp])
    i_g = sig[:, 0 * Hp:1 * Hp]
    f_g = sig[:, 1 * Hp:2 * Hp]
    o_g = sig[:, 2 * Hp:3 * Hp]
    g_g = jnp.tanh(gates[:, 3 * Hp:4 * Hp])
    c = f_g * c + i_g * g_g
    h = o_g * jnp.tanh(c)
    # Fused fc: vector accumulate, no per-step cross-lane reduction.
    acc = acc + h * w_fc_ref[t]                                     # (Bp, Hp)

  out_ref[...] = jnp.sum(acc, axis=-1, keepdims=True) + b_fc_ref[...]


def init_params(key, nfeat, timestep, emb_dim=EMB_DIM, hidden_dim=HIDDEN_DIM):
  """Raw parameters matching the PyTorch module layout."""
  E, H = emb_dim, hidden_dim
  ks = jax.random.split(key, 8)
  lstm_bound = 1.0 / float(H) ** 0.5
  fc_bound = 1.0 / float(H * timestep) ** 0.5
  return {
      "adj_emb": jax.random.uniform(ks[0], (2, E), jnp.float32, -0.1, 0.1),
      "op_emb": jax.random.uniform(ks[1], (nfeat, E), jnp.float32, -0.1, 0.1),
      # gate order (i, f, g, o), matching PyTorch's weight_ih_l0 layout (4H, E)
      "w_ih": jax.random.uniform(ks[2], (4, H, E), jnp.float32,
                                 -lstm_bound, lstm_bound),
      "w_hh": jax.random.uniform(ks[3], (4, H, H), jnp.float32,
                                 -lstm_bound, lstm_bound),
      "b_ih": jax.random.uniform(ks[4], (4, H), jnp.float32,
                                 -lstm_bound, lstm_bound),
      "b_hh": jax.random.uniform(ks[5], (4, H), jnp.float32,
                                 -lstm_bound, lstm_bound),
      "w_fc": jax.random.uniform(ks[6], (1, timestep * H), jnp.float32,
                                 -fc_bound, fc_bound),
      "b_fc": jax.random.uniform(ks[7], (1,), jnp.float32, -fc_bound, fc_bound),
  }


def prepare_params(params, timestep):
  """One-time padding / gate-blocking into kernel-ready layouts (done at init,
  NOT per forward call)."""
  E, H = EMB_DIM, HIDDEN_DIM
  Ep, Hp, G = E_PAD, H_PAD, G_PAD
  T = timestep
  nfeat = params["op_emb"].shape[0]
  nfeat_pad = max(8, ((nfeat + 7) // 8) * 8)

  adj_tab = jnp.zeros((8, Ep), jnp.float32).at[:2, :E].set(params["adj_emb"])
  op_tab = jnp.zeros((nfeat_pad, Ep), jnp.float32).at[:nfeat, :E].set(
      params["op_emb"])

  # Reorder gates (i, f, g, o) -> (i, f, o, g) so the kernel does one
  # contiguous sigmoid slab + one trailing tanh slab per step.
  perm = jnp.array([0, 1, 3, 2])
  w_ih = params["w_ih"][perm]                       # (4, H, E)
  w_hh = params["w_hh"][perm]                       # (4, H, H)
  b = (params["b_ih"] + params["b_hh"])[perm]       # (4, H)

  # column index = gate*Hp + hidden
  w_ih_p = jnp.zeros((Ep, 4, Hp), jnp.float32)
  w_ih_p = w_ih_p.at[:E, :, :H].set(jnp.transpose(w_ih, (2, 0, 1))).reshape(Ep, G)
  w_hh_p = jnp.zeros((Hp, 4, Hp), jnp.float32)
  w_hh_p = w_hh_p.at[:H, :, :H].set(jnp.transpose(w_hh, (2, 0, 1))).reshape(Hp, G)
  b_p = jnp.zeros((4, Hp), jnp.float32).at[:, :H].set(b).reshape(1, G)

  # fc weight (1, T*H) -> per-timestep rows, padded on the hidden lane dim.
  w_fc_p = jnp.zeros((T, 1, Hp), jnp.float32)
  w_fc_p = w_fc_p.at[:, 0, :H].set(params["w_fc"].reshape(T, H))
  b_fc = params["b_fc"].reshape(1, 1)

  return {
      "adj_tab": adj_tab, "op_tab": op_tab,
      "w_ih": w_ih_p, "w_hh": w_hh_p, "b": b_p,
      "w_fc": w_fc_p, "b_fc": b_fc,
  }


@jax.jit
def lstm_forward(prep, x, adj):
  """Forward pass using pre-padded params. x: (B, T_op) int, adj: (B, T_adj) int."""
  B, T_adj = adj.shape
  T_op = x.shape[1]
  T = prep["w_fc"].shape[0]
  if T_adj + T_op != T:
    raise ValueError("T_adj + T_op must equal timestep")
  Ep = prep["w_ih"].shape[0]
  G = prep["w_ih"].shape[1]
  Hp = prep["w_hh"].shape[0]
  adj_rows = prep["adj_tab"].shape[0]
  op_rows = prep["op_tab"].shape[0]
  Bp = max(8, ((B + 7) // 8) * 8)                    # full sublane group

  out = pl.pallas_call(
      lstm_fc_kernel,
      out_shape=jax.ShapeDtypeStruct((Bp, 1), jnp.float32),
      grid_spec=pltpu.PrefetchScalarGridSpec(
          num_scalar_prefetch=2,
          grid=(1,),
          in_specs=[
              pl.BlockSpec((adj_rows, Ep), lambda i, a, o: (0, 0)),
              pl.BlockSpec((op_rows, Ep), lambda i, a, o: (0, 0)),
              pl.BlockSpec((Ep, G), lambda i, a, o: (0, 0)),
              pl.BlockSpec((Hp, G), lambda i, a, o: (0, 0)),
              pl.BlockSpec((1, G), lambda i, a, o: (0, 0)),
              pl.BlockSpec((T, 1, Hp), lambda i, a, o: (0, 0, 0)),
              pl.BlockSpec((1, 1), lambda i, a, o: (0, 0)),
          ],
          out_specs=pl.BlockSpec((Bp, 1), lambda i, a, o: (0, 0)),
          scratch_shapes=[
              pltpu.VMEM((T * Bp, Ep), jnp.float32),   # embed slab
          ]),
      compiler_params=pltpu.CompilerParams(
          dimension_semantics=("arbitrary",)),
  )(adj.astype(jnp.int32), x.astype(jnp.int32),
    prep["adj_tab"], prep["op_tab"], prep["w_ih"], prep["w_hh"],
    prep["b"], prep["w_fc"], prep["b_fc"])
  return out[:B]


def lstm_forward_ref(params, x, adj):
  """Pure-JAX reference matching PyTorch nn.LSTM semantics (raw params)."""
  adj_embed = params["adj_emb"][adj]
  op_embed = params["op_emb"][x]
  embed = jnp.concatenate([adj_embed, op_embed], axis=1)
  B, T, _ = embed.shape
  H = HIDDEN_DIM
  w_ih = params["w_ih"].reshape(4 * H, -1)
  w_hh = params["w_hh"].reshape(4 * H, H)
  b = (params["b_ih"] + params["b_hh"]).reshape(4 * H)
  h = jnp.zeros((B, H), jnp.float32)
  c = jnp.zeros((B, H), jnp.float32)
  outs = []
  for t in range(T):
    gates = embed[:, t] @ w_ih.T + h @ w_hh.T + b
    i = jax.nn.sigmoid(gates[:, :H])
    f = jax.nn.sigmoid(gates[:, H:2 * H])
    g = jnp.tanh(gates[:, 2 * H:3 * H])
    o = jax.nn.sigmoid(gates[:, 3 * H:])
    c = f * c + i * g
    h = o * jnp.tanh(c)
    outs.append(h)
  out = jnp.stack(outs, axis=1).reshape(B, T * H)
  return out @ params["w_fc"].T + params["b_fc"]


if __name__ == "__main__":
  key = jax.random.PRNGKey(0)
  nfeat = 5
  timestep = 8          # T_adj + T_op must equal timestep (fc expects T*H inputs)
  B, T_adj, T_op = 2, 4, 4

  pkey, xkey, akey = jax.random.split(key, 3)
  params = init_params(pkey, nfeat, timestep)
  prep = prepare_params(params, timestep)

  x = jax.random.randint(xkey, (B, T_op), 0, nfeat, dtype=jnp.int32)
  adj = jax.random.randint(akey, (B, T_adj), 0, 2, dtype=jnp.int32)

  out = lstm_forward(prep, x, adj)
  out = jax.block_until_ready(out)

  ref = lstm_forward_ref(params, x, adj)
  assert out.shape == (B, 1), out.shape
  assert jnp.allclose(out, ref, atol=1e-4, rtol=1e-4), (out, ref)

  print("KERNEL_OK")
</pallas_src>

<mosaic_0001>
module attributes {stable_mosaic.version = 11 : i64} {
  func.func @lstm_fc_kernel(%arg0: i32, %arg1: memref<2x4xi32, #tpu.memory_space<smem>>, %arg2: memref<2x4xi32, #tpu.memory_space<smem>>, %arg3: memref<8x128xf32, #tpu.memory_space<vmem>>, %arg4: memref<8x128xf32, #tpu.memory_space<vmem>>, %arg5: memref<128x512xf32, #tpu.memory_space<vmem>>, %arg6: memref<128x512xf32, #tpu.memory_space<vmem>>, %arg7: memref<1x512xf32, #tpu.memory_space<vmem>>, %arg8: memref<8x1x128xf32, #tpu.memory_space<vmem>>, %arg9: memref<1x1xf32, #tpu.memory_space<vmem>>, %arg10: memref<8x1xf32, #tpu.memory_space<vmem>>, %arg11: memref<64x128xf32, #tpu.memory_space<vmem>>) attributes {dimension_semantics = [#tpu.dimension_semantics<arbitrary>], iteration_bounds = array<i64: 1>, scalar_prefetch = 2 : i64, scratch_operands = 1 : i64, tpu.core_type = #tpu.core_type<tc>, window_params = [{pipeline_mode = #tpu.pipeline_mode<synchronous>, transform_indices = @transform_0, window_bounds = array<i64: 8, 128>}, {pipeline_mode = #tpu.pipeline_mode<synchronous>, transform_indices = @transform_1, window_bounds = array<i64: 8, 128>}, {pipeline_mode = #tpu.pipeline_mode<synchronous>, transform_indices = @transform_2, window_bounds = array<i64: 128, 512>}, {pipeline_mode = #tpu.pipeline_mode<synchronous>, transform_indices = @transform_3, window_bounds = array<i64: 128, 512>}, {pipeline_mode = #tpu.pipeline_mode<synchronous>, transform_indices = @transform_4, window_bounds = array<i64: 1, 512>}, {pipeline_mode = #tpu.pipeline_mode<synchronous>, transform_indices = @transform_5, window_bounds = array<i64: 8, 1, 128>}, {pipeline_mode = #tpu.pipeline_mode<synchronous>, transform_indices = @transform_6, window_bounds = array<i64: 1, 1>}, {pipeline_mode = #tpu.pipeline_mode<synchronous>, transform_indices = @transform_7, window_bounds = array<i64: 8, 1>}]} {
    %cst = arith.constant 0.000000e+00 : f32
    %0 = vector.broadcast %cst : f32 to vector<64x128xf32>
    %c0 = arith.constant 0 : index
    %c0_0 = arith.constant 0 : index
    %1 = vector.load %arg11[%c0, %c0_0] : memref<64x128xf32, #tpu.memory_space<vmem>>, vector<64x128xf32>
    tpu.vector_store %arg11[%c0, %c0_0], %0 {strides = array<i32>} : memref<64x128xf32, #tpu.memory_space<vmem>>, vector<64x128xf32>,
    %c0_1 = arith.constant 0 : index
    %c0_2 = arith.constant 0 : index
    %2 = memref.load %arg1[%c0_1, %c0_2] : memref<2x4xi32, #tpu.memory_space<smem>>
    %3 = arith.index_cast %2 : i32 to index
    %c0_3 = arith.constant 0 : index
    %4 = vector.load %arg3[%3, %c0_3] : memref<8x128xf32, #tpu.memory_space<vmem>>, vector<1x128xf32>
    %c0_4 = arith.constant 0 : index
    %c0_5 = arith.constant 0 : index
    %5 = vector.load %arg11[%c0_4, %c0_5] : memref<64x128xf32, #tpu.memory_space<vmem>>, vector<1x128xf32>
    tpu.vector_store %arg11[%c0_4, %c0_5], %4 {strides = array<i32>} : memref<64x128xf32, #tpu.memory_space<vmem>>, vector<1x128xf32>,
    %c1 = arith.constant 1 : index
    %c0_6 = arith.constant 0 : index
    %6 = memref.load %arg1[%c1, %c0_6] : memref<2x4xi32, #tpu.memory_space<smem>>
    %7 = arith.index_cast %6 : i32 to index
    %c0_7 = arith.constant 0 : index
    %8 = vector.load %arg3[%7, %c0_7] : memref<8x128xf32, #tpu.memory_space<vmem>>, vector<1x128xf32>
    %c1_8 = arith.constant 1 : index
    %c0_9 = arith.constant 0 : index
    %9 = vector.load %arg11[%c1_8, %c0_9] : memref<64x128xf32, #tpu.memory_space<vmem>>, vector<1x128xf32>
    tpu.vector_store %arg11[%c1_8, %c0_9], %8 {strides = array<i32>} : memref<64x128xf32, #tpu.memory_space<vmem>>, vector<1x128xf32>,
    %c0_10 = arith.constant 0 : index
    %c1_11 = arith.constant 1 : index
    %10 = memref.load %arg1[%c0_10, %c1_11] : memref<2x4xi32, #tpu.memory_space<smem>>
    %11 = arith.index_cast %10 : i32 to index
    %c0_12 = arith.constant 0 : index
    %12 = vector.load %arg3[%11, %c0_12] : memref<8x128xf32, #tpu.memory_space<vmem>>, vector<1x128xf32>
    %c8 = arith.constant 8 : index
    %c0_13 = arith.constant 0 : index
    %13 = vector.load %arg11[%c8, %c0_13] : memref<64x128xf32, #tpu.memory_space<vmem>>, vector<1x128xf32>
    tpu.vector_store %arg11[%c8, %c0_13], %12 {strides = array<i32>} : memref<64x128xf32, #tpu.memory_space<vmem>>, vector<1x128xf32>,
    %c1_14 = arith.constant 1 : index
    %c1_15 = arith.constant 1 : index
    %14 = memref.load %arg1[%c1_14, %c1_15] : memref<2x4xi32, #tpu.memory_space<smem>>
    %15 = arith.index_cast %14 : i32 to index
    %c0_16 = arith.constant 0 : index
    %16 = vector.load %arg3[%15, %c0_16] : memref<8x128xf32, #tpu.memory_space<vmem>>, vector<1x128xf32>
    %c9 = arith.constant 9 : index
    %c0_17 = arith.constant 0 : index
    %17 = vector.load %arg11[%c9, %c0_17] : memref<64x128xf32, #tpu.memory_space<vmem>>, vector<1x128xf32>
    tpu.vector_store %arg11[%c9, %c0_17], %16 {strides = array<i32>} : memref<64x128xf32, #tpu.memory_space<vmem>>, vector<1x128xf32>,
    %c0_18 = arith.constant 0 : index
    %c2 = arith.constant 2 : index
    %18 = memref.load %arg1[%c0_18, %c2] : memref<2x4xi32, #tpu.memory_space<smem>>
    %19 = arith.index_cast %18 : i32 to index
    %c0_19 = arith.constant 0 : index
    %20 = vector.load %arg3[%19, %c0_19] : memref<8x128xf32, #tpu.memory_space<vmem>>, vector<1x128xf32>
    %c16 = arith.constant 16 : index
    %c0_20 = arith.constant 0 : index
    %21 = vector.load %arg11[%c16, %c0_20] : memref<64x128xf32, #tpu.memory_space<vmem>>, vector<1x128xf32>
    tpu.vector_store %arg11[%c16, %c0_20], %20 {strides = array<i32>} : memref<64x128xf32, #tpu.memory_space<vmem>>, vector<1x128xf32>,
    %c1_21 = arith.constant 1 : index
    %c2_22 = arith.constant 2 : index
    %22 = memref.load %arg1[%c1_21, %c2_22] : memref<2x4xi32, #tpu.memory_space<smem>>
    %23 = arith.index_cast %22 : i32 to index
    %c0_23 = arith.constant 0 : index
    %24 = vector.load %arg3[%23, %c0_23] : memref<8x128xf32, #tpu.memory_space<vmem>>, vector<1x128xf32>
    %c17 = arith.constant 17 : index
    %c0_24 = arith.constant 0 : index
    %25 = vector.load %arg11[%c17, %c0_24] : memref<64x128xf32, #tpu.memory_space<vmem>>, vector<1x128xf32>
    tpu.vector_store %arg11[%c17, %c0_24], %24 {strides = array<i32>} : memref<64x128xf32, #tpu.memory_space<vmem>>, vector<1x128xf32>,
    %c0_25 = arith.constant 0 : index
    %c3 = arith.constant 3 : index
    %26 = memref.load %arg1[%c0_25, %c3] : memref<2x4xi32, #tpu.memory_space<smem>>
    %27 = arith.index_cast %26 : i32 to index
    %c0_26 = arith.constant 0 : index
    %28 = vector.load %arg3[%27, %c0_26] : memref<8x128xf32, #tpu.memory_space<vmem>>, vector<1x128xf32>
    %c24 = arith.constant 24 : index
    %c0_27 = arith.constant 0 : index
    %29 = vector.load %arg11[%c24, %c0_27] : memref<64x128xf32, #tpu.memory_space<vmem>>, vector<1x128xf32>
    tpu.vector_store %arg11[%c24, %c0_27], %28 {strides = array<i32>} : memref<64x128xf32, #tpu.memory_space<vmem>>, vector<1x128xf32>,
    %c1_28 = arith.constant 1 : index
    %c3_29 = arith.constant 3 : index
    %30 = memref.load %arg1[%c1_28, %c3_29] : memref<2x4xi32, #tpu.memory_space<smem>>
    %31 = arith.index_cast %30 : i32 to index
    %c0_30 = arith.constant 0 : index
    %32 = vector.load %arg3[%31, %c0_30] : memref<8x128xf32, #tpu.memory_space<vmem>>, vector<1x128xf32>
    %c25 = arith.constant 25 : index
    %c0_31 = arith.constant 0 : index
    %33 = vector.load %arg11[%c25, %c0_31] : memref<64x128xf32, #tpu.memory_space<vmem>>, vector<1x128xf32>
    tpu.vector_store %arg11[%c25, %c0_31], %32 {strides = array<i32>} : memref<64x128xf32, #tpu.memory_space<vmem>>, vector<1x128xf32>,
    %c0_32 = arith.constant 0 : index
    %c0_33 = arith.constant 0 : index
    %34 = memref.load %arg2[%c0_32, %c0_33] : memref<2x4xi32, #tpu.memory_space<smem>>
    %35 = arith.index_cast %34 : i32 to index
    %c0_34 = arith.constant 0 : index
    %36 = vector.load %arg4[%35, %c0_34] : memref<8x128xf32, #tpu.memory_space<vmem>>, vector<1x128xf32>
    %c32 = arith.constant 32 : index
    %c0_35 = arith.constant 0 : index
    %37 = vector.load %arg11[%c32, %c0_35] : memref<64x128xf32, #tpu.memory_space<vmem>>, vector<1x128xf32>
    tpu.vector_store %arg11[%c32, %c0_35], %36 {strides = array<i32>} : memref<64x128xf32, #tpu.memory_space<vmem>>, vector<1x128xf32>,
    %c1_36 = arith.constant 1 : index
    %c0_37 = arith.constant 0 : index
    %38 = memref.load %arg2[%c1_36, %c0_37] : memref<2x4xi32, #tpu.memory_space<smem>>
    %39 = arith.index_cast %38 : i32 to index
    %c0_38 = arith.constant 0 : index
    %40 = vector.load %arg4[%39, %c0_38] : memref<8x128xf32, #tpu.memory_space<vmem>>, vector<1x128xf32>
    %c33 = arith.constant 33 : index
    %c0_39 = arith.constant 0 : index
    %41 = vector.load %arg11[%c33, %c0_39] : memref<64x128xf32, #tpu.memory_space<vmem>>, vector<1x128xf32>
    tpu.vector_store %arg11[%c33, %c0_39], %40 {strides = array<i32>} : memref<64x128xf32, #tpu.memory_space<vmem>>, vector<1x128xf32>,
    %c0_40 = arith.constant 0 : index
    %c1_41 = arith.constant 1 : index
    %42 = memref.load %arg2[%c0_40, %c1_41] : memref<2x4xi32, #tpu.memory_space<smem>>
    %43 = arith.index_cast %42 : i32 to index
    %c0_42 = arith.constant 0 : index
    %44 = vector.load %arg4[%43, %c0_42] : memref<8x128xf32, #tpu.memory_space<vmem>>, vector<1x128xf32>
    %c40 = arith.constant 40 : index
    %c0_43 = arith.constant 0 : index
    %45 = vector.load %arg11[%c40, %c0_43] : memref<64x128xf32, #tpu.memory_space<vmem>>, vector<1x128xf32>
    tpu.vector_store %arg11[%c40, %c0_43], %44 {strides = array<i32>} : memref<64x128xf32, #tpu.memory_space<vmem>>, vector<1x128xf32>,
    %c1_44 = arith.constant 1 : index
    %c1_45 = arith.constant 1 : index
    %46 = memref.load %arg2[%c1_44, %c1_45] : memref<2x4xi32, #tpu.memory_space<smem>>
    %47 = arith.index_cast %46 : i32 to index
    %c0_46 = arith.constant 0 : index
    %48 = vector.load %arg4[%47, %c0_46] : memref<8x128xf32, #tpu.memory_space<vmem>>, vector<1x128xf32>
    %c41 = arith.constant 41 : index
    %c0_47 = arith.constant 0 : index
    %49 = vector.load %arg11[%c41, %c0_47] : memref<64x128xf32, #tpu.memory_space<vmem>>, vector<1x128xf32>
    tpu.vector_store %arg11[%c41, %c0_47], %48 {strides = array<i32>} : memref<64x128xf32, #tpu.memory_space<vmem>>, vector<1x128xf32>,
    %c0_48 = arith.constant 0 : index
    %c2_49 = arith.constant 2 : index
    %50 = memref.load %arg2[%c0_48, %c2_49] : memref<2x4xi32, #tpu.memory_space<smem>>
    %51 = arith.index_cast %50 : i32 to index
    %c0_50 = arith.constant 0 : index
    %52 = vector.load %arg4[%51, %c0_50] : memref<8x128xf32, #tpu.memory_space<vmem>>, vector<1x128xf32>
    %c48 = arith.constant 48 : index
    %c0_51 = arith.constant 0 : index
    %53 = vector.load %arg11[%c48, %c0_51] : memref<64x128xf32, #tpu.memory_space<vmem>>, vector<1x128xf32>
    tpu.vector_store %arg11[%c48, %c0_51], %52 {strides = array<i32>} : memref<64x128xf32, #tpu.memory_space<vmem>>, vector<1x128xf32>,
    %c1_52 = arith.constant 1 : index
    %c2_53 = arith.constant 2 : index
    %54 = memref.load %arg2[%c1_52, %c2_53] : memref<2x4xi32, #tpu.memory_space<smem>>
    %55 = arith.index_cast %54 : i32 to index
    %c0_54 = arith.constant 0 : index
    %56 = vector.load %arg4[%55, %c0_54] : memref<8x128xf32, #tpu.memory_space<vmem>>, vector<1x128xf32>
    %c49 = arith.constant 49 : index
    %c0_55 = arith.constant 0 : index
    %57 = vector.load %arg11[%c49, %c0_55] : memref<64x128xf32, #tpu.memory_space<vmem>>, vector<1x128xf32>
    tpu.vector_store %arg11[%c49, %c0_55], %56 {strides = array<i32>} : memref<64x128xf32, #tpu.memory_space<vmem>>, vector<1x128xf32>,
    %c0_56 = arith.constant 0 : index
    %c3_57 = arith.constant 3 : index
    %58 = memref.load %arg2[%c0_56, %c3_57] : memref<2x4xi32, #tpu.memory_space<smem>>
    %59 = arith.index_cast %58 : i32 to index
    %c0_58 = arith.constant 0 : index
    %60 = vector.load %arg4[%59, %c0_58] : memref<8x128xf32, #tpu.memory_space<vmem>>, vector<1x128xf32>
    %c56 = arith.constant 56 : index
    %c0_59 = arith.constant 0 : index
    %61 = vector.load %arg11[%c56, %c0_59] : memref<64x128xf32, #tpu.memory_space<vmem>>, vector<1x128xf32>
    tpu.vector_store %arg11[%c56, %c0_59], %60 {strides = array<i32>} : memref<64x128xf32, #tpu.memory_space<vmem>>, vector<1x128xf32>,
    %c1_60 = arith.constant 1 : index
    %c3_61 = arith.constant 3 : index
    %62 = memref.load %arg2[%c1_60, %c3_61] : memref<2x4xi32, #tpu.memory_space<smem>>
    %63 = arith.index_cast %62 : i32 to index
    %c0_62 = arith.constant 0 : index
    %64 = vector.load %arg4[%63, %c0_62] : memref<8x128xf32, #tpu.memory_space<vmem>>, vector<1x128xf32>
    %c57 = arith.constant 57 : index
    %c0_63 = arith.constant 0 : index
    %65 = vector.load %arg11[%c57, %c0_63] : memref<64x128xf32, #tpu.memory_space<vmem>>, vector<1x128xf32>
    tpu.vector_store %arg11[%c57, %c0_63], %64 {strides = array<i32>} : memref<64x128xf32, #tpu.memory_space<vmem>>, vector<1x128xf32>,
    %cst_64 = arith.constant 0.000000e+00 : f32
    %66 = vector.broadcast %cst_64 : f32 to vector<8x128xf32>
    %cst_65 = arith.constant 0.000000e+00 : f32
    %67 = vector.broadcast %cst_65 : f32 to vector<8x128xf32>
    %cst_66 = arith.constant 0.000000e+00 : f32
    %68 = vector.broadcast %cst_66 : f32 to vector<8x128xf32>
    %c0_67 = arith.constant 0 : index
    %c0_68 = arith.constant 0 : index
    %69 = vector.load %arg11[%c0_67, %c0_68] : memref<64x128xf32, #tpu.memory_space<vmem>>, vector<8x128xf32>
    %c0_69 = arith.constant 0 : index
    %c0_70 = arith.constant 0 : index
    %70 = vector.load %arg5[%c0_69, %c0_70] : memref<128x512xf32, #tpu.memory_space<vmem>>, vector<128x512xf32>
    %cst_71 = arith.constant dense<0.000000e+00> : vector<8x512xf32>
    %71 = tpu.matmul %69, %70, %cst_71 {dimension_numbers = #tpu.dot_dimension_numbers<[1], [0], [0], [1], [0, 0, 1, 1], [], []>} : vector<8x128xf32>, vector<128x512xf32>, vector<8x512xf32> -> vector<8x512xf32>
    %c0_72 = arith.constant 0 : index
    %c0_73 = arith.constant 0 : index
    %72 = vector.load %arg7[%c0_72, %c0_73] : memref<1x512xf32, #tpu.memory_space<vmem>>, vector<1x512xf32>
    %73 = vector.broadcast %72 : vector<1x512xf32> to vector<8x512xf32>
    %74 = arith.addf %71, %73 : vector<8x512xf32>
    %c0_74 = arith.constant 0 : index
    %c0_75 = arith.constant 0 : index
    %75 = vector.load %arg6[%c0_74, %c0_75] : memref<128x512xf32, #tpu.memory_space<vmem>>, vector<128x512xf32>
    %cst_76 = arith.constant dense<0.000000e+00> : vector<8x512xf32>
    %76 = tpu.matmul %66, %75, %cst_76 {dimension_numbers = #tpu.dot_dimension_numbers<[1], [0], [0], [1], [0, 0, 1, 1], [], []>} : vector<8x128xf32>, vector<128x512xf32>, vector<8x512xf32> -> vector<8x512xf32>
    %77 = arith.addf %74, %76 : vector<8x512xf32>
    %78 = vector.extract_strided_slice %77 {offsets = [0, 0], sizes = [8, 384], strides = [1, 1]} : vector<8x512xf32> to vector<8x384xf32>
    %79 = arith.negf %78 : vector<8x384xf32>
    %80 = math.exp %79 : vector<8x384xf32>
    %cst_77 = arith.constant 1.000000e+00 : f32
    %81 = vector.broadcast %cst_77 : f32 to vector<8x384xf32>
    %82 = arith.addf %81, %80 : vector<8x384xf32>
    %83 = arith.divf %81, %82 : vector<8x384xf32>
    %84 = vector.extract_strided_slice %83 {offsets = [0, 0], sizes = [8, 128], strides = [1, 1]} : vector<8x384xf32> to vector<8x128xf32>
    %85 = vector.extract_strided_slice %83 {offsets = [0, 128], sizes = [8, 128], strides = [1, 1]} : vector<8x384xf32> to vector<8x128xf32>
    %86 = vector.extract_strided_slice %83 {offsets = [0, 256], sizes = [8, 128], strides = [1, 1]} : vector<8x384xf32> to vector<8x128xf32>
    %87 = vector.extract_strided_slice %77 {offsets = [0, 384], sizes = [8, 128], strides = [1, 1]} : vector<8x512xf32> to vector<8x128xf32>
    %88 = math.tanh %87 : vector<8x128xf32>
    %89 = arith.mulf %85, %67 : vector<8x128xf32>
    %90 = arith.mulf %84, %88 : vector<8x128xf32>
    %91 = arith.addf %89, %90 : vector<8x128xf32>
    %92 = math.tanh %91 : vector<8x128xf32>
    %93 = arith.mulf %86, %92 : vector<8x128xf32>
    %c0_78 = arith.constant 0 : index
    %c0_79 = arith.constant 0 : index
    %c0_80 = arith.constant 0 : index
    %94 = vector.load %arg8[%c0_78, %c0_79, %c0_80] : memref<8x1x128xf32, #tpu.memory_space<vmem>>, vector<1x1x128xf32>
    %95 = vector.shape_cast %94 : vector<1x1x128xf32> to vector<1x128xf32>
    %96 = vector.broadcast %95 : vector<1x128xf32> to vector<8x128xf32>
    %97 = arith.mulf %93, %96 : vector<8x128xf32>
    %98 = arith.addf %68, %97 : vector<8x128xf32>
    %c8_81 = arith.constant 8 : index
    %c0_82 = arith.constant 0 : index
    %99 = vector.load %arg11[%c8_81, %c0_82] : memref<64x128xf32, #tpu.memory_space<vmem>>, vector<8x128xf32>
    %c0_83 = arith.constant 0 : index
    %c0_84 = arith.constant 0 : index
    %100 = vector.load %arg5[%c0_83, %c0_84] : memref<128x512xf32, #tpu.memory_space<vmem>>, vector<128x512xf32>
    %cst_85 = arith.constant dense<0.000000e+00> : vector<8x512xf32>
    %101 = tpu.matmul %99, %100, %cst_85 {dimension_numbers = #tpu.dot_dimension_numbers<[1], [0], [0], [1], [0, 0, 1, 1], [], []>} : vector<8x128xf32>, vector<128x512xf32>, vector<8x512xf32> -> vector<8x512xf32>
    %c0_86 = arith.constant 0 : index
    %c0_87 = arith.constant 0 : index
    %102 = vector.load %arg7[%c0_86, %c0_87] : memref<1x512xf32, #tpu.memory_space<vmem>>, vector<1x512xf32>
    %103 = vector.broadcast %102 : vector<1x512xf32> to vector<8x512xf32>
    %104 = arith.addf %101, %103 : vector<8x512xf32>
    %c0_88 = arith.constant 0 : index
    %c0_89 = arith.constant 0 : index
    %105 = vector.load %arg6[%c0_88, %c0_89] : memref<128x512xf32, #tpu.memory_space<vmem>>, vector<128x512xf32>
    %cst_90 = arith.constant dense<0.000000e+00> : vector<8x512xf32>
    %106 = tpu.matmul %93, %105, %cst_90 {dimension_numbers = #tpu.dot_dimension_numbers<[1], [0], [0], [1], [0, 0, 1, 1], [], []>} : vector<8x128xf32>, vector<128x512xf32>, vector<8x512xf32> -> vector<8x512xf32>
    %107 = arith.addf %104, %106 : vector<8x512xf32>
    %108 = vector.extract_strided_slice %107 {offsets = [0, 0], sizes = [8, 384], strides = [1, 1]} : vector<8x512xf32> to vector<8x384xf32>
    %109 = arith.negf %108 : vector<8x384xf32>
    %110 = math.exp %109 : vector<8x384xf32>
    %cst_91 = arith.constant 1.000000e+00 : f32
    %111 = vector.broadcast %cst_91 : f32 to vector<8x384xf32>
    %112 = arith.addf %111, %110 : vector<8x384xf32>
    %113 = arith.divf %111, %112 : vector<8x384xf32>
    %114 = vector.extract_strided_slice %113 {offsets = [0, 0], sizes = [8, 128], strides = [1, 1]} : vector<8x384xf32> to vector<8x128xf32>
    %115 = vector.extract_strided_slice %113 {offsets = [0, 128], sizes = [8, 128], strides = [1, 1]} : vector<8x384xf32> to vector<8x128xf32>
    %116 = vector.extract_strided_slice %113 {offsets = [0, 256], sizes = [8, 128], strides = [1, 1]} : vector<8x384xf32> to vector<8x128xf32>
    %117 = vector.extract_strided_slice %107 {offsets = [0, 384], sizes = [8, 128], strides = [1, 1]} : vector<8x512xf32> to vector<8x128xf32>
    %118 = math.tanh %117 : vector<8x128xf32>
    %119 = arith.mulf %115, %91 : vector<8x128xf32>
    %120 = arith.mulf %114, %118 : vector<8x128xf32>
    %121 = arith.addf %119, %120 : vector<8x128xf32>
    %122 = math.tanh %121 : vector<8x128xf32>
    %123 = arith.mulf %116, %122 : vector<8x128xf32>
    %c1_92 = arith.constant 1 : index
    %c0_93 = arith.constant 0 : index
    %c0_94 = arith.constant 0 : index
    %124 = vector.load %arg8[%c1_92, %c0_93, %c0_94] : memref<8x1x128xf32, #tpu.memory_space<vmem>>, vector<1x1x128xf32>
    %125 = vector.shape_cast %124 : vector<1x1x128xf32> to vector<1x128xf32>
    %126 = vector.broadcast %125 : vector<1x128xf32> to vector<8x128xf32>
    %127 = arith.mulf %123, %126 : vector<8x128xf32>
    %128 = arith.addf %98, %127 : vector<8x128xf32>
    %c16_95 = arith.constant 16 : index
    %c0_96 = arith.constant 0 : index
    %129 = vector.load %arg11[%c16_95, %c0_96] : memref<64x128xf32, #tpu.memory_space<vmem>>, vector<8x128xf32>
    %c0_97 = arith.constant 0 : index
    %c0_98 = arith.constant 0 : index
    %130 = vector.load %arg5[%c0_97, %c0_98] : memref<128x512xf32, #tpu.memory_space<vmem>>, vector<128x512xf32>
    %cst_99 = arith.constant dense<0.000000e+00> : vector<8x512xf32>
    %131 = tpu.matmul %129, %130, %cst_99 {dimension_numbers = #tpu.dot_dimension_numbers<[1], [0], [0], [1], [0, 0, 1, 1], [], []>} : vector<8x128xf32>, vector<128x512xf32>, vector<8x512xf32> -> vector<8x512xf32>
    %c0_100 = arith.constant 0 : index
    %c0_101 = arith.constant 0 : index
    %132 = vector.load %arg7[%c0_100, %c0_101] : memref<1x512xf32, #tpu.memory_space<vmem>>, vector<1x512xf32>
    %133 = vector.broadcast %132 : vector<1x512xf32> to vector<8x512xf32>
    %134 = arith.addf %131, %133 : vector<8x512xf32>
    %c0_102 = arith.constant 0 : index
    %c0_103 = arith.constant 0 : index
    %135 = vector.load %arg6[%c0_102, %c0_103] : memref<128x512xf32, #tpu.memory_space<vmem>>, vector<128x512xf32>
    %cst_104 = arith.constant dense<0.000000e+00> : vector<8x512xf32>
    %136 = tpu.matmul %123, %135, %cst_104 {dimension_numbers = #tpu.dot_dimension_numbers<[1], [0], [0], [1], [0, 0, 1, 1], [], []>} : vector<8x128xf32>, vector<128x512xf32>, vector<8x512xf32> -> vector<8x512xf32>
    %137 = arith.addf %134, %136 : vector<8x512xf32>
    %138 = vector.extract_strided_slice %137 {offsets = [0, 0], sizes = [8, 384], strides = [1, 1]} : vector<8x512xf32> to vector<8x384xf32>
    %139 = arith.negf %138 : vector<8x384xf32>
    %140 = math.exp %139 : vector<8x384xf32>
    %cst_105 = arith.constant 1.000000e+00 : f32
    %141 = vector.broadcast %cst_105 : f32 to vector<8x384xf32>
    %142 = arith.addf %141, %140 : vector<8x384xf32>
    %143 = arith.divf %141, %142 : vector<8x384xf32>
    %144 = vector.extract_strided_slice %143 {offsets = [0, 0], sizes = [8, 128], strides = [1, 1]} : vector<8x384xf32> to vector<8x128xf32>
    %145 = vector.extract_strided_slice %143 {offsets = [0, 128], sizes = [8, 128], strides = [1, 1]} : vector<8x384xf32> to vector<8x128xf32>
    %146 = vector.extract_strided_slice %143 {offsets = [0, 256], sizes = [8, 128], strides = [1, 1]} : vector<8x384xf32> to vector<8x128xf32>
    %147 = vector.extract_strided_slice %137 {offsets = [0, 384], sizes = [8, 128], strides = [1, 1]} : vector<8x512xf32> to vector<8x128xf32>
    %148 = math.tanh %147 : vector<8x128xf32>
    %149 = arith.mulf %145, %121 : vector<8x128xf32>
    %150 = arith.mulf %144, %148 : vector<8x128xf32>
    %151 = arith.addf %149, %150 : vector<8x128xf32>
    %152 = math.tanh %151 : vector<8x128xf32>
    %153 = arith.mulf %146, %152 : vector<8x128xf32>
    %c2_106 = arith.constant 2 : index
    %c0_107 = arith.constant 0 : index
    %c0_108 = arith.constant 0 : index
    %154 = vector.load %arg8[%c2_106, %c0_107, %c0_108] : memref<8x1x128xf32, #tpu.memory_space<vmem>>, vector<1x1x128xf32>
    %155 = vector.shape_cast %154 : vector<1x1x128xf32> to vector<1x128xf32>
    %156 = vector.broadcast %155 : vector<1x128xf32> to vector<8x128xf32>
    %157 = arith.mulf %153, %156 : vector<8x128xf32>
    %158 = arith.addf %128, %157 : vector<8x128xf32>
    %c24_109 = arith.constant 24 : index
    %c0_110 = arith.constant 0 : index
    %159 = vector.load %arg11[%c24_109, %c0_110] : memref<64x128xf32, #tpu.memory_space<vmem>>, vector<8x128xf32>
    %c0_111 = arith.constant 0 : index
    %c0_112 = arith.constant 0 : index
    %160 = vector.load %arg5[%c0_111, %c0_112] : memref<128x512xf32, #tpu.memory_space<vmem>>, vector<128x512xf32>
    %cst_113 = arith.constant dense<0.000000e+00> : vector<8x512xf32>
    %161 = tpu.matmul %159, %160, %cst_113 {dimension_numbers = #tpu.dot_dimension_numbers<[1], [0], [0], [1], [0, 0, 1, 1], [], []>} : vector<8x128xf32>, vector<128x512xf32>, vector<8x512xf32> -> vector<8x512xf32>
    %c0_114 = arith.constant 0 : index
    %c0_115 = arith.constant 0 : index
    %162 = vector.load %arg7[%c0_114, %c0_115] : memref<1x512xf32, #tpu.memory_space<vmem>>, vector<1x512xf32>
    %163 = vector.broadcast %162 : vector<1x512xf32> to vector<8x512xf32>
    %164 = arith.addf %161, %163 : vector<8x512xf32>
    %c0_116 = arith.constant 0 : index
    %c0_117 = arith.constant 0 : index
    %165 = vector.load %arg6[%c0_116, %c0_117] : memref<128x512xf32, #tpu.memory_space<vmem>>, vector<128x512xf32>
    %cst_118 = arith.constant dense<0.000000e+00> : vector<8x512xf32>
    %166 = tpu.matmul %153, %165, %cst_118 {dimension_numbers = #tpu.dot_dimension_numbers<[1], [0], [0], [1], [0, 0, 1, 1], [], []>} : vector<8x128xf32>, vector<128x512xf32>, vector<8x512xf32> -> vector<8x512xf32>
    %167 = arith.addf %164, %166 : vector<8x512xf32>
    %168 = vector.extract_strided_slice %167 {offsets = [0, 0], sizes = [8, 384], strides = [1, 1]} : vector<8x512xf32> to vector<8x384xf32>
    %169 = arith.negf %168 : vector<8x384xf32>
    %170 = math.exp %169 : vector<8x384xf32>
    %cst_119 = arith.constant 1.000000e+00 : f32
    %171 = vector.broadcast %cst_119 : f32 to vector<8x384xf32>
    %172 = arith.addf %171, %170 : vector<8x384xf32>
    %173 = arith.divf %171, %172 : vector<8x384xf32>
    %174 = vector.extract_strided_slice %173 {offsets = [0, 0], sizes = [8, 128], strides = [1, 1]} : vector<8x384xf32> to vector<8x128xf32>
    %175 = vector.extract_strided_slice %173 {offsets = [0, 128], sizes = [8, 128], strides = [1, 1]} : vector<8x384xf32> to vector<8x128xf32>
    %176 = vector.extract_strided_slice %173 {offsets = [0, 256], sizes = [8, 128], strides = [1, 1]} : vector<8x384xf32> to vector<8x128xf32>
    %177 = vector.extract_strided_slice %167 {offsets = [0, 384], sizes = [8, 128], strides = [1, 1]} : vector<8x512xf32> to vector<8x128xf32>
    %178 = math.tanh %177 : vector<8x128xf32>
    %179 = arith.mulf %175, %151 : vector<8x128xf32>
    %180 = arith.mulf %174, %178 : vector<8x128xf32>
    %181 = arith.addf %179, %180 : vector<8x128xf32>
    %182 = math.tanh %181 : vector<8x128xf32>
    %183 = arith.mulf %176, %182 : vector<8x128xf32>
    %c3_120 = arith.constant 3 : index
    %c0_121 = arith.constant 0 : index
    %c0_122 = arith.constant 0 : index
    %184 = vector.load %arg8[%c3_120, %c0_121, %c0_122] : memref<8x1x128xf32, #tpu.memory_space<vmem>>, vector<1x1x128xf32>
    %185 = vector.shape_cast %184 : vector<1x1x128xf32> to vector<1x128xf32>
    %186 = vector.broadcast %185 : vector<1x128xf32> to vector<8x128xf32>
    %187 = arith.mulf %183, %186 : vector<8x128xf32>
    %188 = arith.addf %158, %187 : vector<8x128xf32>
    %c32_123 = arith.constant 32 : index
    %c0_124 = arith.constant 0 : index
    %189 = vector.load %arg11[%c32_123, %c0_124] : memref<64x128xf32, #tpu.memory_space<vmem>>, vector<8x128xf32>
    %c0_125 = arith.constant 0 : index
    %c0_126 = arith.constant 0 : index
    %190 = vector.load %arg5[%c0_125, %c0_126] : memref<128x512xf32, #tpu.memory_space<vmem>>, vector<128x512xf32>
    %cst_127 = arith.constant dense<0.000000e+00> : vector<8x512xf32>
    %191 = tpu.matmul %189, %190, %cst_127 {dimension_numbers = #tpu.dot_dimension_numbers<[1], [0], [0], [1], [0, 0, 1, 1], [], []>} : vector<8x128xf32>, vector<128x512xf32>, vector<8x512xf32> -> vector<8x512xf32>
    %c0_128 = arith.constant 0 : index
    %c0_129 = arith.constant 0 : index
    %192 = vector.load %arg7[%c0_128, %c0_129] : memref<1x512xf32, #tpu.memory_space<vmem>>, vector<1x512xf32>
    %193 = vector.broadcast %192 : vector<1x512xf32> to vector<8x512xf32>
    %194 = arith.addf %191, %193 : vector<8x512xf32>
    %c0_130 = arith.constant 0 : index
    %c0_131 = arith.constant 0 : index
    %195 = vector.load %arg6[%c0_130, %c0_131] : memref<128x512xf32, #tpu.memory_space<vmem>>, vector<128x512xf32>
    %cst_132 = arith.constant dense<0.000000e+00> : vector<8x512xf32>
    %196 = tpu.matmul %183, %195, %cst_132 {dimension_numbers = #tpu.dot_dimension_numbers<[1], [0], [0], [1], [0, 0, 1, 1], [], []>} : vector<8x128xf32>, vector<128x512xf32>, vector<8x512xf32> -> vector<8x512xf32>
    %197 = arith.addf %194, %196 : vector<8x512xf32>
    %198 = vector.extract_strided_slice %197 {offsets = [0, 0], sizes = [8, 384], strides = [1, 1]} : vector<8x512xf32> to vector<8x384xf32>
    %199 = arith.negf %198 : vector<8x384xf32>
    %200 = math.exp %199 : vector<8x384xf32>
    %cst_133 = arith.constant 1.000000e+00 : f32
    %201 = vector.broadcast %cst_133 : f32 to vector<8x384xf32>
    %202 = arith.addf %201, %200 : vector<8x384xf32>
    %203 = arith.divf %201, %202 : vector<8x384xf32>
    %204 = vector.extract_strided_slice %203 {offsets = [0, 0], sizes = [8, 128], strides = [1, 1]} : vector<8x384xf32> to vector<8x128xf32>
    %205 = vector.extract_strided_slice %203 {offsets = [0, 128], sizes = [8, 128], strides = [1, 1]} : vector<8x384xf32> to vector<8x128xf32>
    %206 = vector.extract_strided_slice %203 {offsets = [0, 256], sizes = [8, 128], strides = [1, 1]} : vector<8x384xf32> to vector<8x128xf32>
    %207 = vector.extract_strided_slice %197 {offsets = [0, 384], sizes = [8, 128], strides = [1, 1]} : vector<8x512xf32> to vector<8x128xf32>
    %208 = math.tanh %207 : vector<8x128xf32>
    %209 = arith.mulf %205, %181 : vector<8x128xf32>
    %210 = arith.mulf %204, %208 : vector<8x128xf32>
    %211 = arith.addf %209, %210 : vector<8x128xf32>
    %212 = math.tanh %211 : vector<8x128xf32>
    %213 = arith.mulf %206, %212 : vector<8x128xf32>
    %c4 = arith.constant 4 : index
    %c0_134 = arith.constant 0 : index
    %c0_135 = arith.constant 0 : index
    %214 = vector.load %arg8[%c4, %c0_134, %c0_135] : memref<8x1x128xf32, #tpu.memory_space<vmem>>, vector<1x1x128xf32>
    %215 = vector.shape_cast %214 : vector<1x1x128xf32> to vector<1x128xf32>
    %216 = vector.broadcast %215 : vector<1x128xf32> to vector<8x128xf32>
    %217 = arith.mulf %213, %216 : vector<8x128xf32>
    %218 = arith.addf %188, %217 : vector<8x128xf32>
    %c40_136 = arith.constant 40 : index
    %c0_137 = arith.constant 0 : index
    %219 = vector.load %arg11[%c40_136, %c0_137] : memref<64x128xf32, #tpu.memory_space<vmem>>, vector<8x128xf32>
    %c0_138 = arith.constant 0 : index
    %c0_139 = arith.constant 0 : index
    %220 = vector.load %arg5[%c0_138, %c0_139] : memref<128x512xf32, #tpu.memory_space<vmem>>, vector<128x512xf32>
    %cst_140 = arith.constant dense<0.000000e+00> : vector<8x512xf32>
    %221 = tpu.matmul %219, %220, %cst_140 {dimension_numbers = #tpu.dot_dimension_numbers<[1], [0], [0], [1], [0, 0, 1, 1], [], []>} : vector<8x128xf32>, vector<128x512xf32>, vector<8x512xf32> -> vector<8x512xf32>
    %c0_141 = arith.constant 0 : index
    %c0_142 = arith.constant 0 : index
    %222 = vector.load %arg7[%c0_141, %c0_142] : memref<1x512xf32, #tpu.memory_space<vmem>>, vector<1x512xf32>
    %223 = vector.broadcast %222 : vector<1x512xf32> to vector<8x512xf32>
    %224 = arith.addf %221, %223 : vector<8x512xf32>
    %c0_143 = arith.constant 0 : index
    %c0_144 = arith.constant 0 : index
    %225 = vector.load %arg6[%c0_143, %c0_144] : memref<128x512xf32, #tpu.memory_space<vmem>>, vector<128x512xf32>
    %cst_145 = arith.constant dense<0.000000e+00> : vector<8x512xf32>
    %226 = tpu.matmul %213, %225, %cst_145 {dimension_numbers = #tpu.dot_dimension_numbers<[1], [0], [0], [1], [0, 0, 1, 1], [], []>} : vector<8x128xf32>, vector<128x512xf32>, vector<8x512xf32> -> vector<8x512xf32>
    %227 = arith.addf %224, %226 : vector<8x512xf32>
    %228 = vector.extract_strided_slice %227 {offsets = [0, 0], sizes = [8, 384], strides = [1, 1]} : vector<8x512xf32> to vector<8x384xf32>
    %229 = arith.negf %228 : vector<8x384xf32>
    %230 = math.exp %229 : vector<8x384xf32>
    %cst_146 = arith.constant 1.000000e+00 : f32
    %231 = vector.broadcast %cst_146 : f32 to vector<8x384xf32>
    %232 = arith.addf %231, %230 : vector<8x384xf32>
    %233 = arith.divf %231, %232 : vector<8x384xf32>
    %234 = vector.extract_strided_slice %233 {offsets = [0, 0], sizes = [8, 128], strides = [1, 1]} : vector<8x384xf32> to vector<8x128xf32>
    %235 = vector.extract_strided_slice %233 {offsets = [0, 128], sizes = [8, 128], strides = [1, 1]} : vector<8x384xf32> to vector<8x128xf32>
    %236 = vector.extract_strided_slice %233 {offsets = [0, 256], sizes = [8, 128], strides = [1, 1]} : vector<8x384xf32> to vector<8x128xf32>
    %237 = vector.extract_strided_slice %227 {offsets = [0, 384], sizes = [8, 128], strides = [1, 1]} : vector<8x512xf32> to vector<8x128xf32>
    %238 = math.tanh %237 : vector<8x128xf32>
    %239 = arith.mulf %235, %211 : vector<8x128xf32>
    %240 = arith.mulf %234, %238 : vector<8x128xf32>
    %241 = arith.addf %239, %240 : vector<8x128xf32>
    %242 = math.tanh %241 : vector<8x128xf32>
    %243 = arith.mulf %236, %242 : vector<8x128xf32>
    %c5 = arith.constant 5 : index
    %c0_147 = arith.constant 0 : index
    %c0_148 = arith.constant 0 : index
    %244 = vector.load %arg8[%c5, %c0_147, %c0_148] : memref<8x1x128xf32, #tpu.memory_space<vmem>>, vector<1x1x128xf32>
    %245 = vector.shape_cast %244 : vector<1x1x128xf32> to vector<1x128xf32>
    %246 = vector.broadcast %245 : vector<1x128xf32> to vector<8x128xf32>
    %247 = arith.mulf %243, %246 : vector<8x128xf32>
    %248 = arith.addf %218, %247 : vector<8x128xf32>
    %c48_149 = arith.constant 48 : index
    %c0_150 = arith.constant 0 : index
    %249 = vector.load %arg11[%c48_149, %c0_150] : memref<64x128xf32, #tpu.memory_space<vmem>>, vector<8x128xf32>
    %c0_151 = arith.constant 0 : index
    %c0_152 = arith.constant 0 : index
    %250 = vector.load %arg5[%c0_151, %c0_152] : memref<128x512xf32, #tpu.memory_space<vmem>>, vector<128x512xf32>
    %cst_153 = arith.constant dense<0.000000e+00> : vector<8x512xf32>
    %251 = tpu.matmul %249, %250, %cst_153 {dimension_numbers = #tpu.dot_dimension_numbers<[1], [0], [0], [1], [0, 0, 1, 1], [], []>} : vector<8x128xf32>, vector<128x512xf32>, vector<8x512xf32> -> vector<8x512xf32>
    %c0_154 = arith.constant 0 : index
    %c0_155 = arith.constant 0 : index
    %252 = vector.load %arg7[%c0_154, %c0_155] : memref<1x512xf32, #tpu.memory_space<vmem>>, vector<1x512xf32>
    %253 = vector.broadcast %252 : vector<1x512xf32> to vector<8x512xf32>
    %254 = arith.addf %251, %253 : vector<8x512xf32>
    %c0_156 = arith.constant 0 : index
    %c0_157 = arith.constant 0 : index
    %255 = vector.load %arg6[%c0_156, %c0_157] : memref<128x512xf32, #tpu.memory_space<vmem>>, vector<128x512xf32>
    %cst_158 = arith.constant dense<0.000000e+00> : vector<8x512xf32>
    %256 = tpu.matmul %243, %255, %cst_158 {dimension_numbers = #tpu.dot_dimension_numbers<[1], [0], [0], [1], [0, 0, 1, 1], [], []>} : vector<8x128xf32>, vector<128x512xf32>, vector<8x512xf32> -> vector<8x512xf32>
    %257 = arith.addf %254, %256 : vector<8x512xf32>
    %258 = vector.extract_strided_slice %257 {offsets = [0, 0], sizes = [8, 384], strides = [1, 1]} : vector<8x512xf32> to vector<8x384xf32>
    %259 = arith.negf %258 : vector<8x384xf32>
    %260 = math.exp %259 : vector<8x384xf32>
    %cst_159 = arith.constant 1.000000e+00 : f32
    %261 = vector.broadcast %cst_159 : f32 to vector<8x384xf32>
    %262 = arith.addf %261, %260 : vector<8x384xf32>
    %263 = arith.divf %261, %262 : vector<8x384xf32>
    %264 = vector.extract_strided_slice %263 {offsets = [0, 0], sizes = [8, 128], strides = [1, 1]} : vector<8x384xf32> to vector<8x128xf32>
    %265 = vector.extract_strided_slice %263 {offsets = [0, 128], sizes = [8, 128], strides = [1, 1]} : vector<8x384xf32> to vector<8x128xf32>
    %266 = vector.extract_strided_slice %263 {offsets = [0, 256], sizes = [8, 128], strides = [1, 1]} : vector<8x384xf32> to vector<8x128xf32>
    %267 = vector.extract_strided_slice %257 {offsets = [0, 384], sizes = [8, 128], strides = [1, 1]} : vector<8x512xf32> to vector<8x128xf32>
    %268 = math.tanh %267 : vector<8x128xf32>
    %269 = arith.mulf %265, %241 : vector<8x128xf32>
    %270 = arith.mulf %264, %268 : vector<8x128xf32>
    %271 = arith.addf %269, %270 : vector<8x128xf32>
    %272 = math.tanh %271 : vector<8x128xf32>
    %273 = arith.mulf %266, %272 : vector<8x128xf32>
    %c6 = arith.constant 6 : index
    %c0_160 = arith.constant 0 : index
    %c0_161 = arith.constant 0 : index
    %274 = vector.load %arg8[%c6, %c0_160, %c0_161] : memref<8x1x128xf32, #tpu.memory_space<vmem>>, vector<1x1x128xf32>
    %275 = vector.shape_cast %274 : vector<1x1x128xf32> to vector<1x128xf32>
    %276 = vector.broadcast %275 : vector<1x128xf32> to vector<8x128xf32>
    %277 = arith.mulf %273, %276 : vector<8x128xf32>
    %278 = arith.addf %248, %277 : vector<8x128xf32>
    %c56_162 = arith.constant 56 : index
    %c0_163 = arith.constant 0 : index
    %279 = vector.load %arg11[%c56_162, %c0_163] : memref<64x128xf32, #tpu.memory_space<vmem>>, vector<8x128xf32>
    %c0_164 = arith.constant 0 : index
    %c0_165 = arith.constant 0 : index
    %280 = vector.load %arg5[%c0_164, %c0_165] : memref<128x512xf32, #tpu.memory_space<vmem>>, vector<128x512xf32>
    %cst_166 = arith.constant dense<0.000000e+00> : vector<8x512xf32>
    %281 = tpu.matmul %279, %280, %cst_166 {dimension_numbers = #tpu.dot_dimension_numbers<[1], [0], [0], [1], [0, 0, 1, 1], [], []>} : vector<8x128xf32>, vector<128x512xf32>, vector<8x512xf32> -> vector<8x512xf32>
    %c0_167 = arith.constant 0 : index
    %c0_168 = arith.constant 0 : index
    %282 = vector.load %arg7[%c0_167, %c0_168] : memref<1x512xf32, #tpu.memory_space<vmem>>, vector<1x512xf32>
    %283 = vector.broadcast %282 : vector<1x512xf32> to vector<8x512xf32>
    %284 = arith.addf %281, %283 : vector<8x512xf32>
    %c0_169 = arith.constant 0 : index
    %c0_170 = arith.constant 0 : index
    %285 = vector.load %arg6[%c0_169, %c0_170] : memref<128x512xf32, #tpu.memory_space<vmem>>, vector<128x512xf32>
    %cst_171 = arith.constant dense<0.000000e+00> : vector<8x512xf32>
    %286 = tpu.matmul %273, %285, %cst_171 {dimension_numbers = #tpu.dot_dimension_numbers<[1], [0], [0], [1], [0, 0, 1, 1], [], []>} : vector<8x128xf32>, vector<128x512xf32>, vector<8x512xf32> -> vector<8x512xf32>
    %287 = arith.addf %284, %286 : vector<8x512xf32>
    %288 = vector.extract_strided_slice %287 {offsets = [0, 0], sizes = [8, 384], strides = [1, 1]} : vector<8x512xf32> to vector<8x384xf32>
    %289 = arith.negf %288 : vector<8x384xf32>
    %290 = math.exp %289 : vector<8x384xf32>
    %cst_172 = arith.constant 1.000000e+00 : f32
    %291 = vector.broadcast %cst_172 : f32 to vector<8x384xf32>
    %292 = arith.addf %291, %290 : vector<8x384xf32>
    %293 = arith.divf %291, %292 : vector<8x384xf32>
    %294 = vector.extract_strided_slice %293 {offsets = [0, 0], sizes = [8, 128], strides = [1, 1]} : vector<8x384xf32> to vector<8x128xf32>
    %295 = vector.extract_strided_slice %293 {offsets = [0, 128], sizes = [8, 128], strides = [1, 1]} : vector<8x384xf32> to vector<8x128xf32>
    %296 = vector.extract_strided_slice %293 {offsets = [0, 256], sizes = [8, 128], strides = [1, 1]} : vector<8x384xf32> to vector<8x128xf32>
    %297 = vector.extract_strided_slice %287 {offsets = [0, 384], sizes = [8, 128], strides = [1, 1]} : vector<8x512xf32> to vector<8x128xf32>
    %298 = math.tanh %297 : vector<8x128xf32>
    %299 = arith.mulf %295, %271 : vector<8x128xf32>
    %300 = arith.mulf %294, %298 : vector<8x128xf32>
    %301 = arith.addf %299, %300 : vector<8x128xf32>
    %302 = math.tanh %301 : vector<8x128xf32>
    %303 = arith.mulf %296, %302 : vector<8x128xf32>
    %c7 = arith.constant 7 : index
    %c0_173 = arith.constant 0 : index
    %c0_174 = arith.constant 0 : index
    %304 = vector.load %arg8[%c7, %c0_173, %c0_174] : memref<8x1x128xf32, #tpu.memory_space<vmem>>, vector<1x1x128xf32>
    %305 = vector.shape_cast %304 : vector<1x1x128xf32> to vector<1x128xf32>
    %306 = vector.broadcast %305 : vector<1x128xf32> to vector<8x128xf32>
    %307 = arith.mulf %303, %306 : vector<8x128xf32>
    %308 = arith.addf %278, %307 : vector<8x128xf32>
    %cst_175 = arith.constant dense<0.000000e+00> : vector<8xf32>
    %309 = vector.multi_reduction <add>, %308, %cst_175 [1] : vector<8x128xf32> to vector<8xf32>
    %310 = vector.shape_cast %309 : vector<8xf32> to vector<8x1xf32>
    %c0_176 = arith.constant 0 : index
    %c0_177 = arith.constant 0 : index
    %311 = vector.load %arg9[%c0_176, %c0_177] : memref<1x1xf32, #tpu.memory_space<vmem>>, vector<1x1xf32>
    %312 = vector.broadcast %311 : vector<1x1xf32> to vector<8x1xf32>
    %313 = arith.addf %310, %312 : vector<8x1xf32>
    %c0_178 = arith.constant 0 : index
    %c0_179 = arith.constant 0 : index
    %314 = vector.load %arg10[%c0_178, %c0_179] : memref<8x1xf32, #tpu.memory_space<vmem>>, vector<8x1xf32>
    tpu.vector_store %arg10[%c0_178, %c0_179], %313 {strides = array<i32>} : memref<8x1xf32, #tpu.memory_space<vmem>>, vector<8x1xf32>,
    return
  }
  func.func @transform_0(%arg0: i32, %arg1: memref<2x4xi32, #tpu.memory_space<smem>>, %arg2: memref<2x4xi32, #tpu.memory_space<smem>>) -> (i32, i32) {
    %c0_i32 = arith.constant 0 : i32
    %c0_i32_0 = arith.constant 0 : i32
    %c0_i32_1 = arith.constant 0 : i32
    return %c0_i32, %c0_i32_0 : i32, i32
  }
  func.func @transform_1(%arg0: i32, %arg1: memref<2x4xi32, #tpu.memory_space<smem>>, %arg2: memref<2x4xi32, #tpu.memory_space<smem>>) -> (i32, i32) {
    %c0_i32 = arith.constant 0 : i32
    %c0_i32_0 = arith.constant 0 : i32
    %c0_i32_1 = arith.constant 0 : i32
    return %c0_i32, %c0_i32_0 : i32, i32
  }
  func.func @transform_2(%arg0: i32, %arg1: memref<2x4xi32, #tpu.memory_space<smem>>, %arg2: memref<2x4xi32, #tpu.memory_space<smem>>) -> (i32, i32) {
    %c0_i32 = arith.constant 0 : i32
    %c0_i32_0 = arith.constant 0 : i32
    %c0_i32_1 = arith.constant 0 : i32
    return %c0_i32, %c0_i32_0 : i32, i32
  }
  func.func @transform_3(%arg0: i32, %arg1: memref<2x4xi32, #tpu.memory_space<smem>>, %arg2: memref<2x4xi32, #tpu.memory_space<smem>>) -> (i32, i32) {
    %c0_i32 = arith.constant 0 : i32
    %c0_i32_0 = arith.constant 0 : i32
    %c0_i32_1 = arith.constant 0 : i32
    return %c0_i32, %c0_i32_0 : i32, i32
  }
  func.func @transform_4(%arg0: i32, %arg1: memref<2x4xi32, #tpu.memory_space<smem>>, %arg2: memref<2x4xi32, #tpu.memory_space<smem>>) -> (i32, i32) {
    %c0_i32 = arith.constant 0 : i32
    %c0_i32_0 = arith.constant 0 : i32
    %c0_i32_1 = arith.constant 0 : i32
    return %c0_i32, %c0_i32_0 : i32, i32
  }
  func.func @transform_5(%arg0: i32, %arg1: memref<2x4xi32, #tpu.memory_space<smem>>, %arg2: memref<2x4xi32, #tpu.memory_space<smem>>) -> (i32, i32, i32) {
    %c0_i32 = arith.constant 0 : i32
    %c0_i32_0 = arith.constant 0 : i32
    %c0_i32_1 = arith.constant 0 : i32
    %c0_i32_2 = arith.constant 0 : i32
    return %c0_i32, %c0_i32_0, %c0_i32_1 : i32, i32, i32
  }
  func.func @transform_6(%arg0: i32, %arg1: memref<2x4xi32, #tpu.memory_space<smem>>, %arg2: memref<2x4xi32, #tpu.memory_space<smem>>) -> (i32, i32) {
    %c0_i32 = arith.constant 0 : i32
    %c0_i32_0 = arith.constant 0 : i32
    %c0_i32_1 = arith.constant 0 : i32
    return %c0_i32, %c0_i32_0 : i32, i32
  }
  func.func @transform_7(%arg0: i32, %arg1: memref<2x4xi32, #tpu.memory_space<smem>>, %arg2: memref<2x4xi32, #tpu.memory_space<smem>>) -> (i32, i32) {
    %c0_i32 = arith.constant 0 : i32
    %c0_i32_0 = arith.constant 0 : i32
    %c0_i32_1 = arith.constant 0 : i32
    return %c0_i32, %c0_i32_0 : i32, i32
  }
}

</mosaic_0001>

<bundles_post_ra>
// kernel: lstm_forward.1
= control target key start
LH: loop header
LB: loop body
LE: loop exit
PB: predicated region body
PF: predicated region fallthrough
CT: control target
= control target key end

     0   :  { %s5578_s0 = inlined_call_operand.vmem [shape: s32[2,4], index: 0, kind: input, shape index: {}]   ;;  %s5579_s2 = inlined_call_operand.hbm [shape: f32[8,128], index: 2, kind: input, shape index: {}]   ;;  %s5580_s3 = inlined_call_operand.hbm [shape: f32[8,128], index: 3, kind: input, shape index: {}]   ;;  %s5581_s4 = inlined_call_operand.hbm [shape: f32[128,512], index: 4, kind: input, shape index: {}]   ;;  %s5582_s5 = inlined_call_operand.hbm [shape: f32[128,512], index: 5, kind: input, shape index: {}]   ;;  %s5583_s6 = inlined_call_operand.hbm [shape: f32[1,512], index: 6, kind: input, shape index: {}]   ;;  %s5584_s7 = inlined_call_operand.hbm [shape: f32[8,1,128], index: 7, kind: input, shape index: {}]   ;;  %s5585_s9 = inlined_call_operand.vmem [shape: f32[8,1], index: 9, kind: output, shape index: {}]   ;;  %s5586_s1 = inlined_call_operand.vmem [shape: s32[2,4], index: 1, kind: input, shape index: {}]   ;;  %s5587_s8 = inlined_call_operand.<no memory space> [shape: f32[1,1], index: 8, kind: input, shape index: {}]  }
   0x1   :  { %s14_s11 = sshll.u32 %s5578_s0, 4  ;;  %s18_s14 = sshll.u32 %s5586_s1, 4  ;;  %v22_v0 = vstv %s5587_s8  ;;  %s15_s11 = int_to_ptr.vmem [resolvable:$true] %s14_s11  ;;  %s19_s14 = int_to_ptr.vmem [resolvable:$true] %s18_s14 }
   0x2   :  { %23 = vst [vmem:[#allocation6] sm:$0x1] %v22_v0  ;;  %s3403_s17 = scalar_lea.vmem %s15_s11, 32  ;;  %p3408_p1 = scmp.lt.s32.totalorder %s15_s11, %s15_s11 }
   0x3   :  { %p3404_p0 = scmp.ne.s32.totalorder %s15_s11, %s3403_s17  ;;  %p3409_p2 = scmp.lt.s32.totalorder %s3403_s17, %s3403_s17 }
   0x5   :  { %p3410_p3 = por %p3409_p2, %p3408_p1 }
   0x7   :  { %p3411_p4 = pnand %p3410_p3, %p3404_p0 }
   0x9   :  { %3414 = shalt.err (!%p3411_p4)  }
   0xa   :  { %s3557_s18 = smov [#allocation4]   ;;  %s3415_s0 = scalar_lea.vmem %s19_s14, 32 }
   0xb   :  { %17 = dma.vmem_to_smem %s15_s11, 32, %s3557_s18, [#allocation3] }
   0xc   :  { %p3416_p5 = scmp.ne.s32.totalorder %s19_s14, %s3415_s0  ;;  %p3420_p6 = scmp.lt.s32.totalorder %s19_s14, %s19_s14 }
   0xd   :  { %p3421_p7 = scmp.lt.s32.totalorder %s3415_s0, %s3415_s0 }
   0xf   :  { %p3422_p8 = por %p3421_p7, %p3420_p6 }
  0x11   :  { %p3423_p9 = pnand %p3422_p8, %p3416_p5 }
  0x13   :  { %3426 = shalt.err (!%p3423_p9)  }
  0x14   :  { %s3558_s1 = smov [#allocation5]  }
  0x15   :  { %21 = dma.vmem_to_smem %s19_s14, 32, %s3558_s1, [#allocation3] }
  0x16   :  { %3547 = dma.done.wait [#allocation3], 64 }
  0x17   :  { %3548 = vsyncadd [#allocation3], 4294967232 }
  0x18   :  { %25 = sfence }
  0x19   :  { %26 = vsyncpa [#allocation8], 0 }
  0x1a   :  { %27 = vsyncpa [#allocation10], 0 }
  0x1b   :  { %28 = vsyncpa [#allocation13], 0 }
  0x1c   :  { %29 = vsyncpa [#allocation16], 0  ;;  %s3559_s8 = smov [#allocation9]  }
  0x1d   :  { %s46_s19 = sshll.u32 %s3559_s8, 4  ;;  %s47_s19 = int_to_ptr.vmem [resolvable:$true] %s46_s19 }
  0x1e   :  { %s3435_s20 = scalar_lea.vmem %s47_s19, 128  ;;  %p3440_p11 = scmp.lt.s32.totalorder %s47_s19, %s47_s19 }
  0x1f   :  { %p3436_p10 = scmp.ne.s32.totalorder %s47_s19, %s3435_s20  ;;  %p3441_p12 = scmp.lt.s32.totalorder %s3435_s20, %s3435_s20 }
  0x21   :  { %p3442_p13 = por %p3441_p12, %p3440_p11 }
  0x23   :  { %p3443_p0 = pnand %p3442_p13, %p3436_p10 }
  0x25   :  { %3446 = shalt.err (!%p3443_p0)
}
  0x26   :  { %49 = dma.hbm_to_vmem [thread:$0]  %s5580_s3, 128, %s47_s19, [#allocation10]  }
  0x27   :  { %s3560_s23 = smov [#allocation12]   ;;  %s3561_s25 = smov [#allocation7]  }
  0x28   :  { %s67_s24 = sshll.u32 %s3560_s23, 4  ;;  %s36_s26 = sshll.u32 %s3561_s25, 4  ;;  %s68_s24 = int_to_ptr.vmem [resolvable:$true] %s67_s24  ;;  %s37_s26 = int_to_ptr.vmem [resolvable:$true] %s36_s26 }
  0x29   :  { %s3455_s27 = scalar_lea.vmem %s68_s24, 8192  ;;  %p3460_p2 = scmp.lt.s32.totalorder %s68_s24, %s68_s24 }
  0x2a   :  { %p3456_p1 = scmp.ne.s32.totalorder %s68_s24, %s3455_s27  ;;  %p3461_p3 = scmp.lt.s32.totalorder %s3455_s27, %s3455_s27 }
  0x2c   :  { %p3462_p4 = por %p3461_p3, %p3460_p2 }
  0x2e   :  { %p3463_p5 = pnand %p3462_p4, %p3456_p1 }
  0x30   :  { %3466 = shalt.err (!%p3463_p5)
}
  0x31   :  { %s3562_s28 = smov 512   ;;  %s3563_s29 = smov 32  }
  0x32   :  { %73 = dma.hbm_to_vmem [thread:$0]  %s5582_s5, 8192, %s68_s24, [#allocation13], %s3562_s28, %s3562_s28, %s3563_s29  }
  0x33   :  { %s3475_s3 = scalar_lea.vmem %s37_s26, 128  ;;  %p3480_p7 = scmp.lt.s32.totalorder %s37_s26, %s37_s26 }
  0x34   :  { %p3476_p6 = scmp.ne.s32.totalorder %s37_s26, %s3475_s3  ;;  %p3481_p8 = scmp.lt.s32.totalorder %s3475_s3, %s3475_s3 }
  0x36   :  { %p3482_p9 = por %p3481_p8, %p3480_p7 }
  0x38   :  { %p3483_p10 = pnand %p3482_p9, %p3476_p6 }
  0x3a   :  { %3486 = shalt.err (!%p3483_p10)
}
  0x3b   :  { %39 = dma.hbm_to_vmem [thread:$0]  %s5579_s2, 128, %s37_s26, [#allocation8]  }
  0x3c   :  { %s3564_s13 = smov [#allocation11]   ;;  %s3565_s15 = smov [#allocation14]  }
  0x3d   :  { %s55_s14 = sshll.u32 %s3564_s13, 4  ;;  %s80_s16 = sshll.u32 %s3565_s15, 4  ;;  %s56_s14 = int_to_ptr.vmem [resolvable:$true] %s55_s14  ;;  %s81_s16 = int_to_ptr.vmem [resolvable:$true] %s80_s16 }
  0x3e   :  { %s3495_s17 = scalar_lea.vmem %s56_s14, 8192  ;;  %p3500_p12 = scmp.lt.s32.totalorder %s56_s14, %s56_s14 }
  0x3f   :  { %p3496_p11 = scmp.ne.s32.totalorder %s56_s14, %s3495_s17  ;;  %p3501_p13 = scmp.lt.s32.totalorder %s3495_s17, %s3495_s17 }
  0x41   :  { %p3502_p0 = por %p3501_p13, %p3500_p12 }
  0x43   :  { %p3503_p1 = pnand %p3502_p0, %p3496_p11 }
  0x45   :  { %3506 = shalt.err (!%p3503_p1)
}
  0x46   :  { %61 = dma.hbm_to_vmem [thread:$0]  %s5581_s4, 8192, %s56_s14, [#allocation10], %s3562_s28, %s3562_s28, %s3563_s29  }
  0x47   :  { %s3515_s0 = scalar_lea.vmem %s81_s16, 64  ;;  %p3520_p3 = scmp.lt.s32.totalorder %s81_s16, %s81_s16 }
  0x48   :  { %p3516_p2 = scmp.ne.s32.totalorder %s81_s16, %s3515_s0  ;;  %p3521_p4 = scmp.lt.s32.totalorder %s3515_s0, %s3515_s0 }
  0x4a   :  { %p3522_p5 = por %p3521_p4, %p3520_p3 }
  0x4c   :  { %p3523_p6 = pnand %p3522_p5, %p3516_p2 }
  0x4e   :  { %3526 = shalt.err (!%p3523_p6)
}
  0x4f   :  { %83 = dma.hbm_to_vmem [thread:$0]  %s5583_s6, 64, %s81_s16, [#allocation13]  }
  0x50   :  { %s3566_s8 = smov [#allocation15]  }
  0x51   :  { %s89_s19 = sshll.u32 %s3566_s8, 4  ;;  %s90_s19 = int_to_ptr.vmem [resolvable:$true] %s89_s19 }
  0x52   :  { %s3535_s20 = scalar_lea.vmem %s90_s19, 128  ;;  %p3540_p8 = scmp.lt.s32.totalorder %s90_s19, %s90_s19 }
  0x53   :  { %p3536_p7 = scmp.ne.s32.totalorder %s90_s19, %s3535_s20  ;;  %p3541_p9 = scmp.lt.s32.totalorder %s3535_s20, %s3535_s20 }
  0x55   :  { %p3542_p10 = por %p3541_p9, %p3540_p8 }
  0x57   :  { %p3543_p11 = pnand %p3542_p10, %p3536_p7 }
  0x59   :  { %3546 = shalt.err (!%p3543_p11)
}
  0x5a   :  { %s3567_s4 = smov 16   ;;  %s3568_s21 = smov 1  }
  0x5b   :  { %95 = dma.hbm_to_vmem [thread:$0]  %s5584_s7, 128, %s90_s19, [#allocation16], %s3567_s4, %s3567_s4, %s3568_s21  }
  0x5c   :  { %3549 = dma.done.wait [#allocation8], 128  }
  0x5d   :  { %3550 = vsyncadd [#allocation8], 4294967168 }
  0x5e   :  { %3551 = dma.done.wait [#allocation10], 8320  }
  0x5f   :  { %3552 = vsyncadd [#allocation10], 4294958976 }
  0x60   :  { %3553 = dma.done.wait [#allocation13], 8256  }
  0x61   :  { %3554 = vsyncadd [#allocation13], 4294959040 }
  0x62   :  { %3555 = dma.done.wait [#allocation16], 128  }
  0x63   :  { %3556 = vsyncadd [#allocation16], 4294967168  ;;  %v5588_v1 = vmov 0.0   ;;  %v3657_v2 = vld [vmem:[#allocation11 + $0x1e8] sm:$0xff]  ;;  %v3659_v3 = vld [vmem:[#allocation11 + $0x1f8] sm:$0xff]  ;;  %s3723_s6 = sld [smem:[#allocation4]] }
  0x64   :  { %339 = vmatprep.mubr.f32.mxu0 %v5588_v1  ;;  %116 = vst [vmem:[#allocation2] sm:$0xff] %v5588_v1  ;;  %117 = vst [vmem:[#allocation2 + $0x8] sm:$0xff] %v5588_v1  ;;  %410 = vmatprep.mubr.f32.mxu1 %v5588_v1  ;;  %v3661_v4 = vld [vmem:[#allocation11 + $0x1e0] sm:$0xff]  ;;  %v3665_v5 = vld [vmem:[#allocation11 + $0x1f0] sm:$0xff]  ;;  %s3731_s7 = sld [smem:[#allocation4 + $0x80]]  ;;  %vm2931_vm0 = vcmask 7168  }
  0x65   :  { %118 = vst [vmem:[#allocation2 + $0x10] sm:$0xff] %v5588_v1  ;;  %119 = vst [vmem:[#allocation2 + $0x18] sm:$0xff] %v5588_v1  ;;  %275 = vmatprep.subr.mxu0 %v3657_v2  ;;  %346 = vmatprep.subr.mxu1 %v3659_v3  ;;  %v3667_v6 = vld [vmem:[#allocation11 + $0x1c8] sm:$0xff]  ;;  %v3669_v7 = vld [vmem:[#allocation11 + $0x1d8] sm:$0xff]  ;;  %s2958_s26 = sld [smem:[#allocation4 + $0x1]] }
  0x66   :  { %120 = vst [vmem:[#allocation2 + $0x20] sm:$0xff] %v5588_v1  ;;  %121 = vst [vmem:[#allocation2 + $0x28] sm:$0xff] %v5588_v1  ;;  %276 = vmatpush1.msra.mxu0 %v3661_v4  ;;  %347 = vmatpush1.msra.mxu1 %v3665_v5  ;;  %v3673_v8 = vld [vmem:[#allocation11 + $0x1c0] sm:$0xff]  ;;  %v3675_v9 = vld [vmem:[#allocation11 + $0x1d0] sm:$0xff]  ;;  %s2959_s27 = sld [smem:[#allocation4 + $0x81]] }
  0x67   :  { %122 = vst [vmem:[#allocation2 + $0x30] sm:$0xff] %v5588_v1  ;;  %123 = vst [vmem:[#allocation2 + $0x38] sm:$0xff] %v5588_v1  ;;  %v3677_v10 = vld [vmem:[#allocation11 + $0x1a8] sm:$0xff]  ;;  %277 = vmatprep.subr.mxu0 %v3667_v6  ;;  %348 = vmatprep.subr.mxu1 %v3669_v7  ;;  %v3681_v11 = vld [vmem:[#allocation11 + $0x1b8] sm:$0xff]  ;;  %s2960_s30 = sld [smem:[#allocation4 + $0x2]] }
  0x68   :  { %v3683_v12 = vld [vmem:[#allocation11 + $0x1a0] sm:$0xff]  ;;  %v3685_v13 = vld [vmem:[#allocation11 + $0x1b0] sm:$0xff]  ;;  %278 = vmatpush1.msra.mxu0 %v3673_v8  ;;  %349 = vmatpush1.msra.mxu1 %v3675_v9  ;;  %v3689_v14 = vld [vmem:[#allocation11 + $0x188] sm:$0xff]  ;;  %s2961_s10 = sld [smem:[#allocation4 + $0x82]] }
  0x69   :  { %v3691_v15 = vld [vmem:[#allocation11 + $0x198] sm:$0xff]  ;;  %279 = vmatprep.subr.mxu0 %v3677_v10  ;;  %350 = vmatprep.subr.mxu1 %v3681_v11  ;;  %v3695_v16 = vld [vmem:[#allocation11 + $0x180] sm:$0xff]  ;;  %v3697_v17 = vld [vmem:[#allocation11 + $0x190] sm:$0xff]  ;;  %s125_s24 = scalar_lea.vmem [#allocation7], %s3723_s6  ;;  %s2962_s12 = sld [smem:[#allocation4 + $0x3]] }
  0x6a   :  { %280 = vmatpush1.msra.mxu0 %v3683_v12  ;;  %351 = vmatpush1.msra.mxu1 %v3685_v13  ;;  %v3701_v18 = vld [vmem:[#allocation11 + $0x168] sm:$0xff]  ;;  %v3703_v19 = vld [vmem:[#allocation11 + $0x178] sm:$0xff]  ;;  %v3707_v20 = vld [vmem:[#allocation11 + $0x160] sm:$0xff]  ;;  %s129_s25 = scalar_lea.vmem [#allocation7], %s3731_s7  ;;  %s2963_s13 = sld [smem:[#allocation4 + $0x83]] }
  0x6b   :  { %281 = vmatprep.subr.mxu0 %v3689_v14  ;;  %352 = vmatprep.subr.mxu1 %v3691_v15  ;;  %v3709_v21 = vld [vmem:[#allocation11 + $0x170] sm:$0xff]  ;;  %v3713_v22 = vld [vmem:[#allocation11 + $0x148] sm:$0xff]  ;;  %v3715_v23 = vld [vmem:[#allocation11 + $0x158] sm:$0xff]  ;;  %s133_s28 = scalar_lea.vmem [#allocation7], %s2958_s26  ;;  %s156_s16 = sld [smem:[#allocation5]] }
  0x6c   :  { %282 = vmatpush1.msra.mxu0 %v3695_v16  ;;  %353 = vmatpush1.msra.mxu1 %v3697_v17  ;;  %v3719_v24 = vld [vmem:[#allocation11 + $0x140] sm:$0xff]  ;;  %v3721_v25 = vld [vmem:[#allocation11 + $0x150] sm:$0xff]  ;;  %v3727_v26 = vld [vmem:[#allocation11 + $0x128] sm:$0xff]  ;;  %s137_s29 = scalar_lea.vmem [#allocation7], %s2959_s27  ;;  %s2964_s17 = sld [smem:[#allocation5 + $0x80]] }
  0x6d   :  { %283 = vmatprep.subr.mxu0 %v3701_v18  ;;  %354 = vmatprep.subr.mxu1 %v3703_v19  ;;  %v3729_v27 = vld [vmem:[#allocation11 + $0x138] sm:$0xff]  ;;  %v3735_v28 = vld [vmem:[#allocation11 + $0x120] sm:$0xff]  ;;  %v3737_v29 = vld [vmem:[#allocation11 + $0x130] sm:$0xff]  ;;  %s141_s3 = scalar_lea.vmem [#allocation7], %s2960_s30  ;;  %s2965_s0 = sld [smem:[#allocation5 + $0x1]] }
  0x6e   :  { %284 = vmatpush1.msra.mxu0 %v3707_v20  ;;  %355 = vmatpush1.msra.mxu1 %v3709_v21  ;;  %v3741_v30 = vld [vmem:[#allocation11 + $0x108] sm:$0xff]  ;;  %v3743_v31 = vld [vmem:[#allocation11 + $0x118] sm:$0xff]  ;;  %v3747_v32 = vld [vmem:[#allocation11 + $0x100] sm:$0xff]  ;;  %s145_s11 = scalar_lea.vmem [#allocation7], %s2961_s10  ;;  %s2966_s2 = sld [smem:[#allocation5 + $0x81]] }
  0x6f   :  { %285 = vmatprep.subr.mxu0 %v3713_v22  ;;  %356 = vmatprep.subr.mxu1 %v3715_v23  ;;  %v3749_v33 = vld [vmem:[#allocation11 + $0x110] sm:$0xff]  ;;  %v3753_v34 = vld [vmem:[#allocation11 + $0xe8] sm:$0xff]  ;;  %v3755_v35 = vld [vmem:[#allocation11 + $0xf8] sm:$0xff]  ;;  %s149_s14 = scalar_lea.vmem [#allocation7], %s2962_s12  ;;  %s2967_s19 = sld [smem:[#allocation5 + $0x2]] }
  0x70   :  { %286 = vmatpush1.msra.mxu0 %v3719_v24  ;;  %357 = vmatpush1.msra.mxu1 %v3721_v25  ;;  %v3759_v36 = vld [vmem:[#allocation11 + $0xe0] sm:$0xff]  ;;  %v3761_v37 = vld [vmem:[#allocation11 + $0xf0] sm:$0xff]  ;;  %v3765_v38 = vld [vmem:[#allocation11 + $0xc8] sm:$0xff]  ;;  %s153_s15 = scalar_lea.vmem [#allocation7], %s2963_s13  ;;  %s2968_s20 = sld [smem:[#allocation5 + $0x82]] }
  0x71   :  { %287 = vmatprep.subr.mxu0 %v3727_v26  ;;  %358 = vmatprep.subr.mxu1 %v3729_v27  ;;  %v3767_v39 = vld [vmem:[#allocation11 + $0xd8] sm:$0xff]  ;;  %v3771_v40 = vld [vmem:[#allocation11 + $0xc0] sm:$0xff]  ;;  %v3773_v41 = vld [vmem:[#allocation11 + $0xd0] sm:$0xff]  ;;  %s157_s5 = scalar_lea.vmem [#allocation9], %s156_s16  ;;  %s2969_s22 = sld [smem:[#allocation5 + $0x3]] }
  0x72   :  { %288 = vmatpush1.msra.mxu0 %v3735_v28  ;;  %359 = vmatpush1.msra.mxu1 %v3737_v29  ;;  %v3777_v42 = vld [vmem:[#allocation11 + $0xa8] sm:$0xff]  ;;  %v3779_v43 = vld [vmem:[#allocation11 + $0xb8] sm:$0xff]  ;;  %v3783_v44 = vld [vmem:[#allocation11 + $0xa0] sm:$0xff]  ;;  %s161_s18 = scalar_lea.vmem [#allocation9], %s2964_s17  ;;  %s2970_s23 = sld [smem:[#allocation5 + $0x83]] }
  0x73   :  { %289 = vmatprep.subr.mxu0 %v3741_v30  ;;  %360 = vmatprep.subr.mxu1 %v3743_v31  ;;  %6011 = vst [vmem:[#allocation22_spill] sm:$0xff] %v3783_v44  ;;  %v3785_v45 = vld [vmem:[#allocation11 + $0xb0] sm:$0xff]  ;;  %v3789_v46 = vld [vmem:[#allocation11 + $0x88] sm:$0xff]  ;;  %v3791_v47 = vld [vmem:[#allocation11 + $0x98] sm:$0xff]  ;;  %s165_s1 = scalar_lea.vmem [#allocation9], %s2965_s0 }
  0x74   :  { %290 = vmatpush1.msra.mxu0 %v3747_v32  ;;  %361 = vmatpush1.msra.mxu1 %v3749_v33  ;;  %6012 = vst [vmem:[#allocation23_spill] sm:$0xff] %v3785_v45  ;;  %6013 = vst [vmem:[#allocation24_spill] sm:$0xff] %v3789_v46  ;;  %v3793_v48 = vld [vmem:[#allocation11 + $0x80] sm:$0xff]  ;;  %v3797_v49 = vld [vmem:[#allocation11 + $0x90] sm:$0xff]  ;;  %s169_s8 = scalar_lea.vmem [#allocation9], %s2966_s2 }
  0x75   :  { %291 = vmatprep.subr.mxu0 %v3753_v34  ;;  %362 = vmatprep.subr.mxu1 %v3755_v35  ;;  %6014 = vst [vmem:[#allocation25_spill] sm:$0xff] %v3791_v47  ;;  %6015 = vst [vmem:[#allocation26_spill] sm:$0xff] %v3793_v48  ;;  %v126_v50 = vld [vmem:[%s125_s24] sm:$0x1]  ;;  %v3805_v53 = vld [vmem:[#allocation11 + $0x78] sm:$0xff]  ;;  %s173_s4 = scalar_lea.vmem [#allocation9], %s2967_s19 }
  0x76   :  { %292 = vmatpush1.msra.mxu0 %v3759_v36  ;;  %363 = vmatpush1.msra.mxu1 %v3761_v37  ;;  %6016 = vst [vmem:[#allocation27_spill] sm:$0xff] %v3797_v49  ;;  %v130_v51 = vld [vmem:[%s129_s25] sm:$0x1]  ;;  %6018 = vst [vmem:[#allocation29_spill] sm:$0xff] %v3805_v53  ;;  %v3809_v54 = vld [vmem:[#allocation11 + $0x60] sm:$0xff]  ;;  %s177_s21 = scalar_lea.vmem [#allocation9], %s2968_s20 }
  0x77   :  { %293 = vmatprep.subr.mxu0 %v3765_v38  ;;  %364 = vmatprep.subr.mxu1 %v3767_v39  ;;  %v3803_v52 = vld [vmem:[#allocation11 + $0x68] sm:$0xff]  ;;  %127 = vst [vmem:[#allocation2] sm:$0x1] %v126_v50  ;;  %131 = vst [vmem:[#allocation2 + $0x1] sm:$0x1] %v130_v51  ;;  %v3811_v55 = vld [vmem:[#allocation11 + $0x70] sm:$0xff] }
  0x78   :  { %294 = vmatpush1.msra.mxu0 %v3771_v40  ;;  %365 = vmatpush1.msra.mxu1 %v3773_v41  ;;  %6017 = vst [vmem:[#allocation28_spill] sm:$0xff] %v3803_v52  ;;  %6019 = vst [vmem:[#allocation30_spill] sm:$0xff] %v3809_v54  ;;  %v3815_v56 = vld [vmem:[#allocation11 + $0x48] sm:$0xff]  ;;  %v3817_v57 = vld [vmem:[#allocation11 + $0x58] sm:$0xff]  ;;  %s181_s6 = scalar_lea.vmem [#allocation9], %s2969_s22  ;;  %s185_s7 = scalar_lea.vmem [#allocation9], %s2970_s23 }
  0x79   :  { %295 = vmatprep.subr.mxu0 %v3777_v42  ;;  %366 = vmatprep.subr.mxu1 %v3779_v43  ;;  %6020 = vst [vmem:[#allocation31_spill] sm:$0xff] %v3811_v55  ;;  %6021 = vst [vmem:[#allocation32_spill] sm:$0xff] %v3815_v56  ;;  %v3821_v58 = vld [vmem:[#allocation11 + $0x40] sm:$0xff]  ;;  %v3823_v59 = vld [vmem:[#allocation11 + $0x50] sm:$0xff] }
  0x7a   :  { %296 = vmatpush1.msra.mxu0 %v3783_v44  ;;  %367 = vmatpush1.msra.mxu1 %v3785_v45  ;;  %6022 = vst [vmem:[#allocation33_spill] sm:$0xff] %v3817_v57  ;;  %6023 = vst [vmem:[#allocation34_spill] sm:$0xff] %v3821_v58  ;;  %v3827_v60 = vld [vmem:[#allocation11 + $0x28] sm:$0xff]  ;;  %v3829_v61 = vld [vmem:[#allocation11 + $0x38] sm:$0xff] }
  0x7b   :  { %297 = vmatprep.subr.mxu0 %v3789_v46  ;;  %368 = vmatprep.subr.mxu1 %v3791_v47  ;;  %6024 = vst [vmem:[#allocation35_spill] sm:$0xff] %v3823_v59  ;;  %6025 = vst [vmem:[#allocation36_spill] sm:$0xff] %v3827_v60  ;;  %v3833_v62 = vld [vmem:[#allocation11 + $0x20] sm:$0xff]  ;;  %v3835_v63 = vld [vmem:[#allocation11 + $0x30] sm:$0xff] }
  0x7c   :  { %298 = vmatpush1.msra.mxu0 %v3793_v48  ;;  %369 = vmatpush1.msra.mxu1 %v3797_v49  ;;  %6026 = vst [vmem:[#allocation37_spill] sm:$0xff] %v3829_v61  ;;  %6027 = vst [vmem:[#allocation38_spill] sm:$0xff] %v3833_v62  ;;  %v3839_v0 = vld [vmem:[#allocation11 + $0x8] sm:$0xff]  ;;  %v3841_v50 = vld [vmem:[#allocation11 + $0x18] sm:$0xff] }
  0x7d   :  { %299 = vmatprep.subr.mxu0 %v3803_v52  ;;  %370 = vmatprep.subr.mxu1 %v3805_v53  ;;  %6028 = vst [vmem:[#allocation39_spill] sm:$0xff] %v3835_v63  ;;  %6029 = vst [vmem:[#allocation40_spill] sm:$0xff] %v3839_v0  ;;  %v3845_v51 = vld [vmem:[#allocation11] sm:$0xff]  ;;  %v3847_v1 = vld [vmem:[#allocation11 + $0x10] sm:$0xff] }
  0x7e   :  { %300 = vmatpush1.msra.mxu0 %v3809_v54  ;;  %371 = vmatpush1.msra.mxu1 %v3811_v55  ;;  %6030 = vst [vmem:[#allocation41_spill] sm:$0xff] %v3841_v50  ;;  %6031 = vst [vmem:[#allocation42_spill] sm:$0xff] %v3845_v51 }
  0x7f   :  { %301 = vmatprep.subr.mxu0 %v3815_v56  ;;  %372 = vmatprep.subr.mxu1 %v3817_v57  ;;  %6032 = vst [vmem:[#allocation43_spill] sm:$0xff] %v3847_v1  ;;  %v188_v57 = vld [vmem:[#allocation2] sm:$0xff] }
  0x80   :  { %302 = vmatpush1.msra.mxu0 %v3821_v58  ;;  %373 = vmatpush1.msra.mxu1 %v3823_v59  ;;  %v3851_v58 = vld [vmem:[#allocation12 + $0x1e8] sm:$0xff]  ;;  %v3855_v59 = vld [vmem:[#allocation12 + $0x1f8] sm:$0xff] }
  0x81   :  { %303 = vmatprep.subr.mxu0 %v3827_v60  ;;  %374 = vmatprep.subr.mxu1 %v3829_v61  ;;  %6033 = vst [vmem:[#allocation44_spill] sm:$0xff] %v3851_v58  ;;  %6034 = vst [vmem:[#allocation45_spill] sm:$0xff] %v3855_v59  ;;  %v3859_v61 = vld [vmem:[#allocation12 + $0x1e0] sm:$0xff]  ;;  %v3861_v60 = vld [vmem:[#allocation12 + $0x1f0] sm:$0xff] }
  0x82   :  { %304 = vmatpush1.msra.mxu0 %v3833_v62  ;;  %375 = vmatpush1.msra.mxu1 %v3835_v63  ;;  %6035 = vst [vmem:[#allocation46_spill] sm:$0xff] %v3859_v61  ;;  %6036 = vst [vmem:[#allocation47_spill] sm:$0xff] %v3861_v60  ;;  %v3864_v63 = vld [vmem:[#allocation12 + $0x1c8] sm:$0xff]  ;;  %v3866_v62 = vld [vmem:[#allocation12 + $0x1d8] sm:$0xff] }
  0x83   :  { %305 = vmatprep.subr.mxu0 %v3839_v0  ;;  %376 = vmatprep.subr.mxu1 %v3841_v50  ;;  %6037 = vst [vmem:[#allocation48_spill] sm:$0xff] %v3864_v63  ;;  %6038 = vst [vmem:[#allocation49_spill] sm:$0xff] %v3866_v62  ;;  %v3869_v50 = vld [vmem:[#allocation12 + $0x1c0] sm:$0xff]  ;;  %v3871_v0 = vld [vmem:[#allocation12 + $0x1d0] sm:$0xff] }
  0x84   :  { %306 = vmatpush1.msra.mxu0 %v3845_v51  ;;  %377 = vmatpush1.msra.mxu1 %v3847_v1  ;;  %6039 = vst [vmem:[#allocation50_spill] sm:$0xff] %v3869_v50  ;;  %6040 = vst [vmem:[#allocation51_spill] sm:$0xff] %v3871_v0  ;;  %v3875_v1 = vld [vmem:[#allocation12 + $0x1a8] sm:$0xff]  ;;  %v3877_v51 = vld [vmem:[#allocation12 + $0x1b8] sm:$0xff] }
  0x85   :  { %340 = vmatmul.mubr.f32.vlgmr.msra.gmra.mxu0 %v188_v57  ;;  %481 = vmatprep.subr.mxu0 %v3851_v58  ;;  %6041 = vst [vmem:[#allocation52_spill] sm:$0xff] %v3875_v1  ;;  %6042 = vst [vmem:[#allocation53_spill] sm:$0xff] %v3877_v51  ;;  %v3881_v58 = vld [vmem:[#allocation12 + $0x1a0] sm:$0xff] }
  0x86   :  { %552 = vmatprep.subr.mxu1 %v3855_v59  ;;  %411 = vmatmul.mubr.f32.vlgmr.msra.gmra.mxu1 %v188_v57  ;;  %6043 = vst [vmem:[#allocation54_spill] sm:$0xff] %v3881_v58  ;;  %v3883_v59 = vld [vmem:[#allocation12 + $0x1b0] sm:$0xff]  ;;  %v3887_v57 = vld [vmem:[#allocation12 + $0x188] sm:$0xff] }
  0x87   :  { %482 = vmatpush1.msra.mxu0 %v3859_v61  ;;  %553 = vmatpush1.msra.mxu1 %v3861_v60  ;;  %6044 = vst [vmem:[#allocation55_spill] sm:$0xff] %v3883_v59  ;;  %6045 = vst [vmem:[#allocation56_spill] sm:$0xff] %v3887_v57  ;;  %v3889_v61 = vld [vmem:[#allocation12 + $0x198] sm:$0xff]  ;;  %v3893_v60 = vld [vmem:[#allocation12 + $0x180] sm:$0xff] }
  0x88   :  { %483 = vmatprep.subr.mxu0 %v3864_v63  ;;  %554 = vmatprep.subr.mxu1 %v3866_v62  ;;  %6046 = vst [vmem:[#allocation57_spill] sm:$0xff] %v3889_v61  ;;  %6047 = vst [vmem:[#allocation58_spill] sm:$0xff] %v3893_v60  ;;  %v3895_v63 = vld [vmem:[#allocation12 + $0x190] sm:$0xff]  ;;  %v3899_v62 = vld [vmem:[#allocation12 + $0x168] sm:$0xff] }
  0x89   :  { %484 = vmatpush1.msra.mxu0 %v3869_v50  ;;  %555 = vmatpush1.msra.mxu1 %v3871_v0  ;;  %6048 = vst [vmem:[#allocation59_spill] sm:$0xff] %v3895_v63  ;;  %6049 = vst [vmem:[#allocation60_spill] sm:$0xff] %v3899_v62  ;;  %v3901_v50 = vld [vmem:[#allocation12 + $0x178] sm:$0xff]  ;;  %v3905_v0 = vld [vmem:[#allocation12 + $0x160] sm:$0xff] }
  0x8a   :  { %485 = vmatprep.subr.mxu0 %v3875_v1  ;;  %556 = vmatprep.subr.mxu1 %v3877_v51  ;;  %6050 = vst [vmem:[#allocation61_spill] sm:$0xff] %v3901_v50  ;;  %6051 = vst [vmem:[#allocation62_spill] sm:$0xff] %v3905_v0  ;;  %v3907_v1 = vld [vmem:[#allocation12 + $0x170] sm:$0xff]  ;;  %v3911_v51 = vld [vmem:[#allocation12 + $0x148] sm:$0xff] }
  0x8b   :  { %486 = vmatpush1.msra.mxu0 %v3881_v58  ;;  %557 = vmatpush1.msra.mxu1 %v3883_v59  ;;  %6052 = vst [vmem:[#allocation63_spill] sm:$0xff] %v3907_v1  ;;  %6053 = vst [vmem:[#allocation64_spill] sm:$0xff] %v3911_v51  ;;  %v3913_v58 = vld [vmem:[#allocation12 + $0x158] sm:$0xff]  ;;  %v3917_v59 = vld [vmem:[#allocation12 + $0x140] sm:$0xff] }
  0x8c   :  { %487 = vmatprep.subr.mxu0 %v3887_v57  ;;  %558 = vmatprep.subr.mxu1 %v3889_v61  ;;  %6054 = vst [vmem:[#allocation65_spill] sm:$0xff] %v3913_v58  ;;  %6055 = vst [vmem:[#allocation66_spill] sm:$0xff] %v3917_v59  ;;  %v3919_v57 = vld [vmem:[#allocation12 + $0x150] sm:$0xff]  ;;  %v3923_v61 = vld [vmem:[#allocation12 + $0x128] sm:$0xff] }
  0x8d   :  { %488 = vmatpush1.msra.mxu0 %v3893_v60  ;;  %559 = vmatpush1.msra.mxu1 %v3895_v63  ;;  %6056 = vst [vmem:[#allocation67_spill] sm:$0xff] %v3919_v57  ;;  %6057 = vst [vmem:[#allocation68_spill] sm:$0xff] %v3923_v61  ;;  %v3925_v60 = vld [vmem:[#allocation12 + $0x138] sm:$0xff]  ;;  %v3929_v63 = vld [vmem:[#allocation12 + $0x120] sm:$0xff] }
  0x8e   :  { %489 = vmatprep.subr.mxu0 %v3899_v62  ;;  %560 = vmatprep.subr.mxu1 %v3901_v50  ;;  %6058 = vst [vmem:[#allocation69_spill] sm:$0xff] %v3925_v60  ;;  %6059 = vst [vmem:[#allocation70_spill] sm:$0xff] %v3929_v63  ;;  %v3931_v62 = vld [vmem:[#allocation12 + $0x130] sm:$0xff]  ;;  %v3935_v50 = vld [vmem:[#allocation12 + $0x108] sm:$0xff] }
  0x8f   :  { %490 = vmatpush1.msra.mxu0 %v3905_v0  ;;  %561 = vmatpush1.msra.mxu1 %v3907_v1  ;;  %6060 = vst [vmem:[#allocation71_spill] sm:$0xff] %v3931_v62  ;;  %6061 = vst [vmem:[#allocation72_spill] sm:$0xff] %v3935_v50  ;;  %v3937_v0 = vld [vmem:[#allocation12 + $0x118] sm:$0xff]  ;;  %v3941_v1 = vld [vmem:[#allocation12 + $0x100] sm:$0xff] }
  0x90   :  { %491 = vmatprep.subr.mxu0 %v3911_v51  ;;  %562 = vmatprep.subr.mxu1 %v3913_v58  ;;  %6062 = vst [vmem:[#allocation73_spill] sm:$0xff] %v3937_v0  ;;  %6063 = vst [vmem:[#allocation74_spill] sm:$0xff] %v3941_v1  ;;  %v3943_v51 = vld [vmem:[#allocation12 + $0x110] sm:$0xff]  ;;  %v3947_v58 = vld [vmem:[#allocation12 + $0xe8] sm:$0xff] }
  0x91   :  { %492 = vmatpush1.msra.mxu0 %v3917_v59  ;;  %563 = vmatpush1.msra.mxu1 %v3919_v57  ;;  %6064 = vst [vmem:[#allocation75_spill] sm:$0xff] %v3943_v51  ;;  %6065 = vst [vmem:[#allocation76_spill] sm:$0xff] %v3947_v58  ;;  %v3949_v59 = vld [vmem:[#allocation12 + $0xf8] sm:$0xff]  ;;  %v3953_v57 = vld [vmem:[#allocation12 + $0xe0] sm:$0xff] }
  0x92   :  { %493 = vmatprep.subr.mxu0 %v3923_v61  ;;  %564 = vmatprep.subr.mxu1 %v3925_v60  ;;  %6066 = vst [vmem:[#allocation77_spill] sm:$0xff] %v3949_v59  ;;  %6067 = vst [vmem:[#allocation78_spill] sm:$0xff] %v3953_v57  ;;  %v3955_v61 = vld [vmem:[#allocation12 + $0xf0] sm:$0xff]  ;;  %v3959_v60 = vld [vmem:[#allocation12 + $0xc8] sm:$0xff] }
  0x93   :  { %494 = vmatpush1.msra.mxu0 %v3929_v63  ;;  %565 = vmatpush1.msra.mxu1 %v3931_v62  ;;  %6068 = vst [vmem:[#allocation79_spill] sm:$0xff] %v3955_v61  ;;  %6069 = vst [vmem:[#allocation80_spill] sm:$0xff] %v3959_v60  ;;  %v3961_v63 = vld [vmem:[#allocation12 + $0xd8] sm:$0xff]  ;;  %v3965_v62 = vld [vmem:[#allocation12 + $0xc0] sm:$0xff] }
  0x94   :  { %495 = vmatprep.subr.mxu0 %v3935_v50  ;;  %566 = vmatprep.subr.mxu1 %v3937_v0  ;;  %6070 = vst [vmem:[#allocation81_spill] sm:$0xff] %v3961_v63  ;;  %6071 = vst [vmem:[#allocation82_spill] sm:$0xff] %v3965_v62  ;;  %v3967_v50 = vld [vmem:[#allocation12 + $0xd0] sm:$0xff]  ;;  %v3971_v0 = vld [vmem:[#allocation12 + $0xa8] sm:$0xff] }
  0x95   :  { %496 = vmatpush1.msra.mxu0 %v3941_v1  ;;  %567 = vmatpush1.msra.mxu1 %v3943_v51  ;;  %6072 = vst [vmem:[#allocation83_spill] sm:$0xff] %v3967_v50  ;;  %6073 = vst [vmem:[#allocation84_spill] sm:$0xff] %v3971_v0  ;;  %v3973_v1 = vld [vmem:[#allocation12 + $0xb8] sm:$0xff]  ;;  %v3977_v51 = vld [vmem:[#allocation12 + $0xa0] sm:$0xff] }
  0x96   :  { %497 = vmatprep.subr.mxu0 %v3947_v58  ;;  %568 = vmatprep.subr.mxu1 %v3949_v59  ;;  %6074 = vst [vmem:[#allocation85_spill] sm:$0xff] %v3973_v1  ;;  %6075 = vst [vmem:[#allocation86_spill] sm:$0xff] %v3977_v51  ;;  %v3979_v58 = vld [vmem:[#allocation12 + $0xb0] sm:$0xff]  ;;  %v3983_v59 = vld [vmem:[#allocation12 + $0x88] sm:$0xff] }
  0x97   :  { %498 = vmatpush1.msra.mxu0 %v3953_v57  ;;  %569 = vmatpush1.msra.mxu1 %v3955_v61  ;;  %6076 = vst [vmem:[#allocation87_spill] sm:$0xff] %v3979_v58  ;;  %6077 = vst [vmem:[#allocation88_spill] sm:$0xff] %v3983_v59  ;;  %v3985_v57 = vld [vmem:[#allocation12 + $0x98] sm:$0xff]  ;;  %v3989_v61 = vld [vmem:[#allocation12 + $0x80] sm:$0xff] }
  0x98   :  { %499 = vmatprep.subr.mxu0 %v3959_v60  ;;  %570 = vmatprep.subr.mxu1 %v3961_v63  ;;  %6078 = vst [vmem:[#allocation89_spill] sm:$0xff] %v3985_v57  ;;  %6079 = vst [vmem:[#allocation90_spill] sm:$0xff] %v3989_v61  ;;  %v3991_v60 = vld [vmem:[#allocation12 + $0x90] sm:$0xff]  ;;  %v3995_v63 = vld [vmem:[#allocation12 + $0x68] sm:$0xff] }
  0x99   :  { %500 = vmatpush1.msra.mxu0 %v3965_v62  ;;  %571 = vmatpush1.msra.mxu1 %v3967_v50  ;;  %6080 = vst [vmem:[#allocation91_spill] sm:$0xff] %v3991_v60  ;;  %6081 = vst [vmem:[#allocation92_spill] sm:$0xff] %v3995_v63  ;;  %v3997_v62 = vld [vmem:[#allocation12 + $0x78] sm:$0xff]  ;;  %v4001_v50 = vld [vmem:[#allocation12 + $0x60] sm:$0xff] }
  0x9a   :  { %501 = vmatprep.subr.mxu0 %v3971_v0  ;;  %572 = vmatprep.subr.mxu1 %v3973_v1  ;;  %6082 = vst [vmem:[#allocation93_spill] sm:$0xff] %v3997_v62  ;;  %6083 = vst [vmem:[#allocation94_spill] sm:$0xff] %v4001_v50  ;;  %v4003_v0 = vld [vmem:[#allocation12 + $0x70] sm:$0xff]  ;;  %v4007_v1 = vld [vmem:[#allocation12 + $0x48] sm:$0xff] }
  0x9b   :  { %502 = vmatpush1.msra.mxu0 %v3977_v51  ;;  %573 = vmatpush1.msra.mxu1 %v3979_v58  ;;  %6084 = vst [vmem:[#allocation95_spill] sm:$0xff] %v4003_v0  ;;  %6085 = vst [vmem:[#allocation96_spill] sm:$0xff] %v4007_v1  ;;  %v4009_v51 = vld [vmem:[#allocation12 + $0x58] sm:$0xff]  ;;  %v4013_v58 = vld [vmem:[#allocation12 + $0x40] sm:$0xff] }
  0x9c   :  { %503 = vmatprep.subr.mxu0 %v3983_v59  ;;  %574 = vmatprep.subr.mxu1 %v3985_v57  ;;  %6086 = vst [vmem:[#allocation97_spill] sm:$0xff] %v4009_v51  ;;  %6087 = vst [vmem:[#allocation98_spill] sm:$0xff] %v4013_v58  ;;  %v4015_v59 = vld [vmem:[#allocation12 + $0x50] sm:$0xff]  ;;  %v4019_v57 = vld [vmem:[#allocation12 + $0x28] sm:$0xff] }
  0x9d   :  { %504 = vmatpush1.msra.mxu0 %v3989_v61  ;;  %575 = vmatpush1.msra.mxu1 %v3991_v60  ;;  %6088 = vst [vmem:[#allocation99_spill] sm:$0xff] %v4015_v59  ;;  %6089 = vst [vmem:[#allocation100_spill] sm:$0xff] %v4019_v57  ;;  %v4021_v61 = vld [vmem:[#allocation12 + $0x38] sm:$0xff]  ;;  %v4025_v60 = vld [vmem:[#allocation12 + $0x20] sm:$0xff] }
  0x9e   :  { %505 = vmatprep.subr.mxu0 %v3995_v63  ;;  %576 = vmatprep.subr.mxu1 %v3997_v62  ;;  %6090 = vst [vmem:[#allocation101_spill] sm:$0xff] %v4021_v61  ;;  %6091 = vst [vmem:[#allocation102_spill] sm:$0xff] %v4025_v60  ;;  %v4027_v63 = vld [vmem:[#allocation12 + $0x30] sm:$0xff]  ;;  %v4031_v62 = vld [vmem:[#allocation12 + $0x8] sm:$0xff] }
  0x9f   :  { %506 = vmatpush1.msra.mxu0 %v4001_v50  ;;  %577 = vmatpush1.msra.mxu1 %v4003_v0  ;;  %6092 = vst [vmem:[#allocation103_spill] sm:$0xff] %v4027_v63  ;;  %6093 = vst [vmem:[#allocation104_spill] sm:$0xff] %v4031_v62  ;;  %v4033_v50 = vld [vmem:[#allocation12 + $0x18] sm:$0xff]  ;;  %v4037_v0 = vld [vmem:[#allocation12] sm:$0xff] }
  0xa0   :  { %507 = vmatprep.subr.mxu0 %v4007_v1  ;;  %578 = vmatprep.subr.mxu1 %v4009_v51  ;;  %6094 = vst [vmem:[#allocation105_spill] sm:$0xff] %v4033_v50  ;;  %6095 = vst [vmem:[#allocation106_spill] sm:$0xff] %v4037_v0  ;;  %v4041_v51 = vld [vmem:[#allocation12 + $0x10] sm:$0xff] }
  0xa1   :  { %508 = vmatpush1.msra.mxu0 %v4013_v58  ;;  %579 = vmatpush1.msra.mxu1 %v4015_v59  ;;  %6096 = vst [vmem:[#allocation107_spill] sm:$0xff] %v4041_v51  ;;  %v6097_v59 = vmov 0.0  }
  0xa2   :  { %509 = vmatprep.subr.mxu0 %v4019_v57  ;;  %580 = vmatprep.subr.mxu1 %v4021_v61 }
  0xa3   :  { %510 = vmatpush1.msra.mxu0 %v4025_v60  ;;  %581 = vmatpush1.msra.mxu1 %v4027_v63 }
  0xa4   :  { %511 = vmatprep.subr.mxu0 %v4031_v62  ;;  %582 = vmatprep.subr.mxu1 %v4033_v50 }
  0xa5   :  { %512 = vmatpush1.msra.mxu0 %v4037_v0  ;;  %545 = vmatprep.mubr.f32.mxu0 %v6097_v59 }
  0xa6   :  { %583 = vmatpush1.msra.mxu1 %v4041_v51  ;;  %616 = vmatprep.mubr.f32.mxu1 %v6097_v59 }
  0xa7   :  { %546 = vmatmul.mubr.f32.vlgmr.msra.gmra.mxu0 %v6097_v59  ;;  %617 = vmatmul.mubr.f32.vlgmr.msra.gmra.mxu1 %v6097_v59 }
  0xa8   :  { %661 = vmatprep.subr.mxu0 %v3657_v2  ;;  %732 = vmatprep.subr.mxu1 %v3659_v3 }
  0xa9   :  { %662 = vmatpush1.msra.mxu0 %v3661_v4  ;;  %733 = vmatpush1.msra.mxu1 %v3665_v5 }
  0xaa   :  { %663 = vmatprep.subr.mxu0 %v3667_v6  ;;  %734 = vmatprep.subr.mxu1 %v3669_v7 }
  0xab   :  { %664 = vmatpush1.msra.mxu0 %v3673_v8  ;;  %735 = vmatpush1.msra.mxu1 %v3675_v9 }
  0xac   :  { %665 = vmatprep.subr.mxu0 %v3677_v10  ;;  %736 = vmatprep.subr.mxu1 %v3681_v11 }
  0xad   :  { %666 = vmatpush1.msra.mxu0 %v3683_v12  ;;  %737 = vmatpush1.msra.mxu1 %v3685_v13 }
  0xae   :  { %667 = vmatprep.subr.mxu0 %v3689_v14  ;;  %738 = vmatprep.subr.mxu1 %v3691_v15 }
  0xaf   :  { %668 = vmatpush1.msra.mxu0 %v3695_v16  ;;  %739 = vmatpush1.msra.mxu1 %v3697_v17 }
  0xb0   :  { %669 = vmatprep.subr.mxu0 %v3701_v18  ;;  %740 = vmatprep.subr.mxu1 %v3703_v19 }
  0xb1   :  { %670 = vmatpush1.msra.mxu0 %v3707_v20  ;;  %741 = vmatpush1.msra.mxu1 %v3709_v21 }
  0xb2   :  { %671 = vmatprep.subr.mxu0 %v3713_v22  ;;  %742 = vmatprep.subr.mxu1 %v3715_v23 }
  0xb3   :  { %672 = vmatpush1.msra.mxu0 %v3719_v24  ;;  %743 = vmatpush1.msra.mxu1 %v3721_v25 }
  0xb4   :  { %673 = vmatprep.subr.mxu0 %v3727_v26  ;;  %744 = vmatprep.subr.mxu1 %v3729_v27 }
  0xb5   :  { %674 = vmatpush1.msra.mxu0 %v3735_v28  ;;  %745 = vmatpush1.msra.mxu1 %v3737_v29 }
  0xb6   :  { %675 = vmatprep.subr.mxu0 %v3741_v30  ;;  %746 = vmatprep.subr.mxu1 %v3743_v31 }
  0xb7   :  { %676 = vmatpush1.msra.mxu0 %v3747_v32  ;;  %747 = vmatpush1.msra.mxu1 %v3749_v33 }
  0xb8   :  { %677 = vmatprep.subr.mxu0 %v3753_v34  ;;  %748 = vmatprep.subr.mxu1 %v3755_v35 }
  0xb9   :  { %678 = vmatpush1.msra.mxu0 %v3759_v36  ;;  %749 = vmatpush1.msra.mxu1 %v3761_v37 }
  0xba   :  { %679 = vmatprep.subr.mxu0 %v3765_v38  ;;  %750 = vmatprep.subr.mxu1 %v3767_v39 }
  0xbb   :  { %680 = vmatpush1.msra.mxu0 %v3771_v40  ;;  %751 = vmatpush1.msra.mxu1 %v3773_v41 }
  0xbc   :  { %681 = vmatprep.subr.mxu0 %v3777_v42  ;;  %752 = vmatprep.subr.mxu1 %v3779_v43 }
  0xbd   :  { %682 = vmatpush1.msra.mxu0 %v3783_v44  ;;  %753 = vmatpush1.msra.mxu1 %v3785_v45  ;;  %v6098_v44 = vld [vmem:[#allocation33_spill] sm:$0xff]  ;;  %v6099_v45 = vld [vmem:[#allocation34_spill] sm:$0xff] }
  0xbe   :  { %683 = vmatprep.subr.mxu0 %v3789_v46  ;;  %754 = vmatprep.subr.mxu1 %v3791_v47  ;;  %v6100_v46 = vld [vmem:[#allocation35_spill] sm:$0xff]  ;;  %v6101_v47 = vld [vmem:[#allocation36_spill] sm:$0xff] }
  0xbf   :  { %684 = vmatpush1.msra.mxu0 %v3793_v48  ;;  %755 = vmatpush1.msra.mxu1 %v3797_v49  ;;  %v6102_v48 = vld [vmem:[#allocation37_spill] sm:$0xff]  ;;  %v6103_v49 = vld [vmem:[#allocation38_spill] sm:$0xff] }
  0xc0   :  { %685 = vmatprep.subr.mxu0 %v3803_v52  ;;  %756 = vmatprep.subr.mxu1 %v3805_v53  ;;  %v6104_v52 = vld [vmem:[#allocation39_spill] sm:$0xff]  ;;  %v6105_v53 = vld [vmem:[#allocation40_spill] sm:$0xff] }
  0xc1   :  { %686 = vmatpush1.msra.mxu0 %v3809_v54  ;;  %757 = vmatpush1.msra.mxu1 %v3811_v55  ;;  %v6106_v55 = vld [vmem:[#allocation42_spill] sm:$0xff]  ;;  %v6120_v54 = vld [vmem:[#allocation55_spill] sm:$0xff] }
  0xc2   :  { %687 = vmatprep.subr.mxu0 %v3815_v56  ;;  %758 = vmatprep.subr.mxu1 %v6098_v44  ;;  %v6107_v56 = vld [vmem:[#allocation41_spill] sm:$0xff]  ;;  %v6108_v44 = vld [vmem:[#allocation43_spill] sm:$0xff] }
  0xc3   :  { %688 = vmatpush1.msra.mxu0 %v6099_v45  ;;  %759 = vmatpush1.msra.mxu1 %v6100_v46  ;;  %v6109_v46 = vld [vmem:[#allocation44_spill] sm:$0xff] }
  0xc4   :  { %689 = vmatprep.subr.mxu0 %v6101_v47  ;;  %760 = vmatprep.subr.mxu1 %v6102_v48  ;;  %v6110_v47 = vld [vmem:[#allocation45_spill] sm:$0xff]  ;;  %v6116_v48 = vld [vmem:[#allocation51_spill] sm:$0xff]  ;;  %v6117_v45 = vld [vmem:[#allocation52_spill] sm:$0xff] }
  0xc5   :  { %690 = vmatpush1.msra.mxu0 %v6103_v49  ;;  %761 = vmatpush1.msra.mxu1 %v6104_v52  ;;  %v134_v52 = vld [vmem:[%s133_s28] sm:$0x1] }
  0xc6   :  { %691 = vmatprep.subr.mxu0 %v6105_v53  ;;  %725 = vmatprep.mubr.f32.mxu0 %v6097_v59  ;;  %135 = vst [vmem:[#allocation2 + $0x8] sm:$0x1] %v134_v52  ;;  %v138_v53 = vld [vmem:[%s137_s29] sm:$0x1]  ;;  %v6118_v52 = vld [vmem:[#allocation53_spill] sm:$0xff] }
  0xc7   :  { %692 = vmatpush1.msra.mxu0 %v6106_v55  ;;  %762 = vmatprep.subr.mxu1 %v6107_v56  ;;  %139 = vst [vmem:[#allocation2 + $0x9] sm:$0x1] %v138_v53  ;;  %v6111_v56 = vld [vmem:[#allocation46_spill] sm:$0xff]  ;;  %v6113_v55 = vld [vmem:[#allocation48_spill] sm:$0xff] }
  0xc8   :  { %763 = vmatpush1.msra.mxu1 %v6108_v44  ;;  %796 = vmatprep.mubr.f32.mxu1 %v6097_v59  ;;  %v6112_v44 = vld [vmem:[#allocation47_spill] sm:$0xff]  ;;  %v6119_v53 = vld [vmem:[#allocation54_spill] sm:$0xff] }
  0xc9   :  { %803 = vmatprep.subr.mxu0 %v6109_v46  ;;  %874 = vmatprep.subr.mxu1 %v6110_v47  ;;  %v6114_v46 = vld [vmem:[#allocation49_spill] sm:$0xff]  ;;  %v6115_v47 = vld [vmem:[#allocation50_spill] sm:$0xff] }
  0xce   :  { %v660_v49 = vld [vmem:[#allocation2 + $0x8] sm:$0xff] }
  0xcf   :  { %726 = vmatmul.mubr.f32.vlgmr.msra.gmra.mxu0 %v660_v49  ;;  %797 = vmatmul.mubr.f32.vlgmr.msra.gmra.mxu1 %v660_v49  ;;  %v6121_v49 = vld [vmem:[#allocation56_spill] sm:$0xff] }
  0xd0   :  { %804 = vmatpush1.msra.mxu0 %v6111_v56  ;;  %875 = vmatpush1.msra.mxu1 %v6112_v44  ;;  %v6122_v56 = vld [vmem:[#allocation57_spill] sm:$0xff]  ;;  %v6123_v44 = vld [vmem:[#allocation58_spill] sm:$0xff] }
  0xd1   :  { %805 = vmatprep.subr.mxu0 %v6113_v55  ;;  %876 = vmatprep.subr.mxu1 %v6114_v46  ;;  %v6124_v55 = vld [vmem:[#allocation59_spill] sm:$0xff]  ;;  %v6125_v46 = vld [vmem:[#allocation60_spill] sm:$0xff] }
  0xd2   :  { %806 = vmatpush1.msra.mxu0 %v6115_v47  ;;  %877 = vmatpush1.msra.mxu1 %v6116_v48  ;;  %v6126_v47 = vld [vmem:[#allocation61_spill] sm:$0xff]  ;;  %v6127_v48 = vld [vmem:[#allocation62_spill] sm:$0xff] }
  0xd3   :  { %807 = vmatprep.subr.mxu0 %v6117_v45  ;;  %878 = vmatprep.subr.mxu1 %v6118_v52  ;;  %v6128_v45 = vld [vmem:[#allocation63_spill] sm:$0xff]  ;;  %v6129_v52 = vld [vmem:[#allocation64_spill] sm:$0xff] }
  0xd4   :  { %808 = vmatpush1.msra.mxu0 %v6119_v53  ;;  %879 = vmatpush1.msra.mxu1 %v6120_v54  ;;  %v6130_v53 = vld [vmem:[#allocation65_spill] sm:$0xff]  ;;  %v6131_v54 = vld [vmem:[#allocation66_spill] sm:$0xff] }
  0xd5   :  { %809 = vmatprep.subr.mxu0 %v6121_v49  ;;  %880 = vmatprep.subr.mxu1 %v6122_v56  ;;  %v6132_v49 = vld [vmem:[#allocation67_spill] sm:$0xff]  ;;  %v6133_v56 = vld [vmem:[#allocation68_spill] sm:$0xff] }
  0xd6   :  { %810 = vmatpush1.msra.mxu0 %v6123_v44  ;;  %881 = vmatpush1.msra.mxu1 %v6124_v55  ;;  %v6134_v44 = vld [vmem:[#allocation69_spill] sm:$0xff]  ;;  %v6135_v55 = vld [vmem:[#allocation70_spill] sm:$0xff] }
  0xd7   :  { %811 = vmatprep.subr.mxu0 %v6125_v46  ;;  %882 = vmatprep.subr.mxu1 %v6126_v47  ;;  %v6136_v46 = vld [vmem:[#allocation71_spill] sm:$0xff]  ;;  %v6137_v47 = vld [vmem:[#allocation72_spill] sm:$0xff] }
  0xd8   :  { %812 = vmatpush1.msra.mxu0 %v6127_v48  ;;  %883 = vmatpush1.msra.mxu1 %v6128_v45  ;;  %v6138_v48 = vld [vmem:[#allocation73_spill] sm:$0xff]  ;;  %v6139_v45 = vld [vmem:[#allocation74_spill] sm:$0xff] }
  0xd9   :  { %813 = vmatprep.subr.mxu0 %v6129_v52  ;;  %884 = vmatprep.subr.mxu1 %v6130_v53  ;;  %v6140_v52 = vld [vmem:[#allocation75_spill] sm:$0xff]  ;;  %v6141_v53 = vld [vmem:[#allocation76_spill] sm:$0xff] }
  0xda   :  { %814 = vmatpush1.msra.mxu0 %v6131_v54  ;;  %885 = vmatpush1.msra.mxu1 %v6132_v49  ;;  %v6142_v54 = vld [vmem:[#allocation77_spill] sm:$0xff]  ;;  %v6143_v49 = vld [vmem:[#allocation78_spill] sm:$0xff] }
  0xdb   :  { %815 = vmatprep.subr.mxu0 %v6133_v56  ;;  %886 = vmatprep.subr.mxu1 %v6134_v44  ;;  %v6144_v56 = vld [vmem:[#allocation79_spill] sm:$0xff]  ;;  %v6145_v44 = vld [vmem:[#allocation80_spill] sm:$0xff] }
  0xdc   :  { %816 = vmatpush1.msra.mxu0 %v6135_v55  ;;  %887 = vmatpush1.msra.mxu1 %v6136_v46  ;;  %v6146_v55 = vld [vmem:[#allocation81_spill] sm:$0xff]  ;;  %v6147_v46 = vld [vmem:[#allocation82_spill] sm:$0xff] }
  0xdd   :  { %817 = vmatprep.subr.mxu0 %v6137_v47  ;;  %888 = vmatprep.subr.mxu1 %v6138_v48  ;;  %v6148_v47 = vld [vmem:[#allocation83_spill] sm:$0xff]  ;;  %v6149_v48 = vld [vmem:[#allocation84_spill] sm:$0xff] }
  0xde   :  { %818 = vmatpush1.msra.mxu0 %v6139_v45  ;;  %889 = vmatpush1.msra.mxu1 %v6140_v52  ;;  %v6150_v45 = vld [vmem:[#allocation85_spill] sm:$0xff]  ;;  %v6151_v52 = vld [vmem:[#allocation86_spill] sm:$0xff] }
  0xdf   :  { %819 = vmatprep.subr.mxu0 %v6141_v53  ;;  %890 = vmatprep.subr.mxu1 %v6142_v54  ;;  %v6152_v53 = vld [vmem:[#allocation87_spill] sm:$0xff]  ;;  %v6153_v54 = vld [vmem:[#allocation88_spill] sm:$0xff] }
  0xe0   :  { %820 = vmatpush1.msra.mxu0 %v6143_v49  ;;  %891 = vmatpush1.msra.mxu1 %v6144_v56  ;;  %v6154_v49 = vld [vmem:[#allocation89_spill] sm:$0xff]  ;;  %v6155_v56 = vld [vmem:[#allocation90_spill] sm:$0xff] }
  0xe1   :  { %821 = vmatprep.subr.mxu0 %v6145_v44  ;;  %892 = vmatprep.subr.mxu1 %v6146_v55  ;;  %v6156_v44 = vld [vmem:[#allocation91_spill] sm:$0xff]  ;;  %v6157_v55 = vld [vmem:[#allocation92_spill] sm:$0xff] }
  0xe2   :  { %822 = vmatpush1.msra.mxu0 %v6147_v46  ;;  %893 = vmatpush1.msra.mxu1 %v6148_v47  ;;  %v6158_v46 = vld [vmem:[#allocation93_spill] sm:$0xff]  ;;  %v6159_v47 = vld [vmem:[#allocation94_spill] sm:$0xff] }
  0xe3   :  { %823 = vmatprep.subr.mxu0 %v6149_v48  ;;  %894 = vmatprep.subr.mxu1 %v6150_v45  ;;  %v6160_v48 = vld [vmem:[#allocation95_spill] sm:$0xff] }
  0xe4   :  { %824 = vmatpush1.msra.mxu0 %v6151_v52  ;;  %895 = vmatpush1.msra.mxu1 %v6152_v53  ;;  %v6161_v52 = vld [vmem:[#allocation97_spill] sm:$0xff] }
  0xe5   :  { %825 = vmatprep.subr.mxu0 %v6153_v54  ;;  %896 = vmatprep.subr.mxu1 %v6154_v49  ;;  %v6162_v54 = vld [vmem:[#allocation99_spill] sm:$0xff] }
  0xe6   :  { %826 = vmatpush1.msra.mxu0 %v6155_v56  ;;  %897 = vmatpush1.msra.mxu1 %v6156_v44 }
  0xe7   :  { %827 = vmatprep.subr.mxu0 %v6157_v55  ;;  %898 = vmatprep.subr.mxu1 %v6158_v46 }
  0xe8   :  { %828 = vmatpush1.msra.mxu0 %v6159_v47  ;;  %899 = vmatpush1.msra.mxu1 %v6160_v48 }
  0xe9   :  { %829 = vmatprep.subr.mxu0 %v4007_v1  ;;  %900 = vmatprep.subr.mxu1 %v6161_v52 }
  0xea   :  { %830 = vmatpush1.msra.mxu0 %v4013_v58  ;;  %901 = vmatpush1.msra.mxu1 %v6162_v54 }
  0xeb   :  { %831 = vmatprep.subr.mxu0 %v4019_v57  ;;  %902 = vmatprep.subr.mxu1 %v4021_v61  ;;  %v255_v61 = vlaneseq }
  0xec   :  { %832 = vmatpush1.msra.mxu0 %v4025_v60  ;;  %903 = vmatpush1.msra.mxu1 %v4027_v63  ;;  %v253_v63 = vld [vmem:[#allocation14] sm:$0xf] }
  0xed   :  { %833 = vmatprep.subr.mxu0 %v4031_v62  ;;  %904 = vmatprep.subr.mxu1 %v4033_v50  ;;  %v256_v60 = vshrl.u32 %v255_v61, 7 }
  0xee   :  { %834 = vmatpush1.msra.mxu0 %v4037_v0  ;;  %867 = vmatprep.mubr.f32.mxu0 %v6097_v59 }
  0xef   :  { %905 = vmatpush1.msra.mxu1 %v4041_v51  ;;  %938 = vmatprep.mubr.f32.mxu1 %v6097_v59  ;;  %v257_v57 = vsub.s32 0, %v256_v60  ;;  %v261_v54 = vsub.s32 1, %v256_v60 }
  0xf0   :  { %984 = vmatprep.subr.mxu0 %v3657_v2  ;;  %1055 = vmatprep.subr.mxu1 %v3659_v3  ;;  %v265_v2 = vsub.s32 2, %v256_v60 }
  0xf1   :  { %v4185_v58 = vrot.slane %v253_v63, %v257_v57  ;;  %v4187_v50 = vrot.slane %v253_v63, %v261_v54  ;;  %v269_v54 = vsub.s32 3, %v256_v60 }
  0xf2   :  { %v4191_v55 = vrot.slane %v253_v63, %v265_v2 }
  0xf3   :  { %6163 = vst [vmem:[#allocation85_spill] sm:$0xff] %v4185_v58  ;;  %6164 = vst [vmem:[#allocation87_spill] sm:$0xff] %v4187_v50 }
 0x145   :  { %v341_v62 = vpop.f32.mrf.mxu0 }
 0x146   :  { %v342_v52 = vadd.f32 %v341_v62, %v4185_v58  ;;  %v412_v3 = vpop.f32.mrf.mxu1  ;;  %v4194_v62 = vrot.slane %v253_v63, %v269_v54  ;;  %v6202_v54 = vld [vmem:[#allocation58_spill] sm:$0xff] }
 0x147   :  { %v343_v0 = vpop.f32.mrf.mxu0  ;;  %v413_v56 = vadd.f32 %v412_v3, %v4191_v55 }
 0x148   :  { %v344_v59 = vadd.f32 %v343_v0, %v4187_v50  ;;  %v414_v57 = vpop.f32.mrf.mxu1 }
 0x167   :  { %v547_v51 = vpop.f32.mrf.mxu0  ;;  %v618_v44 = vpop.f32.mrf.mxu1 }
 0x168   :  { %v623_v1 = vadd.f32 %v547_v51, %v342_v52  ;;  %v625_v58 = vadd.f32 %v618_v44, %v413_v56  ;;  %v415_v51 = vadd.f32 %v414_v57, %v4194_v62 }
 0x169   :  { %v549_v48 = vpop.f32.mrf.mxu0  ;;  %v620_v0 = vpop.f32.mrf.mxu1 }
 0x16a   :  { %v2971_v47 = vmul.f32 -1.442695, %v623_v1  ;;  %v624_v61 = vadd.f32 %v549_v48, %v344_v59  ;;  %v2973_v52 = vmul.f32 -1.442695, %v625_v58  ;;  %v626_v1 = vadd.f32 %v620_v0, %v415_v51  ;;  %v6203_v0 = vld [vmem:[#allocation59_spill] sm:$0xff]  ;;  %v6204_v51 = vld [vmem:[#allocation60_spill] sm:$0xff] }
 0x16c   :  { %3017 = vpow2.f32 %v2971_v47  ;;  %v2972_v46 = vmul.f32 -1.442695, %v624_v61 }
 0x16e   :  { %3019 = vpow2.f32 %v2972_v46 }
 0x16f   :  { %3021 = vpow2.f32 %v2973_v52  ;;  %v6205_v52 = vld [vmem:[#allocation61_spill] sm:$0xff] }
 0x179   :  { %v3018_v50 = vpop.eup %3017 }
 0x17a   :  { %v636_v48 = vadd.f32 1.0, %v3018_v50 }
 0x17b   :  { %v3020_v47 = vpop.eup %3019 }
 0x17c   :  { %3023 = vrcp.f32 %v636_v48  ;;  %v637_v59 = vadd.f32 1.0, %v3020_v47  ;;  %v3022_v46 = vpop.eup %3021  ;;  %v6207_v48 = vld [vmem:[#allocation63_spill] sm:$0xff]  ;;  %v6208_v47 = vld [vmem:[#allocation64_spill] sm:$0xff] }
 0x17d   :  { %3025 = vtanh.f32 %v626_v1  ;;  %v638_v63 = vadd.f32 1.0, %v3022_v46  ;;  %v6206_v1 = vld [vmem:[#allocation62_spill] sm:$0xff] }
 0x17e   :  { %3027 = vrcp.f32 %v637_v59  ;;  %v6209_v59 = vld [vmem:[#allocation65_spill] sm:$0xff]  ;;  %v6210_v46 = vld [vmem:[#allocation66_spill] sm:$0xff] }
 0x17f   :  { %3029 = vrcp.f32 %v638_v63  ;;  %v6214_v63 = vld [vmem:[#allocation70_spill] sm:$0xff] }
 0x189   :  { %v3024_v60 = vpop.eup %3023 }
 0x18a   :  { %v3026_v2 = vpop.eup %3025 }
 0x18b   :  { %v3028_v3 = vpop.eup %3027  ;;  %v647_v44 = vmul.f32 %v3026_v2, %v3024_v60  ;;  %v6211_v60 = vld [vmem:[#allocation67_spill] sm:$0xff]  ;;  %v6212_v2 = vld [vmem:[#allocation68_spill] sm:$0xff] }
 0x18c   :  { %v646_v61 = vmul.f32 0.0, %v3028_v3  ;;  %v3030_v58 = vpop.eup %3029  ;;  %v6213_v3 = vld [vmem:[#allocation69_spill] sm:$0xff] }
 0x18e   :  { %v4197_v56 = vadd.f32 %v647_v44, %v646_v61  ;;  %v6215_v61 = vld [vmem:[#allocation71_spill] sm:$0xff]  ;;  %v6216_v44 = vld [vmem:[#allocation72_spill] sm:$0xff] }
 0x190   :  { %3031 = vtanh.f32 %v4197_v56 }
 0x19d   :  { %v3032_v50 = vpop.eup %3031 }
 0x19e   :  { %v4200_v57 = vmul.f32 %v3032_v50, %v3030_v58  ;;  %v6217_v58 = vld [vmem:[#allocation73_spill] sm:$0xff]  ;;  %v6218_v50 = vld [vmem:[#allocation74_spill] sm:$0xff] }
 0x1a0   :  { %868 = vmatmul.mubr.f32.vlgmr.msra.gmra.mxu0 %v4200_v57  ;;  %939 = vmatmul.mubr.f32.vlgmr.msra.gmra.mxu1 %v4200_v57 }
 0x1a1   :  { %985 = vmatpush1.msra.mxu0 %v3661_v4  ;;  %1056 = vmatpush1.msra.mxu1 %v3665_v5  ;;  %v6165_v4 = vld [vmem:[#allocation22_spill] sm:$0xff]  ;;  %v6166_v5 = vld [vmem:[#allocation23_spill] sm:$0xff] }
 0x1a2   :  { %986 = vmatprep.subr.mxu0 %v3667_v6  ;;  %1057 = vmatprep.subr.mxu1 %v3669_v7  ;;  %v6167_v6 = vld [vmem:[#allocation24_spill] sm:$0xff]  ;;  %v6168_v7 = vld [vmem:[#allocation25_spill] sm:$0xff] }
 0x1a3   :  { %987 = vmatpush1.msra.mxu0 %v3673_v8  ;;  %1058 = vmatpush1.msra.mxu1 %v3675_v9  ;;  %v6169_v8 = vld [vmem:[#allocation26_spill] sm:$0xff]  ;;  %v6170_v9 = vld [vmem:[#allocation27_spill] sm:$0xff] }
 0x1a4   :  { %988 = vmatprep.subr.mxu0 %v3677_v10  ;;  %1059 = vmatprep.subr.mxu1 %v3681_v11  ;;  %v6171_v10 = vld [vmem:[#allocation28_spill] sm:$0xff]  ;;  %v6172_v11 = vld [vmem:[#allocation29_spill] sm:$0xff] }
 0x1a5   :  { %989 = vmatpush1.msra.mxu0 %v3683_v12  ;;  %1060 = vmatpush1.msra.mxu1 %v3685_v13  ;;  %v6173_v12 = vld [vmem:[#allocation30_spill] sm:$0xff]  ;;  %v6174_v13 = vld [vmem:[#allocation31_spill] sm:$0xff] }
 0x1a6   :  { %990 = vmatprep.subr.mxu0 %v3689_v14  ;;  %1061 = vmatprep.subr.mxu1 %v3691_v15  ;;  %v6175_v14 = vld [vmem:[#allocation32_spill] sm:$0xff]  ;;  %v6176_v15 = vld [vmem:[#allocation33_spill] sm:$0xff] }
 0x1a7   :  { %991 = vmatpush1.msra.mxu0 %v3695_v16  ;;  %1062 = vmatpush1.msra.mxu1 %v3697_v17  ;;  %v6177_v16 = vld [vmem:[#allocation34_spill] sm:$0xff]  ;;  %v6178_v17 = vld [vmem:[#allocation35_spill] sm:$0xff] }
 0x1a8   :  { %992 = vmatprep.subr.mxu0 %v3701_v18  ;;  %1063 = vmatprep.subr.mxu1 %v3703_v19  ;;  %v6179_v18 = vld [vmem:[#allocation36_spill] sm:$0xff]  ;;  %v6180_v19 = vld [vmem:[#allocation37_spill] sm:$0xff] }
 0x1a9   :  { %993 = vmatpush1.msra.mxu0 %v3707_v20  ;;  %1064 = vmatpush1.msra.mxu1 %v3709_v21  ;;  %v6181_v20 = vld [vmem:[#allocation38_spill] sm:$0xff]  ;;  %v6182_v21 = vld [vmem:[#allocation39_spill] sm:$0xff] }
 0x1aa   :  { %994 = vmatprep.subr.mxu0 %v3713_v22  ;;  %1065 = vmatprep.subr.mxu1 %v3715_v23  ;;  %v6183_v22 = vld [vmem:[#allocation40_spill] sm:$0xff] }
 0x1ab   :  { %995 = vmatpush1.msra.mxu0 %v3719_v24  ;;  %1066 = vmatpush1.msra.mxu1 %v3721_v25  ;;  %v4263_v23 = vld [vmem:[#allocation2 + $0x10] sm:$0xff]  ;;  %v6185_v24 = vld [vmem:[#allocation42_spill] sm:$0xff] }
 0x1ac   :  { %996 = vmatprep.subr.mxu0 %v3727_v26  ;;  %1067 = vmatprep.subr.mxu1 %v3729_v27  ;;  %6184 = vst [vmem:[#allocation89_spill] sm:$0xff] %v4263_v23  ;;  %v6186_v25 = vld [vmem:[#allocation41_spill] sm:$0xff]  ;;  %v6187_v26 = vld [vmem:[#allocation43_spill] sm:$0xff]  ;;  %v6188_v27 = vld [vmem:[#allocation44_spill] sm:$0xff] }
 0x1ad   :  { %997 = vmatpush1.msra.mxu0 %v3735_v28  ;;  %1068 = vmatpush1.msra.mxu1 %v3737_v29  ;;  %v6189_v28 = vld [vmem:[#allocation45_spill] sm:$0xff]  ;;  %v142_v29 = vld [vmem:[%s141_s3] sm:$0x1] }
 0x1ae   :  { %998 = vmatprep.subr.mxu0 %v3741_v30  ;;  %1069 = vmatprep.subr.mxu1 %v3743_v31  ;;  %143 = vst [vmem:[#allocation2 + $0x10] sm:$0x1] %v142_v29  ;;  %v146_v30 = vld [vmem:[%s145_s11] sm:$0x1]  ;;  %v6246_v29 = vld [vmem:[#allocation105_spill] sm:$0xff] }
 0x1af   :  { %999 = vmatpush1.msra.mxu0 %v3747_v32  ;;  %1070 = vmatpush1.msra.mxu1 %v3749_v33  ;;  %147 = vst [vmem:[#allocation2 + $0x11] sm:$0x1] %v146_v30  ;;  %v6190_v32 = vld [vmem:[#allocation46_spill] sm:$0xff]  ;;  %v6191_v33 = vld [vmem:[#allocation47_spill] sm:$0xff] }
 0x1b0   :  { %1000 = vmatprep.subr.mxu0 %v3753_v34  ;;  %1071 = vmatprep.subr.mxu1 %v3755_v35  ;;  %v6192_v34 = vld [vmem:[#allocation48_spill] sm:$0xff]  ;;  %v6193_v35 = vld [vmem:[#allocation49_spill] sm:$0xff]  ;;  %v6247_v30 = vld [vmem:[#allocation106_spill] sm:$0xff] }
 0x1b1   :  { %1001 = vmatpush1.msra.mxu0 %v3759_v36  ;;  %1072 = vmatpush1.msra.mxu1 %v3761_v37  ;;  %v6194_v36 = vld [vmem:[#allocation50_spill] sm:$0xff]  ;;  %v6195_v37 = vld [vmem:[#allocation51_spill] sm:$0xff] }
 0x1b2   :  { %1002 = vmatprep.subr.mxu0 %v3765_v38  ;;  %1073 = vmatprep.subr.mxu1 %v3767_v39  ;;  %v6196_v38 = vld [vmem:[#allocation52_spill] sm:$0xff]  ;;  %v6197_v39 = vld [vmem:[#allocation53_spill] sm:$0xff] }
 0x1b3   :  { %1003 = vmatpush1.msra.mxu0 %v3771_v40  ;;  %1074 = vmatpush1.msra.mxu1 %v3773_v41  ;;  %v6198_v40 = vld [vmem:[#allocation54_spill] sm:$0xff]  ;;  %v6199_v41 = vld [vmem:[#allocation55_spill] sm:$0xff] }
 0x1b4   :  { %1004 = vmatprep.subr.mxu0 %v3777_v42  ;;  %1075 = vmatprep.subr.mxu1 %v3779_v43  ;;  %v6200_v42 = vld [vmem:[#allocation56_spill] sm:$0xff]  ;;  %v6201_v43 = vld [vmem:[#allocation57_spill] sm:$0xff] }
 0x1b5   :  { %1005 = vmatpush1.msra.mxu0 %v6165_v4  ;;  %1076 = vmatpush1.msra.mxu1 %v6166_v5  ;;  %v6219_v4 = vld [vmem:[#allocation75_spill] sm:$0xff]  ;;  %v6220_v5 = vld [vmem:[#allocation76_spill] sm:$0xff] }
 0x1b6   :  { %1006 = vmatprep.subr.mxu0 %v6167_v6  ;;  %1077 = vmatprep.subr.mxu1 %v6168_v7  ;;  %v983_v31 = vld [vmem:[#allocation2 + $0x10] sm:$0xff]  ;;  %v6222_v7 = vld [vmem:[#allocation78_spill] sm:$0xff] }
 0x1b7   :  { %1007 = vmatpush1.msra.mxu0 %v6169_v8  ;;  %1078 = vmatpush1.msra.mxu1 %v6170_v9  ;;  %v6221_v6 = vld [vmem:[#allocation77_spill] sm:$0xff]  ;;  %v6223_v8 = vld [vmem:[#allocation79_spill] sm:$0xff]  ;;  %v6224_v9 = vld [vmem:[#allocation80_spill] sm:$0xff] }
 0x1b8   :  { %1008 = vmatprep.subr.mxu0 %v6171_v10  ;;  %1079 = vmatprep.subr.mxu1 %v6172_v11  ;;  %v6225_v10 = vld [vmem:[#allocation81_spill] sm:$0xff]  ;;  %v6226_v11 = vld [vmem:[#allocation82_spill] sm:$0xff] }
 0x1b9   :  { %1009 = vmatpush1.msra.mxu0 %v6173_v12  ;;  %1080 = vmatpush1.msra.mxu1 %v6174_v13  ;;  %v6227_v12 = vld [vmem:[#allocation83_spill] sm:$0xff]  ;;  %v6228_v13 = vld [vmem:[#allocation84_spill] sm:$0xff] }
 0x1ba   :  { %1010 = vmatprep.subr.mxu0 %v6175_v14  ;;  %1081 = vmatprep.subr.mxu1 %v6176_v15  ;;  %v6229_v14 = vld [vmem:[#allocation86_spill] sm:$0xff]  ;;  %v6230_v15 = vld [vmem:[#allocation88_spill] sm:$0xff] }
 0x1bb   :  { %1011 = vmatpush1.msra.mxu0 %v6177_v16  ;;  %1082 = vmatpush1.msra.mxu1 %v6178_v17  ;;  %v6231_v16 = vld [vmem:[#allocation90_spill] sm:$0xff]  ;;  %v6232_v17 = vld [vmem:[#allocation91_spill] sm:$0xff] }
 0x1bc   :  { %1012 = vmatprep.subr.mxu0 %v6179_v18  ;;  %1083 = vmatprep.subr.mxu1 %v6180_v19  ;;  %v6233_v18 = vld [vmem:[#allocation92_spill] sm:$0xff]  ;;  %v6234_v19 = vld [vmem:[#allocation93_spill] sm:$0xff] }
 0x1bd   :  { %1013 = vmatpush1.msra.mxu0 %v6181_v20  ;;  %1084 = vmatpush1.msra.mxu1 %v6182_v21  ;;  %v6235_v20 = vld [vmem:[#allocation94_spill] sm:$0xff]  ;;  %v6236_v21 = vld [vmem:[#allocation95_spill] sm:$0xff] }
 0x1be   :  { %1014 = vmatprep.subr.mxu0 %v6183_v22  ;;  %1048 = vmatprep.mubr.f32.mxu0 %v4263_v23  ;;  %v6238_v22 = vld [vmem:[#allocation97_spill] sm:$0xff] }
 0x1bf   :  { %1015 = vmatpush1.msra.mxu0 %v6185_v24  ;;  %1085 = vmatprep.subr.mxu1 %v6186_v25  ;;  %v6240_v24 = vld [vmem:[#allocation99_spill] sm:$0xff]  ;;  %v6242_v25 = vld [vmem:[#allocation101_spill] sm:$0xff] }
 0x1c0   :  { %1086 = vmatpush1.msra.mxu1 %v6187_v26  ;;  %1119 = vmatprep.mubr.f32.mxu1 %v4263_v23  ;;  %v6243_v26 = vld [vmem:[#allocation102_spill] sm:$0xff] }
 0x1c1   :  { %1126 = vmatprep.subr.mxu0 %v6188_v27  ;;  %1197 = vmatprep.subr.mxu1 %v6189_v28  ;;  %v6244_v27 = vld [vmem:[#allocation103_spill] sm:$0xff]  ;;  %v6245_v28 = vld [vmem:[#allocation104_spill] sm:$0xff] }
 0x1c2   :  { %1049 = vmatmul.mubr.f32.vlgmr.msra.gmra.mxu0 %v983_v31  ;;  %1120 = vmatmul.mubr.f32.vlgmr.msra.gmra.mxu1 %v983_v31  ;;  %v6248_v31 = vld [vmem:[#allocation107_spill] sm:$0xff] }
 0x1c3   :  { %1127 = vmatpush1.msra.mxu0 %v6190_v32  ;;  %1198 = vmatpush1.msra.mxu1 %v6191_v33  ;;  %v4336_v32 = vld [vmem:[#allocation11 + $0x1e8] sm:$0xff]  ;;  %v4339_v33 = vld [vmem:[#allocation11 + $0x1f8] sm:$0xff] }
 0x1c4   :  { %1128 = vmatprep.subr.mxu0 %v6192_v34  ;;  %1199 = vmatprep.subr.mxu1 %v6193_v35  ;;  %6249 = vst [vmem:[#allocation22_spill] sm:$0xff] %v4336_v32  ;;  %6250 = vst [vmem:[#allocation23_spill] sm:$0xff] %v4339_v33  ;;  %v727_v34 = vpop.f32.mrf.mxu0 }
 0x1c5   :  { %1129 = vmatpush1.msra.mxu0 %v6194_v36  ;;  %1200 = vmatpush1.msra.mxu1 %v6195_v37  ;;  %v6251_v36 = vld [vmem:[#allocation85_spill] sm:$0xff] }
 0x1c6   :  { %1130 = vmatprep.subr.mxu0 %v6196_v38  ;;  %1201 = vmatprep.subr.mxu1 %v6197_v39  ;;  %v729_v35 = vpop.f32.mrf.mxu0  ;;  %v728_v37 = vadd.f32 %v727_v34, %v6251_v36  ;;  %v6252_v39 = vld [vmem:[#allocation87_spill] sm:$0xff]  ;;  %v4407_v34 = vld [vmem:[#allocation11 + $0x148] sm:$0xff] }
 0x1c7   :  { %1131 = vmatpush1.msra.mxu0 %v6198_v40  ;;  %1202 = vmatpush1.msra.mxu1 %v6199_v41  ;;  %v730_v40 = vadd.f32 %v729_v35, %v6252_v39  ;;  %v4410_v35 = vld [vmem:[#allocation11 + $0x158] sm:$0xff] }
 0x1c8   :  { %1132 = vmatprep.subr.mxu0 %v6200_v42  ;;  %1203 = vmatprep.subr.mxu1 %v6201_v43  ;;  %v798_v43 = vpop.f32.mrf.mxu1 }
 0x1c9   :  { %1133 = vmatpush1.msra.mxu0 %v6202_v54  ;;  %1204 = vmatpush1.msra.mxu1 %v6203_v0 }
 0x1ca   :  { %1134 = vmatprep.subr.mxu0 %v6204_v51  ;;  %1205 = vmatprep.subr.mxu1 %v6205_v52  ;;  %v800_v52 = vpop.f32.mrf.mxu1 }
 0x1cb   :  { %1135 = vmatpush1.msra.mxu0 %v6206_v1  ;;  %1206 = vmatpush1.msra.mxu1 %v6207_v48  ;;  %v799_v48 = vadd.f32 %v798_v43, %v4191_v55  ;;  %v4428_v43 = vld [vmem:[#allocation11 + $0x130] sm:$0xff] }
 0x1cc   :  { %1136 = vmatprep.subr.mxu0 %v6208_v47  ;;  %1207 = vmatprep.subr.mxu1 %v6209_v59 }
 0x1cd   :  { %1137 = vmatpush1.msra.mxu0 %v6210_v46  ;;  %1208 = vmatpush1.msra.mxu1 %v6211_v60  ;;  %v801_v46 = vadd.f32 %v800_v52, %v4194_v62  ;;  %v4440_v52 = vld [vmem:[#allocation11 + $0x110] sm:$0xff] }
 0x1ce   :  { %1138 = vmatprep.subr.mxu0 %v6212_v2  ;;  %1209 = vmatprep.subr.mxu1 %v6213_v3 }
 0x1cf   :  { %1139 = vmatpush1.msra.mxu0 %v6214_v63  ;;  %1210 = vmatpush1.msra.mxu1 %v6215_v61 }
 0x1d0   :  { %1140 = vmatprep.subr.mxu0 %v6216_v44  ;;  %1211 = vmatprep.subr.mxu1 %v6217_v58 }
 0x1d1   :  { %1141 = vmatpush1.msra.mxu0 %v6218_v50  ;;  %1212 = vmatpush1.msra.mxu1 %v6219_v4 }
 0x1d2   :  { %1142 = vmatprep.subr.mxu0 %v6220_v5  ;;  %1213 = vmatprep.subr.mxu1 %v6221_v6 }
 0x1d3   :  { %1143 = vmatpush1.msra.mxu0 %v6222_v7  ;;  %1214 = vmatpush1.msra.mxu1 %v6223_v8 }
 0x1d4   :  { %1144 = vmatprep.subr.mxu0 %v6224_v9  ;;  %1215 = vmatprep.subr.mxu1 %v6225_v10 }
 0x1d5   :  { %1145 = vmatpush1.msra.mxu0 %v6226_v11  ;;  %1216 = vmatpush1.msra.mxu1 %v6227_v12  ;;  %v2974_v12 = vld [vmem:[#allocation15] ss:$0 sm:$0xff] }
 0x1d6   :  { %1146 = vmatprep.subr.mxu0 %v6228_v13  ;;  %1217 = vmatprep.subr.mxu1 %v6150_v45  ;;  %v6237_v45 = vld [vmem:[#allocation96_spill] sm:$0xff]  ;;  %v2978_v13 = vld [vmem:[#allocation15 + $0x1] ss:$0 sm:$0xff] }
 0x1d7   :  { %1147 = vmatpush1.msra.mxu0 %v6229_v14  ;;  %1218 = vmatpush1.msra.mxu1 %v6152_v53  ;;  %v6239_v53 = vld [vmem:[#allocation98_spill] sm:$0xff] }
 0x1d8   :  { %1148 = vmatprep.subr.mxu0 %v6230_v15  ;;  %1219 = vmatprep.subr.mxu1 %v6154_v49  ;;  %v6241_v49 = vld [vmem:[#allocation100_spill] sm:$0xff]  ;;  %v658_v15 = vmul.f32 %v2974_v12, %v4200_v57  ;;  %v4503_v12 = vld [vmem:[#allocation11 + $0x48] sm:$0xff] }
 0x1d9   :  { %1149 = vmatpush1.msra.mxu0 %v6231_v16  ;;  %1220 = vmatpush1.msra.mxu1 %v6232_v17  ;;  %v4351_v17 = vld [vmem:[#allocation11 + $0x1e0] sm:$0xff]  ;;  %6263 = vst [vmem:[#allocation34_spill] sm:$0xff] %v4503_v12 }
 0x1da   :  { %1150 = vmatprep.subr.mxu0 %v6233_v18  ;;  %1221 = vmatprep.subr.mxu1 %v6234_v19  ;;  %v4357_v18 = vld [vmem:[#allocation11 + $0x1c8] sm:$0xff]  ;;  %v4360_v19 = vld [vmem:[#allocation11 + $0x1d8] sm:$0xff] }
 0x1db   :  { %1151 = vmatpush1.msra.mxu0 %v6235_v20  ;;  %1222 = vmatpush1.msra.mxu1 %v6236_v21  ;;  %v4365_v20 = vld [vmem:[#allocation11 + $0x1c0] sm:$0xff]  ;;  %v4368_v21 = vld [vmem:[#allocation11 + $0x1d0] sm:$0xff] }
 0x1dc   :  { %1152 = vmatprep.subr.mxu0 %v6237_v45  ;;  %1223 = vmatprep.subr.mxu1 %v6238_v22  ;;  %v4371_v45 = vld [vmem:[#allocation11 + $0x1a8] sm:$0xff]  ;;  %v4374_v22 = vld [vmem:[#allocation11 + $0x1b8] sm:$0xff] }
 0x1dd   :  { %1153 = vmatpush1.msra.mxu0 %v6239_v53  ;;  %1224 = vmatpush1.msra.mxu1 %v6240_v24  ;;  %v4377_v53 = vld [vmem:[#allocation11 + $0x1a0] sm:$0xff]  ;;  %v4380_v24 = vld [vmem:[#allocation11 + $0x1b0] sm:$0xff] }
 0x1de   :  { %1154 = vmatprep.subr.mxu0 %v6241_v49  ;;  %1225 = vmatprep.subr.mxu1 %v6242_v25  ;;  %v4383_v49 = vld [vmem:[#allocation11 + $0x188] sm:$0xff]  ;;  %v4386_v25 = vld [vmem:[#allocation11 + $0x198] sm:$0xff] }
 0x1df   :  { %1155 = vmatpush1.msra.mxu0 %v6243_v26  ;;  %1226 = vmatpush1.msra.mxu1 %v6244_v27  ;;  %v4389_v26 = vld [vmem:[#allocation11 + $0x180] sm:$0xff]  ;;  %v4392_v27 = vld [vmem:[#allocation11 + $0x190] sm:$0xff] }
 0x1e0   :  { %1156 = vmatprep.subr.mxu0 %v6245_v28  ;;  %1227 = vmatprep.subr.mxu1 %v6246_v29  ;;  %v4395_v28 = vld [vmem:[#allocation11 + $0x168] sm:$0xff]  ;;  %v4398_v29 = vld [vmem:[#allocation11 + $0x178] sm:$0xff] }
 0x1e1   :  { %1157 = vmatpush1.msra.mxu0 %v6247_v30  ;;  %1190 = vmatprep.mubr.f32.mxu0 %v4263_v23  ;;  %v4401_v30 = vld [vmem:[#allocation11 + $0x160] sm:$0xff] }
 0x1e2   :  { %1228 = vmatpush1.msra.mxu1 %v6248_v31  ;;  %1261 = vmatprep.mubr.f32.mxu1 %v4263_v23  ;;  %v4404_v31 = vld [vmem:[#allocation11 + $0x170] sm:$0xff] }
 0x1e3   :  { %1307 = vmatprep.subr.mxu0 %v4336_v32  ;;  %1378 = vmatprep.subr.mxu1 %v4339_v33 }
 0x260   :  { %v869_v38 = vpop.f32.mrf.mxu0  ;;  %v940_v1 = vpop.f32.mrf.mxu1 }
 0x261   :  { %v945_v41 = vadd.f32 %v869_v38, %v728_v37  ;;  %v947_v47 = vadd.f32 %v940_v1, %v799_v48  ;;  %v4413_v37 = vld [vmem:[#allocation11 + $0x140] sm:$0xff]  ;;  %v4416_v38 = vld [vmem:[#allocation11 + $0x150] sm:$0xff]  ;;  %v4443_v1 = vld [vmem:[#allocation11 + $0xe8] sm:$0xff] }
 0x262   :  { %v871_v42 = vpop.f32.mrf.mxu0  ;;  %v942_v59 = vpop.f32.mrf.mxu1  ;;  %v4446_v48 = vld [vmem:[#allocation11 + $0xf8] sm:$0xff] }
 0x263   :  { %v2975_v54 = vmul.f32 -1.442695, %v945_v41  ;;  %v946_v0 = vadd.f32 %v871_v42, %v730_v40  ;;  %v2977_v60 = vmul.f32 -1.442695, %v947_v47  ;;  %v948_v3 = vadd.f32 %v942_v59, %v801_v46  ;;  %v4419_v40 = vld [vmem:[#allocation11 + $0x128] sm:$0xff]  ;;  %v4422_v41 = vld [vmem:[#allocation11 + $0x138] sm:$0xff] }
 0x264   :  { %v4425_v42 = vld [vmem:[#allocation11 + $0x120] sm:$0xff]  ;;  %v4452_v59 = vld [vmem:[#allocation11 + $0xf0] sm:$0xff]  ;;  %v4455_v46 = vld [vmem:[#allocation11 + $0xc8] sm:$0xff] }
 0x265   :  { %3033 = vpow2.f32 %v2975_v54  ;;  %v2976_v51 = vmul.f32 -1.442695, %v946_v0  ;;  %v4431_v54 = vld [vmem:[#allocation11 + $0x108] sm:$0xff]  ;;  %v4434_v0 = vld [vmem:[#allocation11 + $0x118] sm:$0xff]  ;;  %v4449_v47 = vld [vmem:[#allocation11 + $0xe0] sm:$0xff] }
 0x267   :  { %3035 = vpow2.f32 %v2976_v51  ;;  %v4437_v51 = vld [vmem:[#allocation11 + $0x100] sm:$0xff] }
 0x268   :  { %3037 = vpow2.f32 %v2977_v60  ;;  %v4458_v60 = vld [vmem:[#allocation11 + $0xd8] sm:$0xff] }
 0x272   :  { %v3034_v2 = vpop.eup %3033 }
 0x273   :  { %v958_v63 = vadd.f32 1.0, %v3034_v2  ;;  %v4461_v2 = vld [vmem:[#allocation11 + $0xc0] sm:$0xff] }
 0x274   :  { %v3036_v61 = vpop.eup %3035 }
 0x275   :  { %3039 = vrcp.f32 %v958_v63  ;;  %v959_v44 = vadd.f32 1.0, %v3036_v61  ;;  %v3038_v58 = vpop.eup %3037  ;;  %v4467_v63 = vld [vmem:[#allocation11 + $0xa8] sm:$0xff]  ;;  %v4470_v61 = vld [vmem:[#allocation11 + $0xb8] sm:$0xff] }
 0x276   :  { %3041 = vtanh.f32 %v948_v3  ;;  %v960_v6 = vadd.f32 1.0, %v3038_v58  ;;  %v4464_v3 = vld [vmem:[#allocation11 + $0xd0] sm:$0xff] }
 0x277   :  { %3043 = vrcp.f32 %v959_v44  ;;  %v4473_v44 = vld [vmem:[#allocation11 + $0xa0] sm:$0xff]  ;;  %v4476_v58 = vld [vmem:[#allocation11 + $0xb0] sm:$0xff] }
 0x278   :  { %3045 = vrcp.f32 %v960_v6  ;;  %6253 = vst [vmem:[#allocation24_spill] sm:$0xff] %v4473_v44  ;;  %6254 = vst [vmem:[#allocation25_spill] sm:$0xff] %v4476_v58  ;;  %v4488_v6 = vld [vmem:[#allocation11 + $0x90] sm:$0xff] }
 0x279   :  { %6258 = vst [vmem:[#allocation29_spill] sm:$0xff] %v4488_v6 }
 0x282   :  { %v3040_v50 = vpop.eup %3039 }
 0x283   :  { %v3042_v4 = vpop.eup %3041 }
 0x284   :  { %v3044_v5 = vpop.eup %3043  ;;  %v969_v8 = vmul.f32 %v3042_v4, %v3040_v50  ;;  %v4479_v50 = vld [vmem:[#allocation11 + $0x88] sm:$0xff]  ;;  %v4482_v4 = vld [vmem:[#allocation11 + $0x98] sm:$0xff] }
 0x285   :  { %v968_v7 = vmul.f32 %v3044_v5, %v4197_v56  ;;  %v3046_v10 = vpop.eup %3045  ;;  %v4354_v56 = vld [vmem:[#allocation11 + $0x1f0] sm:$0xff]  ;;  %6255 = vst [vmem:[#allocation26_spill] sm:$0xff] %v4479_v50  ;;  %6256 = vst [vmem:[#allocation27_spill] sm:$0xff] %v4482_v4  ;;  %v4485_v5 = vld [vmem:[#allocation11 + $0x80] sm:$0xff] }
 0x286   :  { %6257 = vst [vmem:[#allocation28_spill] sm:$0xff] %v4485_v5 }
 0x287   :  { %v4347_v9 = vadd.f32 %v969_v8, %v968_v7  ;;  %v4491_v7 = vld [vmem:[#allocation11 + $0x68] sm:$0xff]  ;;  %v4494_v8 = vld [vmem:[#allocation11 + $0x78] sm:$0xff] }
 0x288   :  { %6259 = vst [vmem:[#allocation30_spill] sm:$0xff] %v4491_v7  ;;  %6260 = vst [vmem:[#allocation31_spill] sm:$0xff] %v4494_v8 }
 0x289   :  { %3047 = vtanh.f32 %v4347_v9 }
 0x296   :  { %v3048_v11 = vpop.eup %3047 }
 0x297   :  { %v972_v14 = vmul.f32 %v3048_v11, %v3046_v10  ;;  %v4497_v10 = vld [vmem:[#allocation11 + $0x60] sm:$0xff]  ;;  %v4500_v11 = vld [vmem:[#allocation11 + $0x70] sm:$0xff] }
 0x298   :  { %6261 = vst [vmem:[#allocation32_spill] sm:$0xff] %v4497_v10  ;;  %6262 = vst [vmem:[#allocation33_spill] sm:$0xff] %v4500_v11 }
 0x299   :  { %v981_v16 = vmul.f32 %v2978_v13, %v972_v14  ;;  %1191 = vmatmul.mubr.f32.vlgmr.msra.gmra.mxu0 %v972_v14  ;;  %1262 = vmatmul.mubr.f32.vlgmr.msra.gmra.mxu1 %v972_v14  ;;  %v4506_v13 = vld [vmem:[#allocation11 + $0x58] sm:$0xff]  ;;  %v4509_v14 = vld [vmem:[#allocation11 + $0x40] sm:$0xff] }
 0x29a   :  { %1308 = vmatpush1.msra.mxu0 %v4351_v17  ;;  %1379 = vmatpush1.msra.mxu1 %v4354_v56  ;;  %6264 = vst [vmem:[#allocation35_spill] sm:$0xff] %v4506_v13  ;;  %6265 = vst [vmem:[#allocation36_spill] sm:$0xff] %v4509_v14 }
 0x29b   :  { %1309 = vmatprep.subr.mxu0 %v4357_v18  ;;  %1380 = vmatprep.subr.mxu1 %v4360_v19  ;;  %v4363_v57 = vadd.f32 %v981_v16, %v658_v15  ;;  %v4512_v15 = vld [vmem:[#allocation11 + $0x50] sm:$0xff]  ;;  %v4515_v16 = vld [vmem:[#allocation11 + $0x28] sm:$0xff] }
 0x29c   :  { %1310 = vmatpush1.msra.mxu0 %v4365_v20  ;;  %1381 = vmatpush1.msra.mxu1 %v4368_v21  ;;  %6266 = vst [vmem:[#allocation37_spill] sm:$0xff] %v4512_v15  ;;  %6267 = vst [vmem:[#allocation38_spill] sm:$0xff] %v4515_v16 }
 0x29d   :  { %1311 = vmatprep.subr.mxu0 %v4371_v45  ;;  %1382 = vmatprep.subr.mxu1 %v4374_v22 }
 0x29e   :  { %1312 = vmatpush1.msra.mxu0 %v4377_v53  ;;  %1383 = vmatpush1.msra.mxu1 %v4380_v24 }
 0x29f   :  { %1313 = vmatprep.subr.mxu0 %v4383_v49  ;;  %1384 = vmatprep.subr.mxu1 %v4386_v25 }
 0x2a0   :  { %1314 = vmatpush1.msra.mxu0 %v4389_v26  ;;  %1385 = vmatpush1.msra.mxu1 %v4392_v27 }
 0x2a1   :  { %1315 = vmatprep.subr.mxu0 %v4395_v28  ;;  %1386 = vmatprep.subr.mxu1 %v4398_v29 }
 0x2a2   :  { %1316 = vmatpush1.msra.mxu0 %v4401_v30  ;;  %1387 = vmatpush1.msra.mxu1 %v4404_v31 }
 0x2a3   :  { %1317 = vmatprep.subr.mxu0 %v4407_v34  ;;  %1388 = vmatprep.subr.mxu1 %v4410_v35 }
 0x2a4   :  { %1318 = vmatpush1.msra.mxu0 %v4413_v37  ;;  %1389 = vmatpush1.msra.mxu1 %v4416_v38 }
 0x2a5   :  { %1319 = vmatprep.subr.mxu0 %v4419_v40  ;;  %1390 = vmatprep.subr.mxu1 %v4422_v41 }
 0x2a6   :  { %1320 = vmatpush1.msra.mxu0 %v4425_v42  ;;  %1391 = vmatpush1.msra.mxu1 %v4428_v43 }
 0x2a7   :  { %1321 = vmatprep.subr.mxu0 %v4431_v54  ;;  %1392 = vmatprep.subr.mxu1 %v4434_v0 }
 0x2a8   :  { %1322 = vmatpush1.msra.mxu0 %v4437_v51  ;;  %1393 = vmatpush1.msra.mxu1 %v4440_v52 }
 0x2a9   :  { %1323 = vmatprep.subr.mxu0 %v4443_v1  ;;  %1394 = vmatprep.subr.mxu1 %v4446_v48 }
 0x2aa   :  { %1324 = vmatpush1.msra.mxu0 %v4449_v47  ;;  %1395 = vmatpush1.msra.mxu1 %v4452_v59 }
 0x2ab   :  { %1325 = vmatprep.subr.mxu0 %v4455_v46  ;;  %1396 = vmatprep.subr.mxu1 %v4458_v60 }
 0x2ac   :  { %1326 = vmatpush1.msra.mxu0 %v4461_v2  ;;  %1397 = vmatpush1.msra.mxu1 %v4464_v3 }
 0x2ad   :  { %1327 = vmatprep.subr.mxu0 %v4467_v63  ;;  %1398 = vmatprep.subr.mxu1 %v4470_v61 }
 0x2ae   :  { %1328 = vmatpush1.msra.mxu0 %v4473_v44  ;;  %1399 = vmatpush1.msra.mxu1 %v4476_v58 }
 0x2af   :  { %1329 = vmatprep.subr.mxu0 %v4479_v50  ;;  %1400 = vmatprep.subr.mxu1 %v4482_v4 }
 0x2b0   :  { %1330 = vmatpush1.msra.mxu0 %v4485_v5  ;;  %1401 = vmatpush1.msra.mxu1 %v4488_v6 }
 0x2b1   :  { %1331 = vmatprep.subr.mxu0 %v4491_v7  ;;  %1402 = vmatprep.subr.mxu1 %v4494_v8  ;;  %v1121_v7 = vpop.f32.mrf.mxu1 }
 0x2b2   :  { %1332 = vmatpush1.msra.mxu0 %v4497_v10  ;;  %1403 = vmatpush1.msra.mxu1 %v4500_v11  ;;  %v4518_v11 = vld [vmem:[#allocation11 + $0x38] sm:$0xff] }
 0x2b3   :  { %1333 = vmatprep.subr.mxu0 %v4503_v12  ;;  %1404 = vmatprep.subr.mxu1 %v4506_v13  ;;  %6268 = vst [vmem:[#allocation39_spill] sm:$0xff] %v4518_v11  ;;  %v4521_v12 = vld [vmem:[#allocation11 + $0x20] sm:$0xff]  ;;  %v4524_v13 = vld [vmem:[#allocation11 + $0x30] sm:$0xff]  ;;  %v4556_v10 = vld [vmem:[#allocation12 + $0x1d8] sm:$0xff]  ;;  %v1123_v4 = vpop.f32.mrf.mxu1 }
 0x2b4   :  { %1334 = vmatpush1.msra.mxu0 %v4509_v14  ;;  %1405 = vmatpush1.msra.mxu1 %v4512_v15  ;;  %6269 = vst [vmem:[#allocation40_spill] sm:$0xff] %v4521_v12  ;;  %6270 = vst [vmem:[#allocation42_spill] sm:$0xff] %v4524_v13  ;;  %v4527_v14 = vld [vmem:[#allocation11 + $0x8] sm:$0xff]  ;;  %v4531_v15 = vld [vmem:[#allocation11] sm:$0xff]  ;;  %v1124_v58 = vadd.f32 %v1123_v4, %v4194_v62 }
 0x2b5   :  { %1335 = vmatprep.subr.mxu0 %v4515_v16  ;;  %1406 = vmatprep.subr.mxu1 %v4518_v11  ;;  %6271 = vst [vmem:[#allocation41_spill] sm:$0xff] %v4527_v14  ;;  %6272 = vst [vmem:[#allocation43_spill] sm:$0xff] %v4531_v15  ;;  %v4534_v16 = vld [vmem:[#allocation11 + $0x18] sm:$0xff]  ;;  %v4537_v11 = vld [vmem:[#allocation11 + $0x10] sm:$0xff] }
 0x2b6   :  { %1336 = vmatpush1.msra.mxu0 %v4521_v12  ;;  %1407 = vmatpush1.msra.mxu1 %v4524_v13  ;;  %6273 = vst [vmem:[#allocation44_spill] sm:$0xff] %v4534_v16  ;;  %6274 = vst [vmem:[#allocation45_spill] sm:$0xff] %v4537_v11  ;;  %v4541_v13 = vld [vmem:[#allocation12 + $0x1e8] sm:$0xff] }
 0x2b7   :  { %1337 = vmatprep.subr.mxu0 %v4527_v14  ;;  %1371 = vmatprep.mubr.f32.mxu0 %v4263_v23  ;;  %6275 = vst [vmem:[#allocation46_spill] sm:$0xff] %v4541_v13  ;;  %v4544_v14 = vld [vmem:[#allocation12 + $0x1f8] sm:$0xff]  ;;  %6280 = vst [vmem:[#allocation51_spill] sm:$0xff] %v4556_v10  ;;  %v6340_v4 = vld [vmem:[#allocation25_spill] sm:$0xff] }
 0x2b8   :  { %1338 = vmatpush1.msra.mxu0 %v4531_v15  ;;  %1408 = vmatprep.subr.mxu1 %v4534_v16  ;;  %6276 = vst [vmem:[#allocation47_spill] sm:$0xff] %v4544_v14  ;;  %v150_v15 = vld [vmem:[%s149_s14] sm:$0x1] }
 0x2b9   :  { %1409 = vmatpush1.msra.mxu1 %v4537_v11  ;;  %1442 = vmatprep.mubr.f32.mxu1 %v4263_v23  ;;  %151 = vst [vmem:[#allocation2 + $0x18] sm:$0x1] %v150_v15  ;;  %v154_v16 = vld [vmem:[%s153_s15] sm:$0x1]  ;;  %v4547_v11 = vld [vmem:[#allocation12 + $0x1e0] sm:$0xff] }
 0x2ba   :  { %1449 = vmatprep.subr.mxu0 %v4541_v13  ;;  %1520 = vmatprep.subr.mxu1 %v4544_v14  ;;  %155 = vst [vmem:[#allocation2 + $0x19] sm:$0x1] %v154_v16  ;;  %6277 = vst [vmem:[#allocation48_spill] sm:$0xff] %v4547_v11  ;;  %v4550_v13 = vld [vmem:[#allocation12 + $0x1f0] sm:$0xff]  ;;  %v4553_v14 = vld [vmem:[#allocation12 + $0x1c8] sm:$0xff] }
 0x2bb   :  { %6278 = vst [vmem:[#allocation49_spill] sm:$0xff] %v4550_v13  ;;  %6279 = vst [vmem:[#allocation50_spill] sm:$0xff] %v4553_v14  ;;  %v4559_v15 = vld [vmem:[#allocation12 + $0x1c0] sm:$0xff]  ;;  %v4565_v16 = vld [vmem:[#allocation12 + $0x1a8] sm:$0xff] }
 0x2bc   :  { %6281 = vst [vmem:[#allocation52_spill] sm:$0xff] %v4559_v15  ;;  %6283 = vst [vmem:[#allocation54_spill] sm:$0xff] %v4565_v16 }
 0x2c1   :  { %v1306_v12 = vld [vmem:[#allocation2 + $0x18] sm:$0xff] }
 0x2c2   :  { %1372 = vmatmul.mubr.f32.vlgmr.msra.gmra.mxu0 %v1306_v12  ;;  %1443 = vmatmul.mubr.f32.vlgmr.msra.gmra.mxu1 %v1306_v12  ;;  %v4562_v12 = vld [vmem:[#allocation12 + $0x1d0] sm:$0xff] }
 0x2c3   :  { %1450 = vmatpush1.msra.mxu0 %v4547_v11  ;;  %1521 = vmatpush1.msra.mxu1 %v4550_v13  ;;  %6282 = vst [vmem:[#allocation53_spill] sm:$0xff] %v4562_v12  ;;  %v4568_v13 = vld [vmem:[#allocation12 + $0x1b8] sm:$0xff] }
 0x2c4   :  { %1451 = vmatprep.subr.mxu0 %v4553_v14  ;;  %1522 = vmatprep.subr.mxu1 %v4556_v10  ;;  %6284 = vst [vmem:[#allocation55_spill] sm:$0xff] %v4568_v13  ;;  %v4571_v14 = vld [vmem:[#allocation12 + $0x1a0] sm:$0xff]  ;;  %v4574_v10 = vld [vmem:[#allocation12 + $0x1b0] sm:$0xff] }
 0x2c5   :  { %1452 = vmatpush1.msra.mxu0 %v4559_v15  ;;  %1523 = vmatpush1.msra.mxu1 %v4562_v12  ;;  %6285 = vst [vmem:[#allocation56_spill] sm:$0xff] %v4571_v14  ;;  %6286 = vst [vmem:[#allocation57_spill] sm:$0xff] %v4574_v10  ;;  %v4577_v15 = vld [vmem:[#allocation12 + $0x188] sm:$0xff]  ;;  %v4580_v12 = vld [vmem:[#allocation12 + $0x198] sm:$0xff] }
 0x2c6   :  { %1453 = vmatprep.subr.mxu0 %v4565_v16  ;;  %1524 = vmatprep.subr.mxu1 %v4568_v13  ;;  %6287 = vst [vmem:[#allocation58_spill] sm:$0xff] %v4577_v15  ;;  %6288 = vst [vmem:[#allocation59_spill] sm:$0xff] %v4580_v12  ;;  %v4583_v16 = vld [vmem:[#allocation12 + $0x180] sm:$0xff]  ;;  %v4586_v13 = vld [vmem:[#allocation12 + $0x190] sm:$0xff] }
 0x2c7   :  { %1454 = vmatpush1.msra.mxu0 %v4571_v14  ;;  %1525 = vmatpush1.msra.mxu1 %v4574_v10  ;;  %6289 = vst [vmem:[#allocation60_spill] sm:$0xff] %v4583_v16  ;;  %6290 = vst [vmem:[#allocation61_spill] sm:$0xff] %v4586_v13  ;;  %v4589_v14 = vld [vmem:[#allocation12 + $0x168] sm:$0xff]  ;;  %v4592_v10 = vld [vmem:[#allocation12 + $0x178] sm:$0xff] }
 0x2c8   :  { %1455 = vmatprep.subr.mxu0 %v4577_v15  ;;  %1526 = vmatprep.subr.mxu1 %v4580_v12  ;;  %6291 = vst [vmem:[#allocation62_spill] sm:$0xff] %v4589_v14  ;;  %6292 = vst [vmem:[#allocation63_spill] sm:$0xff] %v4592_v10  ;;  %v4595_v15 = vld [vmem:[#allocation12 + $0x160] sm:$0xff]  ;;  %v4598_v12 = vld [vmem:[#allocation12 + $0x170] sm:$0xff] }
 0x2c9   :  { %1456 = vmatpush1.msra.mxu0 %v4583_v16  ;;  %1527 = vmatpush1.msra.mxu1 %v4586_v13  ;;  %6293 = vst [vmem:[#allocation64_spill] sm:$0xff] %v4595_v15  ;;  %6294 = vst [vmem:[#allocation65_spill] sm:$0xff] %v4598_v12  ;;  %v4601_v16 = vld [vmem:[#allocation12 + $0x148] sm:$0xff]  ;;  %v4604_v13 = vld [vmem:[#allocation12 + $0x158] sm:$0xff] }
 0x2ca   :  { %1457 = vmatprep.subr.mxu0 %v4589_v14  ;;  %1528 = vmatprep.subr.mxu1 %v4592_v10  ;;  %6295 = vst [vmem:[#allocation66_spill] sm:$0xff] %v4601_v16  ;;  %6296 = vst [vmem:[#allocation67_spill] sm:$0xff] %v4604_v13  ;;  %v4607_v14 = vld [vmem:[#allocation12 + $0x140] sm:$0xff]  ;;  %v4610_v10 = vld [vmem:[#allocation12 + $0x150] sm:$0xff] }
 0x2cb   :  { %1458 = vmatpush1.msra.mxu0 %v4595_v15  ;;  %1529 = vmatpush1.msra.mxu1 %v4598_v12  ;;  %6297 = vst [vmem:[#allocation68_spill] sm:$0xff] %v4607_v14  ;;  %6298 = vst [vmem:[#allocation69_spill] sm:$0xff] %v4610_v10  ;;  %v4613_v15 = vld [vmem:[#allocation12 + $0x128] sm:$0xff]  ;;  %v4616_v12 = vld [vmem:[#allocation12 + $0x138] sm:$0xff] }
 0x2cc   :  { %1459 = vmatprep.subr.mxu0 %v4601_v16  ;;  %1530 = vmatprep.subr.mxu1 %v4604_v13  ;;  %6299 = vst [vmem:[#allocation70_spill] sm:$0xff] %v4613_v15  ;;  %6300 = vst [vmem:[#allocation71_spill] sm:$0xff] %v4616_v12  ;;  %v4619_v16 = vld [vmem:[#allocation12 + $0x120] sm:$0xff]  ;;  %v4622_v13 = vld [vmem:[#allocation12 + $0x130] sm:$0xff] }
 0x2cd   :  { %1460 = vmatpush1.msra.mxu0 %v4607_v14  ;;  %1531 = vmatpush1.msra.mxu1 %v4610_v10  ;;  %6301 = vst [vmem:[#allocation72_spill] sm:$0xff] %v4619_v16  ;;  %6302 = vst [vmem:[#allocation73_spill] sm:$0xff] %v4622_v13  ;;  %v4625_v14 = vld [vmem:[#allocation12 + $0x108] sm:$0xff]  ;;  %v4628_v10 = vld [vmem:[#allocation12 + $0x118] sm:$0xff] }
 0x2ce   :  { %1461 = vmatprep.subr.mxu0 %v4613_v15  ;;  %1532 = vmatprep.subr.mxu1 %v4616_v12  ;;  %6303 = vst [vmem:[#allocation74_spill] sm:$0xff] %v4625_v14  ;;  %6304 = vst [vmem:[#allocation75_spill] sm:$0xff] %v4628_v10  ;;  %v4631_v15 = vld [vmem:[#allocation12 + $0x100] sm:$0xff]  ;;  %v4634_v12 = vld [vmem:[#allocation12 + $0x110] sm:$0xff] }
 0x2cf   :  { %1462 = vmatpush1.msra.mxu0 %v4619_v16  ;;  %1533 = vmatpush1.msra.mxu1 %v4622_v13  ;;  %6305 = vst [vmem:[#allocation76_spill] sm:$0xff] %v4631_v15  ;;  %6306 = vst [vmem:[#allocation77_spill] sm:$0xff] %v4634_v12  ;;  %v4637_v16 = vld [vmem:[#allocation12 + $0xe8] sm:$0xff]  ;;  %v4640_v13 = vld [vmem:[#allocation12 + $0xf8] sm:$0xff] }
 0x2d0   :  { %1463 = vmatprep.subr.mxu0 %v4625_v14  ;;  %1534 = vmatprep.subr.mxu1 %v4628_v10  ;;  %6307 = vst [vmem:[#allocation78_spill] sm:$0xff] %v4637_v16  ;;  %6308 = vst [vmem:[#allocation79_spill] sm:$0xff] %v4640_v13  ;;  %v4643_v14 = vld [vmem:[#allocation12 + $0xe0] sm:$0xff]  ;;  %v4646_v10 = vld [vmem:[#allocation12 + $0xf0] sm:$0xff] }
 0x2d1   :  { %1464 = vmatpush1.msra.mxu0 %v4631_v15  ;;  %1535 = vmatpush1.msra.mxu1 %v4634_v12  ;;  %6309 = vst [vmem:[#allocation80_spill] sm:$0xff] %v4643_v14  ;;  %6310 = vst [vmem:[#allocation81_spill] sm:$0xff] %v4646_v10  ;;  %v4649_v15 = vld [vmem:[#allocation12 + $0xc8] sm:$0xff]  ;;  %v4652_v12 = vld [vmem:[#allocation12 + $0xd8] sm:$0xff] }
 0x2d2   :  { %1465 = vmatprep.subr.mxu0 %v4637_v16  ;;  %1536 = vmatprep.subr.mxu1 %v4640_v13  ;;  %6311 = vst [vmem:[#allocation82_spill] sm:$0xff] %v4649_v15  ;;  %6312 = vst [vmem:[#allocation83_spill] sm:$0xff] %v4652_v12  ;;  %v4655_v16 = vld [vmem:[#allocation12 + $0xc0] sm:$0xff]  ;;  %v4658_v13 = vld [vmem:[#allocation12 + $0xd0] sm:$0xff] }
 0x2d3   :  { %1466 = vmatpush1.msra.mxu0 %v4643_v14  ;;  %1537 = vmatpush1.msra.mxu1 %v4646_v10  ;;  %6313 = vst [vmem:[#allocation84_spill] sm:$0xff] %v4655_v16  ;;  %6314 = vst [vmem:[#allocation86_spill] sm:$0xff] %v4658_v13  ;;  %v4661_v14 = vld [vmem:[#allocation12 + $0xa8] sm:$0xff]  ;;  %v4664_v10 = vld [vmem:[#allocation12 + $0xb8] sm:$0xff] }
 0x2d4   :  { %1467 = vmatprep.subr.mxu0 %v4649_v15  ;;  %1538 = vmatprep.subr.mxu1 %v4652_v12  ;;  %6315 = vst [vmem:[#allocation88_spill] sm:$0xff] %v4661_v14  ;;  %6316 = vst [vmem:[#allocation90_spill] sm:$0xff] %v4664_v10  ;;  %v4667_v15 = vld [vmem:[#allocation12 + $0xa0] sm:$0xff]  ;;  %v4670_v12 = vld [vmem:[#allocation12 + $0xb0] sm:$0xff] }
 0x2d5   :  { %1468 = vmatpush1.msra.mxu0 %v4655_v16  ;;  %1539 = vmatpush1.msra.mxu1 %v4658_v13  ;;  %6317 = vst [vmem:[#allocation91_spill] sm:$0xff] %v4667_v15  ;;  %6318 = vst [vmem:[#allocation92_spill] sm:$0xff] %v4670_v12  ;;  %v4673_v16 = vld [vmem:[#allocation12 + $0x88] sm:$0xff]  ;;  %v4676_v13 = vld [vmem:[#allocation12 + $0x98] sm:$0xff] }
 0x2d6   :  { %1469 = vmatprep.subr.mxu0 %v4661_v14  ;;  %1540 = vmatprep.subr.mxu1 %v4664_v10  ;;  %6319 = vst [vmem:[#allocation93_spill] sm:$0xff] %v4673_v16  ;;  %6320 = vst [vmem:[#allocation94_spill] sm:$0xff] %v4676_v13  ;;  %v4679_v14 = vld [vmem:[#allocation12 + $0x80] sm:$0xff]  ;;  %v4682_v10 = vld [vmem:[#allocation12 + $0x90] sm:$0xff] }
 0x2d7   :  { %1470 = vmatpush1.msra.mxu0 %v4667_v15  ;;  %1541 = vmatpush1.msra.mxu1 %v4670_v12  ;;  %6321 = vst [vmem:[#allocation95_spill] sm:$0xff] %v4679_v14  ;;  %6322 = vst [vmem:[#allocation96_spill] sm:$0xff] %v4682_v10  ;;  %v4685_v15 = vld [vmem:[#allocation12 + $0x68] sm:$0xff]  ;;  %v4688_v12 = vld [vmem:[#allocation12 + $0x78] sm:$0xff] }
 0x2d8   :  { %1471 = vmatprep.subr.mxu0 %v4673_v16  ;;  %1542 = vmatprep.subr.mxu1 %v4676_v13  ;;  %6323 = vst [vmem:[#allocation97_spill] sm:$0xff] %v4685_v15  ;;  %6324 = vst [vmem:[#allocation98_spill] sm:$0xff] %v4688_v12  ;;  %v4691_v16 = vld [vmem:[#allocation12 + $0x60] sm:$0xff]  ;;  %v4694_v13 = vld [vmem:[#allocation12 + $0x70] sm:$0xff] }
 0x2d9   :  { %1472 = vmatpush1.msra.mxu0 %v4679_v14  ;;  %1543 = vmatpush1.msra.mxu1 %v4682_v10  ;;  %6325 = vst [vmem:[#allocation99_spill] sm:$0xff] %v4691_v16  ;;  %6326 = vst [vmem:[#allocation100_spill] sm:$0xff] %v4694_v13  ;;  %v4697_v14 = vld [vmem:[#allocation12 + $0x48] sm:$0xff]  ;;  %v4700_v10 = vld [vmem:[#allocation12 + $0x58] sm:$0xff] }
 0x2da   :  { %1473 = vmatprep.subr.mxu0 %v4685_v15  ;;  %1544 = vmatprep.subr.mxu1 %v4688_v12  ;;  %6327 = vst [vmem:[#allocation101_spill] sm:$0xff] %v4697_v14  ;;  %6328 = vst [vmem:[#allocation102_spill] sm:$0xff] %v4700_v10  ;;  %v4703_v15 = vld [vmem:[#allocation12 + $0x40] sm:$0xff]  ;;  %v4706_v12 = vld [vmem:[#allocation12 + $0x50] sm:$0xff] }
 0x2db   :  { %1474 = vmatpush1.msra.mxu0 %v4691_v16  ;;  %1545 = vmatpush1.msra.mxu1 %v4694_v13  ;;  %6329 = vst [vmem:[#allocation103_spill] sm:$0xff] %v4703_v15  ;;  %6330 = vst [vmem:[#allocation104_spill] sm:$0xff] %v4706_v12  ;;  %v4709_v16 = vld [vmem:[#allocation12 + $0x28] sm:$0xff]  ;;  %v4712_v13 = vld [vmem:[#allocation12 + $0x38] sm:$0xff] }
 0x2dc   :  { %1475 = vmatprep.subr.mxu0 %v4697_v14  ;;  %1546 = vmatprep.subr.mxu1 %v4700_v10  ;;  %6331 = vst [vmem:[#allocation105_spill] sm:$0xff] %v4709_v16  ;;  %6332 = vst [vmem:[#allocation106_spill] sm:$0xff] %v4712_v13  ;;  %v4715_v14 = vld [vmem:[#allocation12 + $0x20] sm:$0xff]  ;;  %v4718_v10 = vld [vmem:[#allocation12 + $0x30] sm:$0xff] }
 0x2dd   :  { %1476 = vmatpush1.msra.mxu0 %v4703_v15  ;;  %1547 = vmatpush1.msra.mxu1 %v4706_v12  ;;  %6333 = vst [vmem:[#allocation107_spill] sm:$0xff] %v4715_v14  ;;  %6334 = vst [vmem:[#allocation87_spill] sm:$0xff] %v4718_v10  ;;  %v4721_v15 = vld [vmem:[#allocation12 + $0x8] sm:$0xff]  ;;  %v4724_v12 = vld [vmem:[#allocation12 + $0x18] sm:$0xff] }
 0x2de   :  { %1477 = vmatprep.subr.mxu0 %v4709_v16  ;;  %1548 = vmatprep.subr.mxu1 %v4712_v13  ;;  %6335 = vst [vmem:[#allocation108_spill] sm:$0xff] %v4721_v15  ;;  %6336 = vst [vmem:[#allocation109_spill] sm:$0xff] %v4724_v12  ;;  %v4727_v16 = vld [vmem:[#allocation12] sm:$0xff]  ;;  %v4731_v13 = vld [vmem:[#allocation12 + $0x10] sm:$0xff] }
 0x2df   :  { %1478 = vmatpush1.msra.mxu0 %v4715_v14  ;;  %1549 = vmatpush1.msra.mxu1 %v4718_v10  ;;  %6337 = vst [vmem:[#allocation110_spill] sm:$0xff] %v4727_v16  ;;  %6338 = vst [vmem:[#allocation111_spill] sm:$0xff] %v4731_v13 }
 0x2e0   :  { %1479 = vmatprep.subr.mxu0 %v4721_v15  ;;  %1550 = vmatprep.subr.mxu1 %v4724_v12  ;;  %v1050_v15 = vpop.f32.mrf.mxu0 }
 0x2e1   :  { %1480 = vmatpush1.msra.mxu0 %v4727_v16  ;;  %1513 = vmatprep.mubr.f32.mxu0 %v4263_v23  ;;  %v1051_v12 = vadd.f32 %v1050_v15, %v6251_v36 }
 0x2e2   :  { %1551 = vmatpush1.msra.mxu1 %v4731_v13  ;;  %1584 = vmatprep.mubr.f32.mxu1 %v4263_v23  ;;  %v1052_v10 = vpop.f32.mrf.mxu0 }
 0x2e3   :  { %1630 = vmatprep.subr.mxu0 %v4336_v32  ;;  %1701 = vmatprep.subr.mxu1 %v4339_v33  ;;  %v1053_v11 = vadd.f32 %v1052_v10, %v6252_v39  ;;  %v1122_v32 = vadd.f32 %v1121_v7, %v4191_v55 }
 0x359   :  { %v1192_v14 = vpop.f32.mrf.mxu0  ;;  %v1263_v23 = vpop.f32.mrf.mxu1 }
 0x35a   :  { %v1268_v16 = vadd.f32 %v1192_v14, %v1051_v12  ;;  %v1270_v33 = vadd.f32 %v1263_v23, %v1122_v32 }
 0x35b   :  { %v1194_v8 = vpop.f32.mrf.mxu0  ;;  %v1265_v50 = vpop.f32.mrf.mxu1 }
 0x35c   :  { %v2979_v6 = vmul.f32 -1.442695, %v1268_v16  ;;  %v1269_v5 = vadd.f32 %v1194_v8, %v1053_v11  ;;  %v2981_v15 = vmul.f32 -1.442695, %v1270_v33  ;;  %v1271_v44 = vadd.f32 %v1265_v50, %v1124_v58  ;;  %v2982_v58 = vld [vmem:[#allocation15 + $0x2] ss:$0 sm:$0xff] }
 0x35d   :  { %v6341_v16 = vld [vmem:[#allocation26_spill] sm:$0xff] }
 0x35e   :  { %3049 = vpow2.f32 %v2979_v6  ;;  %v2980_v13 = vmul.f32 -1.442695, %v1269_v5 }
 0x360   :  { %3051 = vpow2.f32 %v2980_v13 }
 0x361   :  { %3053 = vpow2.f32 %v2981_v15  ;;  %v6342_v15 = vld [vmem:[#allocation27_spill] sm:$0xff] }
 0x36b   :  { %v3050_v36 = vpop.eup %3049 }
 0x36c   :  { %v1281_v10 = vadd.f32 1.0, %v3050_v36 }
 0x36d   :  { %v3052_v14 = vpop.eup %3051 }
 0x36e   :  { %3055 = vrcp.f32 %v1281_v10  ;;  %v1282_v12 = vadd.f32 1.0, %v3052_v14  ;;  %v3054_v5 = vpop.eup %3053  ;;  %v6343_v10 = vld [vmem:[#allocation28_spill] sm:$0xff]  ;;  %v6344_v14 = vld [vmem:[#allocation29_spill] sm:$0xff] }
 0x36f   :  { %3057 = vtanh.f32 %v1271_v44  ;;  %v1283_v13 = vadd.f32 1.0, %v3054_v5  ;;  %v6346_v5 = vld [vmem:[#allocation31_spill] sm:$0xff] }
 0x370   :  { %3059 = vrcp.f32 %v1282_v12  ;;  %v6345_v12 = vld [vmem:[#allocation30_spill] sm:$0xff] }
 0x371   :  { %3061 = vrcp.f32 %v1283_v13  ;;  %v6350_v13 = vld [vmem:[#allocation35_spill] sm:$0xff] }
 0x37b   :  { %v3056_v6 = vpop.eup %3055 }
 0x37c   :  { %v3058_v8 = vpop.eup %3057 }
 0x37d   :  { %v3060_v11 = vpop.eup %3059  ;;  %v1292_v32 = vmul.f32 %v3058_v8, %v3056_v6  ;;  %v6347_v6 = vld [vmem:[#allocation32_spill] sm:$0xff]  ;;  %v6348_v8 = vld [vmem:[#allocation33_spill] sm:$0xff] }
 0x37e   :  { %v1291_v23 = vmul.f32 %v3060_v11, %v4347_v9  ;;  %v3062_v33 = vpop.eup %3061  ;;  %v6349_v11 = vld [vmem:[#allocation34_spill] sm:$0xff] }
 0x380   :  { %v4742_v7 = vadd.f32 %v1292_v32, %v1291_v23  ;;  %v6351_v23 = vld [vmem:[#allocation36_spill] sm:$0xff]  ;;  %v6352_v32 = vld [vmem:[#allocation37_spill] sm:$0xff] }
 0x382   :  { %3063 = vtanh.f32 %v4742_v7 }
 0x38f   :  { %v3064_v36 = vpop.eup %3063 }
 0x390   :  { %v1295_v50 = vmul.f32 %v3064_v36, %v3062_v33  ;;  %v6353_v33 = vld [vmem:[#allocation38_spill] sm:$0xff]  ;;  %v6354_v36 = vld [vmem:[#allocation39_spill] sm:$0xff] }
 0x392   :  { %1514 = vmatmul.mubr.f32.vlgmr.msra.gmra.mxu0 %v1295_v50  ;;  %1585 = vmatmul.mubr.f32.vlgmr.msra.gmra.mxu1 %v1295_v50  ;;  %v1304_v44 = vmul.f32 %v2982_v58, %v1295_v50  ;;  %v6355_v58 = vld [vmem:[#allocation40_spill] sm:$0xff]  ;;  %v6356_v50 = vld [vmem:[#allocation42_spill] sm:$0xff] }
 0x393   :  { %1631 = vmatpush1.msra.mxu0 %v4351_v17  ;;  %1702 = vmatpush1.msra.mxu1 %v4354_v56 }
 0x394   :  { %1632 = vmatprep.subr.mxu0 %v4357_v18  ;;  %1703 = vmatprep.subr.mxu1 %v4360_v19  ;;  %v4750_v9 = vadd.f32 %v1304_v44, %v4363_v57  ;;  %v6339_v57 = vld [vmem:[#allocation24_spill] sm:$0xff]  ;;  %v6357_v44 = vld [vmem:[#allocation41_spill] sm:$0xff] }
 0x395   :  { %1633 = vmatpush1.msra.mxu0 %v4365_v20  ;;  %1704 = vmatpush1.msra.mxu1 %v4368_v21 }
 0x396   :  { %1634 = vmatprep.subr.mxu0 %v4371_v45  ;;  %1705 = vmatprep.subr.mxu1 %v4374_v22 }
 0x397   :  { %1635 = vmatpush1.msra.mxu0 %v4377_v53  ;;  %1706 = vmatpush1.msra.mxu1 %v4380_v24 }
 0x398   :  { %1636 = vmatprep.subr.mxu0 %v4383_v49  ;;  %1707 = vmatprep.subr.mxu1 %v4386_v25 }
 0x399   :  { %1637 = vmatpush1.msra.mxu0 %v4389_v26  ;;  %1708 = vmatpush1.msra.mxu1 %v4392_v27 }
 0x39a   :  { %1638 = vmatprep.subr.mxu0 %v4395_v28  ;;  %1709 = vmatprep.subr.mxu1 %v4398_v29 }
 0x39b   :  { %1639 = vmatpush1.msra.mxu0 %v4401_v30  ;;  %1710 = vmatpush1.msra.mxu1 %v4404_v31 }
 0x39c   :  { %1640 = vmatprep.subr.mxu0 %v4407_v34  ;;  %1711 = vmatprep.subr.mxu1 %v4410_v35 }
 0x39d   :  { %1641 = vmatpush1.msra.mxu0 %v4413_v37  ;;  %1712 = vmatpush1.msra.mxu1 %v4416_v38 }
 0x39e   :  { %1642 = vmatprep.subr.mxu0 %v4419_v40  ;;  %1713 = vmatprep.subr.mxu1 %v4422_v41 }
 0x39f   :  { %1643 = vmatpush1.msra.mxu0 %v4425_v42  ;;  %1714 = vmatpush1.msra.mxu1 %v4428_v43 }
 0x3a0   :  { %1644 = vmatprep.subr.mxu0 %v4431_v54  ;;  %1715 = vmatprep.subr.mxu1 %v4434_v0 }
 0x3a1   :  { %1645 = vmatpush1.msra.mxu0 %v4437_v51  ;;  %1716 = vmatpush1.msra.mxu1 %v4440_v52 }
 0x3a2   :  { %1646 = vmatprep.subr.mxu0 %v4443_v1  ;;  %1717 = vmatprep.subr.mxu1 %v4446_v48 }
 0x3a3   :  { %1647 = vmatpush1.msra.mxu0 %v4449_v47  ;;  %1718 = vmatpush1.msra.mxu1 %v4452_v59 }
 0x3a4   :  { %1648 = vmatprep.subr.mxu0 %v4455_v46  ;;  %1719 = vmatprep.subr.mxu1 %v4458_v60 }
 0x3a5   :  { %1649 = vmatpush1.msra.mxu0 %v4461_v2  ;;  %1720 = vmatpush1.msra.mxu1 %v4464_v3 }
 0x3a6   :  { %1650 = vmatprep.subr.mxu0 %v4467_v63  ;;  %1721 = vmatprep.subr.mxu1 %v4470_v61 }
 0x3a7   :  { %1651 = vmatpush1.msra.mxu0 %v6339_v57  ;;  %1722 = vmatpush1.msra.mxu1 %v6340_v4 }
 0x3a8   :  { %1652 = vmatprep.subr.mxu0 %v6341_v16  ;;  %1723 = vmatprep.subr.mxu1 %v6342_v15 }
 0x3a9   :  { %1653 = vmatpush1.msra.mxu0 %v6343_v10  ;;  %1724 = vmatpush1.msra.mxu1 %v6344_v14 }
 0x3aa   :  { %1654 = vmatprep.subr.mxu0 %v6345_v12  ;;  %1725 = vmatprep.subr.mxu1 %v6346_v5  ;;  %v6373_v5 = vld [vmem:[#allocation57_spill] sm:$0xff] }
 0x3ab   :  { %1655 = vmatpush1.msra.mxu0 %v6347_v6  ;;  %1726 = vmatpush1.msra.mxu1 %v6348_v8  ;;  %v6358_v6 = vld [vmem:[#allocation89_spill] sm:$0xff]  ;;  %v6359_v8 = vld [vmem:[#allocation43_spill] sm:$0xff] }
 0x3ac   :  { %1656 = vmatprep.subr.mxu0 %v6349_v11  ;;  %1727 = vmatprep.subr.mxu1 %v6350_v13  ;;  %v6360_v11 = vld [vmem:[#allocation44_spill] sm:$0xff]  ;;  %v6361_v13 = vld [vmem:[#allocation45_spill] sm:$0xff] }
 0x3ad   :  { %1657 = vmatpush1.msra.mxu0 %v6351_v23  ;;  %1728 = vmatpush1.msra.mxu1 %v6352_v32  ;;  %v6362_v32 = vld [vmem:[#allocation46_spill] sm:$0xff] }
 0x3ae   :  { %1658 = vmatprep.subr.mxu0 %v6353_v33  ;;  %1729 = vmatprep.subr.mxu1 %v6354_v36  ;;  %v6363_v33 = vld [vmem:[#allocation47_spill] sm:$0xff]  ;;  %v6369_v36 = vld [vmem:[#allocation53_spill] sm:$0xff]  ;;  %v6370_v23 = vld [vmem:[#allocation54_spill] sm:$0xff] }
 0x3af   :  { %1659 = vmatpush1.msra.mxu0 %v6355_v58  ;;  %1730 = vmatpush1.msra.mxu1 %v6356_v50  ;;  %v158_v50 = vld [vmem:[%s157_s5] sm:$0x1] }
 0x3b0   :  { %1660 = vmatprep.subr.mxu0 %v6357_v44  ;;  %1694 = vmatprep.mubr.f32.mxu0 %v6358_v6  ;;  %159 = vst [vmem:[#allocation2 + $0x20] sm:$0x1] %v158_v50  ;;  %v162_v44 = vld [vmem:[%s161_s18] sm:$0x1]  ;;  %v6371_v50 = vld [vmem:[#allocation55_spill] sm:$0xff] }
 0x3b1   :  { %1661 = vmatpush1.msra.mxu0 %v6359_v8  ;;  %1731 = vmatprep.subr.mxu1 %v6360_v11  ;;  %163 = vst [vmem:[#allocation2 + $0x21] sm:$0x1] %v162_v44  ;;  %v6364_v11 = vld [vmem:[#allocation48_spill] sm:$0xff]  ;;  %v6366_v8 = vld [vmem:[#allocation50_spill] sm:$0xff] }
 0x3b2   :  { %1732 = vmatpush1.msra.mxu1 %v6361_v13  ;;  %1765 = vmatprep.mubr.f32.mxu1 %v6358_v6  ;;  %v6365_v13 = vld [vmem:[#allocation49_spill] sm:$0xff]  ;;  %v6372_v44 = vld [vmem:[#allocation56_spill] sm:$0xff] }
 0x3b3   :  { %1772 = vmatprep.subr.mxu0 %v6362_v32  ;;  %1843 = vmatprep.subr.mxu1 %v6363_v33  ;;  %v6367_v32 = vld [vmem:[#allocation51_spill] sm:$0xff]  ;;  %v6368_v33 = vld [vmem:[#allocation52_spill] sm:$0xff] }
 0x3b8   :  { %v1629_v58 = vld [vmem:[#allocation2 + $0x20] sm:$0xff] }
 0x3b9   :  { %1695 = vmatmul.mubr.f32.vlgmr.msra.gmra.mxu0 %v1629_v58  ;;  %1766 = vmatmul.mubr.f32.vlgmr.msra.gmra.mxu1 %v1629_v58  ;;  %v6374_v58 = vld [vmem:[#allocation58_spill] sm:$0xff] }
 0x3ba   :  { %1773 = vmatpush1.msra.mxu0 %v6364_v11  ;;  %1844 = vmatpush1.msra.mxu1 %v6365_v13  ;;  %v6375_v11 = vld [vmem:[#allocation59_spill] sm:$0xff]  ;;  %v6376_v13 = vld [vmem:[#allocation60_spill] sm:$0xff] }
 0x3bb   :  { %1774 = vmatprep.subr.mxu0 %v6366_v8  ;;  %1845 = vmatprep.subr.mxu1 %v6367_v32  ;;  %v6377_v8 = vld [vmem:[#allocation61_spill] sm:$0xff]  ;;  %v6378_v32 = vld [vmem:[#allocation62_spill] sm:$0xff] }
 0x3bc   :  { %1775 = vmatpush1.msra.mxu0 %v6368_v33  ;;  %1846 = vmatpush1.msra.mxu1 %v6369_v36  ;;  %v6379_v33 = vld [vmem:[#allocation63_spill] sm:$0xff]  ;;  %v6380_v36 = vld [vmem:[#allocation64_spill] sm:$0xff] }
 0x3bd   :  { %1776 = vmatprep.subr.mxu0 %v6370_v23  ;;  %1847 = vmatprep.subr.mxu1 %v6371_v50  ;;  %v6381_v23 = vld [vmem:[#allocation65_spill] sm:$0xff]  ;;  %v6382_v50 = vld [vmem:[#allocation66_spill] sm:$0xff] }
 0x3be   :  { %1777 = vmatpush1.msra.mxu0 %v6372_v44  ;;  %1848 = vmatpush1.msra.mxu1 %v6373_v5  ;;  %v6383_v44 = vld [vmem:[#allocation67_spill] sm:$0xff]  ;;  %v6384_v5 = vld [vmem:[#allocation68_spill] sm:$0xff] }
 0x3bf   :  { %1778 = vmatprep.subr.mxu0 %v6374_v58  ;;  %1849 = vmatprep.subr.mxu1 %v6375_v11  ;;  %v6385_v58 = vld [vmem:[#allocation69_spill] sm:$0xff]  ;;  %v6386_v11 = vld [vmem:[#allocation70_spill] sm:$0xff] }
 0x3c0   :  { %1779 = vmatpush1.msra.mxu0 %v6376_v13  ;;  %1850 = vmatpush1.msra.mxu1 %v6377_v8  ;;  %v6387_v13 = vld [vmem:[#allocation71_spill] sm:$0xff]  ;;  %v6388_v8 = vld [vmem:[#allocation72_spill] sm:$0xff] }
 0x3c1   :  { %1780 = vmatprep.subr.mxu0 %v6378_v32  ;;  %1851 = vmatprep.subr.mxu1 %v6379_v33  ;;  %v6389_v32 = vld [vmem:[#allocation73_spill] sm:$0xff]  ;;  %v6390_v33 = vld [vmem:[#allocation74_spill] sm:$0xff] }
 0x3c2   :  { %1781 = vmatpush1.msra.mxu0 %v6380_v36  ;;  %1852 = vmatpush1.msra.mxu1 %v6381_v23  ;;  %v6391_v36 = vld [vmem:[#allocation75_spill] sm:$0xff]  ;;  %v6392_v23 = vld [vmem:[#allocation76_spill] sm:$0xff] }
 0x3c3   :  { %1782 = vmatprep.subr.mxu0 %v6382_v50  ;;  %1853 = vmatprep.subr.mxu1 %v6383_v44  ;;  %v6393_v50 = vld [vmem:[#allocation77_spill] sm:$0xff]  ;;  %v6394_v44 = vld [vmem:[#allocation78_spill] sm:$0xff] }
 0x3c4   :  { %1783 = vmatpush1.msra.mxu0 %v6384_v5  ;;  %1854 = vmatpush1.msra.mxu1 %v6385_v58  ;;  %v6395_v5 = vld [vmem:[#allocation79_spill] sm:$0xff]  ;;  %v6396_v58 = vld [vmem:[#allocation80_spill] sm:$0xff] }
 0x3c5   :  { %1784 = vmatprep.subr.mxu0 %v6386_v11  ;;  %1855 = vmatprep.subr.mxu1 %v6387_v13  ;;  %v6397_v11 = vld [vmem:[#allocation81_spill] sm:$0xff]  ;;  %v6398_v13 = vld [vmem:[#allocation82_spill] sm:$0xff] }
 0x3c6   :  { %1785 = vmatpush1.msra.mxu0 %v6388_v8  ;;  %1856 = vmatpush1.msra.mxu1 %v6389_v32  ;;  %v6399_v8 = vld [vmem:[#allocation83_spill] sm:$0xff]  ;;  %v6400_v32 = vld [vmem:[#allocation84_spill] sm:$0xff] }
 0x3c7   :  { %1786 = vmatprep.subr.mxu0 %v6390_v33  ;;  %1857 = vmatprep.subr.mxu1 %v6391_v36  ;;  %v6401_v33 = vld [vmem:[#allocation86_spill] sm:$0xff]  ;;  %v6402_v36 = vld [vmem:[#allocation88_spill] sm:$0xff] }
 0x3c8   :  { %1787 = vmatpush1.msra.mxu0 %v6392_v23  ;;  %1858 = vmatpush1.msra.mxu1 %v6393_v50  ;;  %v6403_v23 = vld [vmem:[#allocation90_spill] sm:$0xff]  ;;  %v6404_v50 = vld [vmem:[#allocation91_spill] sm:$0xff] }
 0x3c9   :  { %1788 = vmatprep.subr.mxu0 %v6394_v44  ;;  %1859 = vmatprep.subr.mxu1 %v6395_v5  ;;  %v6405_v44 = vld [vmem:[#allocation92_spill] sm:$0xff]  ;;  %v6406_v5 = vld [vmem:[#allocation93_spill] sm:$0xff] }
 0x3ca   :  { %1789 = vmatpush1.msra.mxu0 %v6396_v58  ;;  %1860 = vmatpush1.msra.mxu1 %v6397_v11  ;;  %v6407_v58 = vld [vmem:[#allocation94_spill] sm:$0xff]  ;;  %v6408_v11 = vld [vmem:[#allocation95_spill] sm:$0xff] }
 0x3cb   :  { %1790 = vmatprep.subr.mxu0 %v6398_v13  ;;  %1861 = vmatprep.subr.mxu1 %v6399_v8  ;;  %v6409_v13 = vld [vmem:[#allocation96_spill] sm:$0xff]  ;;  %v6410_v8 = vld [vmem:[#allocation97_spill] sm:$0xff] }
 0x3cc   :  { %1791 = vmatpush1.msra.mxu0 %v6400_v32  ;;  %1862 = vmatpush1.msra.mxu1 %v6401_v33  ;;  %v6411_v32 = vld [vmem:[#allocation98_spill] sm:$0xff]  ;;  %v6412_v33 = vld [vmem:[#allocation99_spill] sm:$0xff] }
 0x3cd   :  { %1792 = vmatprep.subr.mxu0 %v6402_v36  ;;  %1863 = vmatprep.subr.mxu1 %v6403_v23  ;;  %v6413_v36 = vld [vmem:[#allocation100_spill] sm:$0xff]  ;;  %v6414_v23 = vld [vmem:[#allocation101_spill] sm:$0xff] }
 0x3ce   :  { %1793 = vmatpush1.msra.mxu0 %v6404_v50  ;;  %1864 = vmatpush1.msra.mxu1 %v6405_v44  ;;  %v6415_v50 = vld [vmem:[#allocation102_spill] sm:$0xff]  ;;  %v6416_v44 = vld [vmem:[#allocation103_spill] sm:$0xff] }
 0x3cf   :  { %1794 = vmatprep.subr.mxu0 %v6406_v5  ;;  %1865 = vmatprep.subr.mxu1 %v6407_v58  ;;  %v6417_v5 = vld [vmem:[#allocation104_spill] sm:$0xff]  ;;  %v6418_v58 = vld [vmem:[#allocation105_spill] sm:$0xff] }
 0x3d0   :  { %1795 = vmatpush1.msra.mxu0 %v6408_v11  ;;  %1866 = vmatpush1.msra.mxu1 %v6409_v13  ;;  %v6419_v11 = vld [vmem:[#allocation106_spill] sm:$0xff]  ;;  %v6420_v13 = vld [vmem:[#allocation107_spill] sm:$0xff] }
 0x3d1   :  { %1796 = vmatprep.subr.mxu0 %v6410_v8  ;;  %1867 = vmatprep.subr.mxu1 %v6411_v32  ;;  %v6421_v8 = vld [vmem:[#allocation87_spill] sm:$0xff]  ;;  %v6422_v32 = vld [vmem:[#allocation108_spill] sm:$0xff] }
 0x3d2   :  { %1797 = vmatpush1.msra.mxu0 %v6412_v33  ;;  %1868 = vmatpush1.msra.mxu1 %v6413_v36  ;;  %v6423_v33 = vld [vmem:[#allocation109_spill] sm:$0xff]  ;;  %v6424_v36 = vld [vmem:[#allocation110_spill] sm:$0xff] }
 0x3d3   :  { %1798 = vmatprep.subr.mxu0 %v6414_v23  ;;  %1869 = vmatprep.subr.mxu1 %v6415_v50  ;;  %v6425_v50 = vld [vmem:[#allocation111_spill] sm:$0xff] }
 0x3d4   :  { %1799 = vmatpush1.msra.mxu0 %v6416_v44  ;;  %1870 = vmatpush1.msra.mxu1 %v6417_v5  ;;  %v6426_v5 = vld [vmem:[#allocation22_spill] sm:$0xff]  ;;  %v6428_v44 = vld [vmem:[#allocation85_spill] sm:$0xff] }
 0x3d5   :  { %1800 = vmatprep.subr.mxu0 %v6418_v58  ;;  %1871 = vmatprep.subr.mxu1 %v6419_v11  ;;  %v6427_v58 = vld [vmem:[#allocation23_spill] sm:$0xff]  ;;  %v1373_v11 = vpop.f32.mrf.mxu0 }
 0x3d6   :  { %1801 = vmatpush1.msra.mxu0 %v6420_v13  ;;  %1872 = vmatpush1.msra.mxu1 %v6421_v8  ;;  %v1374_v8 = vadd.f32 %v1373_v11, %v6428_v44 }
 0x3d7   :  { %1802 = vmatprep.subr.mxu0 %v6422_v32  ;;  %1873 = vmatprep.subr.mxu1 %v6423_v33  ;;  %v1375_v13 = vpop.f32.mrf.mxu0 }
 0x3d8   :  { %1803 = vmatpush1.msra.mxu0 %v6424_v36  ;;  %1836 = vmatprep.mubr.f32.mxu0 %v6358_v6  ;;  %v1376_v32 = vadd.f32 %v1375_v13, %v6252_v39  ;;  %v1444_v36 = vpop.f32.mrf.mxu1 }
 0x3d9   :  { %1874 = vmatpush1.msra.mxu1 %v6425_v50  ;;  %1907 = vmatprep.mubr.f32.mxu1 %v6358_v6 }
 0x3da   :  { %1953 = vmatprep.subr.mxu0 %v6426_v5  ;;  %2024 = vmatprep.subr.mxu1 %v6427_v58  ;;  %v1446_v15 = vpop.f32.mrf.mxu1  ;;  %v1445_v5 = vadd.f32 %v1444_v36, %v4191_v55 }
 0x3db   :  { %v1447_v4 = vadd.f32 %v1446_v15, %v4194_v62  ;;  %v2986_v15 = vld [vmem:[#allocation15 + $0x3] ss:$0 sm:$0xff] }
 0x452   :  { %v1515_v23 = vpop.f32.mrf.mxu0  ;;  %v1586_v6 = vpop.f32.mrf.mxu1 }
 0x453   :  { %v1591_v33 = vadd.f32 %v1515_v23, %v1374_v8  ;;  %v1593_v58 = vadd.f32 %v1586_v6, %v1445_v5  ;;  %v6467_v5 = vld [vmem:[#allocation61_spill] sm:$0xff] }
 0x454   :  { %v1517_v12 = vpop.f32.mrf.mxu0  ;;  %v1588_v16 = vpop.f32.mrf.mxu1 }
 0x455   :  { %v2983_v14 = vmul.f32 -1.442695, %v1591_v33  ;;  %v1592_v10 = vadd.f32 %v1517_v12, %v1376_v32  ;;  %v2985_v11 = vmul.f32 -1.442695, %v1593_v58  ;;  %v1594_v57 = vadd.f32 %v1588_v16, %v1447_v4  ;;  %v6468_v58 = vld [vmem:[#allocation62_spill] sm:$0xff] }
 0x457   :  { %3065 = vpow2.f32 %v2983_v14  ;;  %v2984_v50 = vmul.f32 -1.442695, %v1592_v10 }
 0x459   :  { %3067 = vpow2.f32 %v2984_v50 }
 0x45a   :  { %3069 = vpow2.f32 %v2985_v11  ;;  %v6469_v11 = vld [vmem:[#allocation63_spill] sm:$0xff] }
 0x464   :  { %v3066_v44 = vpop.eup %3065 }
 0x465   :  { %v1604_v13 = vadd.f32 1.0, %v3066_v44 }
 0x466   :  { %v3068_v8 = vpop.eup %3067 }
 0x467   :  { %3071 = vrcp.f32 %v1604_v13  ;;  %v1605_v23 = vadd.f32 1.0, %v3068_v8  ;;  %v3070_v10 = vpop.eup %3069  ;;  %v6470_v13 = vld [vmem:[#allocation64_spill] sm:$0xff]  ;;  %v6471_v8 = vld [vmem:[#allocation65_spill] sm:$0xff] }
 0x468   :  { %3073 = vtanh.f32 %v1594_v57  ;;  %v1606_v33 = vadd.f32 1.0, %v3070_v10  ;;  %v6473_v10 = vld [vmem:[#allocation67_spill] sm:$0xff] }
 0x469   :  { %3075 = vrcp.f32 %v1605_v23  ;;  %v6472_v23 = vld [vmem:[#allocation66_spill] sm:$0xff] }
 0x46a   :  { %3077 = vrcp.f32 %v1606_v33  ;;  %v6477_v33 = vld [vmem:[#allocation71_spill] sm:$0xff] }
 0x474   :  { %v3072_v14 = vpop.eup %3071 }
 0x475   :  { %v3074_v12 = vpop.eup %3073 }
 0x476   :  { %v3076_v32 = vpop.eup %3075  ;;  %v1615_v50 = vmul.f32 %v3074_v12, %v3072_v14  ;;  %v6474_v14 = vld [vmem:[#allocation68_spill] sm:$0xff]  ;;  %v6475_v12 = vld [vmem:[#allocation69_spill] sm:$0xff] }
 0x477   :  { %v1614_v36 = vmul.f32 %v3076_v32, %v4742_v7  ;;  %v3078_v4 = vpop.eup %3077  ;;  %v6476_v32 = vld [vmem:[#allocation70_spill] sm:$0xff] }
 0x479   :  { %v4885_v6 = vadd.f32 %v1615_v50, %v1614_v36  ;;  %v6478_v36 = vld [vmem:[#allocation72_spill] sm:$0xff]  ;;  %v6479_v50 = vld [vmem:[#allocation73_spill] sm:$0xff] }
 0x47b   :  { %3079 = vtanh.f32 %v4885_v6 }
 0x488   :  { %v3080_v16 = vpop.eup %3079 }
 0x489   :  { %v1618_v44 = vmul.f32 %v3080_v16, %v3078_v4  ;;  %v6480_v4 = vld [vmem:[#allocation74_spill] sm:$0xff]  ;;  %v6481_v16 = vld [vmem:[#allocation75_spill] sm:$0xff] }
 0x48b   :  { %1837 = vmatmul.mubr.f32.vlgmr.msra.gmra.mxu0 %v1618_v44  ;;  %1908 = vmatmul.mubr.f32.vlgmr.msra.gmra.mxu1 %v1618_v44  ;;  %v1627_v57 = vmul.f32 %v2986_v15, %v1618_v44  ;;  %v6482_v15 = vld [vmem:[#allocation76_spill] sm:$0xff]  ;;  %v6483_v44 = vld [vmem:[#allocation77_spill] sm:$0xff] }
 0x48c   :  { %1954 = vmatpush1.msra.mxu0 %v4351_v17  ;;  %2025 = vmatpush1.msra.mxu1 %v4354_v56  ;;  %v6429_v17 = vld [vmem:[#allocation24_spill] sm:$0xff]  ;;  %v6430_v56 = vld [vmem:[#allocation25_spill] sm:$0xff] }
 0x48d   :  { %1955 = vmatprep.subr.mxu0 %v4357_v18  ;;  %2026 = vmatprep.subr.mxu1 %v4360_v19  ;;  %v4893_v7 = vadd.f32 %v1627_v57, %v4750_v9  ;;  %v6431_v18 = vld [vmem:[#allocation26_spill] sm:$0xff]  ;;  %v6432_v19 = vld [vmem:[#allocation27_spill] sm:$0xff]  ;;  %v6466_v9 = vld [vmem:[#allocation60_spill] sm:$0xff] }
 0x48e   :  { %1956 = vmatpush1.msra.mxu0 %v4365_v20  ;;  %2027 = vmatpush1.msra.mxu1 %v4368_v21  ;;  %v6433_v20 = vld [vmem:[#allocation28_spill] sm:$0xff]  ;;  %v6434_v21 = vld [vmem:[#allocation29_spill] sm:$0xff]  ;;  %v6484_v57 = vld [vmem:[#allocation78_spill] sm:$0xff] }
 0x48f   :  { %1957 = vmatprep.subr.mxu0 %v4371_v45  ;;  %2028 = vmatprep.subr.mxu1 %v4374_v22  ;;  %v6435_v45 = vld [vmem:[#allocation30_spill] sm:$0xff]  ;;  %v6436_v22 = vld [vmem:[#allocation31_spill] sm:$0xff] }
 0x490   :  { %1958 = vmatpush1.msra.mxu0 %v4377_v53  ;;  %2029 = vmatpush1.msra.mxu1 %v4380_v24  ;;  %v6437_v53 = vld [vmem:[#allocation32_spill] sm:$0xff]  ;;  %v6438_v24 = vld [vmem:[#allocation33_spill] sm:$0xff] }
 0x491   :  { %1959 = vmatprep.subr.mxu0 %v4383_v49  ;;  %2030 = vmatprep.subr.mxu1 %v4386_v25  ;;  %v6439_v49 = vld [vmem:[#allocation34_spill] sm:$0xff]  ;;  %v6440_v25 = vld [vmem:[#allocation35_spill] sm:$0xff] }
 0x492   :  { %1960 = vmatpush1.msra.mxu0 %v4389_v26  ;;  %2031 = vmatpush1.msra.mxu1 %v4392_v27  ;;  %v6441_v26 = vld [vmem:[#allocation36_spill] sm:$0xff]  ;;  %v6442_v27 = vld [vmem:[#allocation37_spill] sm:$0xff] }
 0x493   :  { %1961 = vmatprep.subr.mxu0 %v4395_v28  ;;  %2032 = vmatprep.subr.mxu1 %v4398_v29  ;;  %v6443_v28 = vld [vmem:[#allocation38_spill] sm:$0xff]  ;;  %v6444_v29 = vld [vmem:[#allocation39_spill] sm:$0xff] }
 0x494   :  { %1962 = vmatpush1.msra.mxu0 %v4401_v30  ;;  %2033 = vmatpush1.msra.mxu1 %v4404_v31  ;;  %v6445_v30 = vld [vmem:[#allocation40_spill] sm:$0xff]  ;;  %v6446_v31 = vld [vmem:[#allocation42_spill] sm:$0xff] }
 0x495   :  { %1963 = vmatprep.subr.mxu0 %v4407_v34  ;;  %2034 = vmatprep.subr.mxu1 %v4410_v35  ;;  %v6447_v34 = vld [vmem:[#allocation41_spill] sm:$0xff]  ;;  %v4950_v35 = vld [vmem:[#allocation2 + $0x28] sm:$0xff] }
 0x496   :  { %1964 = vmatpush1.msra.mxu0 %v4413_v37  ;;  %2035 = vmatpush1.msra.mxu1 %v4416_v38  ;;  %6448 = vst [vmem:[#allocation89_spill] sm:$0xff] %v4950_v35  ;;  %v6449_v37 = vld [vmem:[#allocation43_spill] sm:$0xff]  ;;  %v6450_v38 = vld [vmem:[#allocation44_spill] sm:$0xff] }
 0x497   :  { %1965 = vmatprep.subr.mxu0 %v4419_v40  ;;  %2036 = vmatprep.subr.mxu1 %v4422_v41  ;;  %v6451_v40 = vld [vmem:[#allocation45_spill] sm:$0xff]  ;;  %v6452_v41 = vld [vmem:[#allocation46_spill] sm:$0xff] }
 0x498   :  { %1966 = vmatpush1.msra.mxu0 %v4425_v42  ;;  %2037 = vmatpush1.msra.mxu1 %v4428_v43  ;;  %v6453_v42 = vld [vmem:[#allocation47_spill] sm:$0xff]  ;;  %v166_v43 = vld [vmem:[%s165_s1] sm:$0x1] }
 0x499   :  { %1967 = vmatprep.subr.mxu0 %v4431_v54  ;;  %2038 = vmatprep.subr.mxu1 %v4434_v0  ;;  %167 = vst [vmem:[#allocation2 + $0x28] sm:$0x1] %v166_v43  ;;  %v170_v54 = vld [vmem:[%s169_s8] sm:$0x1] }
 0x49a   :  { %1968 = vmatpush1.msra.mxu0 %v4437_v51  ;;  %2039 = vmatpush1.msra.mxu1 %v4440_v52  ;;  %171 = vst [vmem:[#allocation2 + $0x29] sm:$0x1] %v170_v54  ;;  %v6454_v51 = vld [vmem:[#allocation48_spill] sm:$0xff]  ;;  %v6455_v52 = vld [vmem:[#allocation49_spill] sm:$0xff]  ;;  %v6509_v43 = vld [vmem:[#allocation106_spill] sm:$0xff] }
 0x49b   :  { %1969 = vmatprep.subr.mxu0 %v4443_v1  ;;  %2040 = vmatprep.subr.mxu1 %v4446_v48  ;;  %v6456_v1 = vld [vmem:[#allocation50_spill] sm:$0xff]  ;;  %v6457_v48 = vld [vmem:[#allocation51_spill] sm:$0xff] }
 0x49c   :  { %1970 = vmatpush1.msra.mxu0 %v4449_v47  ;;  %2041 = vmatpush1.msra.mxu1 %v4452_v59  ;;  %v6458_v47 = vld [vmem:[#allocation52_spill] sm:$0xff]  ;;  %v6459_v59 = vld [vmem:[#allocation53_spill] sm:$0xff]  ;;  %v6510_v54 = vld [vmem:[#allocation107_spill] sm:$0xff] }
 0x49d   :  { %1971 = vmatprep.subr.mxu0 %v4455_v46  ;;  %2042 = vmatprep.subr.mxu1 %v4458_v60  ;;  %v6460_v46 = vld [vmem:[#allocation54_spill] sm:$0xff]  ;;  %v6461_v60 = vld [vmem:[#allocation55_spill] sm:$0xff] }
 0x49e   :  { %1972 = vmatpush1.msra.mxu0 %v4461_v2  ;;  %2043 = vmatpush1.msra.mxu1 %v4464_v3  ;;  %v6462_v2 = vld [vmem:[#allocation56_spill] sm:$0xff]  ;;  %v6463_v3 = vld [vmem:[#allocation57_spill] sm:$0xff] }
 0x49f   :  { %1973 = vmatprep.subr.mxu0 %v4467_v63  ;;  %2044 = vmatprep.subr.mxu1 %v4470_v61  ;;  %v6464_v63 = vld [vmem:[#allocation58_spill] sm:$0xff]  ;;  %v6465_v61 = vld [vmem:[#allocation59_spill] sm:$0xff] }
 0x4a0   :  { %1974 = vmatpush1.msra.mxu0 %v6429_v17  ;;  %2045 = vmatpush1.msra.mxu1 %v6430_v56  ;;  %v6485_v17 = vld [vmem:[#allocation79_spill] sm:$0xff]  ;;  %v6486_v56 = vld [vmem:[#allocation80_spill] sm:$0xff] }
 0x4a1   :  { %1975 = vmatprep.subr.mxu0 %v6431_v18  ;;  %2046 = vmatprep.subr.mxu1 %v6432_v19  ;;  %v1952_v0 = vld [vmem:[#allocation2 + $0x28] sm:$0xff]  ;;  %v6487_v18 = vld [vmem:[#allocation81_spill] sm:$0xff]  ;;  %v6488_v19 = vld [vmem:[#allocation82_spill] sm:$0xff] }
 0x4a2   :  { %1976 = vmatpush1.msra.mxu0 %v6433_v20  ;;  %2047 = vmatpush1.msra.mxu1 %v6434_v21  ;;  %v6489_v20 = vld [vmem:[#allocation83_spill] sm:$0xff]  ;;  %v6490_v21 = vld [vmem:[#allocation84_spill] sm:$0xff] }
 0x4a3   :  { %1977 = vmatprep.subr.mxu0 %v6435_v45  ;;  %2048 = vmatprep.subr.mxu1 %v6436_v22  ;;  %v6491_v45 = vld [vmem:[#allocation86_spill] sm:$0xff]  ;;  %v6492_v22 = vld [vmem:[#allocation88_spill] sm:$0xff] }
 0x4a4   :  { %1978 = vmatpush1.msra.mxu0 %v6437_v53  ;;  %2049 = vmatpush1.msra.mxu1 %v6438_v24  ;;  %v6493_v53 = vld [vmem:[#allocation90_spill] sm:$0xff]  ;;  %v6494_v24 = vld [vmem:[#allocation91_spill] sm:$0xff] }
 0x4a5   :  { %1979 = vmatprep.subr.mxu0 %v6439_v49  ;;  %2050 = vmatprep.subr.mxu1 %v6440_v25  ;;  %v6495_v49 = vld [vmem:[#allocation92_spill] sm:$0xff]  ;;  %v6496_v25 = vld [vmem:[#allocation93_spill] sm:$0xff] }
 0x4a6   :  { %1980 = vmatpush1.msra.mxu0 %v6441_v26  ;;  %2051 = vmatpush1.msra.mxu1 %v6442_v27  ;;  %v6497_v26 = vld [vmem:[#allocation94_spill] sm:$0xff]  ;;  %v6498_v27 = vld [vmem:[#allocation95_spill] sm:$0xff] }
 0x4a7   :  { %1981 = vmatprep.subr.mxu0 %v6443_v28  ;;  %2052 = vmatprep.subr.mxu1 %v6444_v29  ;;  %v6499_v28 = vld [vmem:[#allocation96_spill] sm:$0xff]  ;;  %v6500_v29 = vld [vmem:[#allocation97_spill] sm:$0xff] }
 0x4a8   :  { %1982 = vmatpush1.msra.mxu0 %v6445_v30  ;;  %2053 = vmatpush1.msra.mxu1 %v6446_v31  ;;  %v6501_v30 = vld [vmem:[#allocation98_spill] sm:$0xff]  ;;  %v6502_v31 = vld [vmem:[#allocation99_spill] sm:$0xff] }
 0x4a9   :  { %1983 = vmatprep.subr.mxu0 %v6447_v34  ;;  %2017 = vmatprep.mubr.f32.mxu0 %v4950_v35  ;;  %v6503_v34 = vld [vmem:[#allocation100_spill] sm:$0xff] }
 0x4aa   :  { %1984 = vmatpush1.msra.mxu0 %v6449_v37  ;;  %2054 = vmatprep.subr.mxu1 %v6450_v38  ;;  %v6504_v37 = vld [vmem:[#allocation101_spill] sm:$0xff]  ;;  %v6505_v38 = vld [vmem:[#allocation102_spill] sm:$0xff] }
 0x4ab   :  { %2055 = vmatpush1.msra.mxu1 %v6451_v40  ;;  %2088 = vmatprep.mubr.f32.mxu1 %v4950_v35  ;;  %v6506_v40 = vld [vmem:[#allocation103_spill] sm:$0xff] }
 0x4ac   :  { %2095 = vmatprep.subr.mxu0 %v6452_v41  ;;  %2166 = vmatprep.subr.mxu1 %v6453_v42  ;;  %v6507_v41 = vld [vmem:[#allocation104_spill] sm:$0xff]  ;;  %v6508_v42 = vld [vmem:[#allocation105_spill] sm:$0xff] }
 0x4ad   :  { %2018 = vmatmul.mubr.f32.vlgmr.msra.gmra.mxu0 %v1952_v0  ;;  %2089 = vmatmul.mubr.f32.vlgmr.msra.gmra.mxu1 %v1952_v0  ;;  %v6511_v0 = vld [vmem:[#allocation87_spill] sm:$0xff] }
 0x4ae   :  { %2096 = vmatpush1.msra.mxu0 %v6454_v51  ;;  %2167 = vmatpush1.msra.mxu1 %v6455_v52  ;;  %v6512_v51 = vld [vmem:[#allocation108_spill] sm:$0xff]  ;;  %v6513_v52 = vld [vmem:[#allocation109_spill] sm:$0xff] }
 0x4af   :  { %2097 = vmatprep.subr.mxu0 %v6456_v1  ;;  %2168 = vmatprep.subr.mxu1 %v6457_v48  ;;  %v6514_v1 = vld [vmem:[#allocation110_spill] sm:$0xff]  ;;  %v6515_v48 = vld [vmem:[#allocation111_spill] sm:$0xff] }
 0x4b0   :  { %2098 = vmatpush1.msra.mxu0 %v6458_v47  ;;  %2169 = vmatpush1.msra.mxu1 %v6459_v59  ;;  %v5023_v47 = vld [vmem:[#allocation11 + $0x1e8] sm:$0xff]  ;;  %v5026_v59 = vld [vmem:[#allocation11 + $0x1f8] sm:$0xff] }
 0x4b1   :  { %2099 = vmatprep.subr.mxu0 %v6460_v46  ;;  %2170 = vmatprep.subr.mxu1 %v6461_v60  ;;  %v1696_v46 = vpop.f32.mrf.mxu0 }
 0x4b2   :  { %2100 = vmatpush1.msra.mxu0 %v6462_v2  ;;  %2171 = vmatpush1.msra.mxu1 %v6463_v3  ;;  %v6516_v2 = vld [vmem:[#allocation85_spill] sm:$0xff] }
 0x4b3   :  { %2101 = vmatprep.subr.mxu0 %v6464_v63  ;;  %2172 = vmatprep.subr.mxu1 %v6465_v61  ;;  %v1698_v60 = vpop.f32.mrf.mxu0  ;;  %v1697_v3 = vadd.f32 %v1696_v46, %v6516_v2  ;;  %v5100_v46 = vld [vmem:[#allocation11 + $0x140] sm:$0xff] }
 0x4b4   :  { %2102 = vmatpush1.msra.mxu0 %v6466_v9  ;;  %2173 = vmatpush1.msra.mxu1 %v6467_v5  ;;  %v1699_v61 = vadd.f32 %v1698_v60, %v6252_v39  ;;  %v5103_v60 = vld [vmem:[#allocation11 + $0x150] sm:$0xff] }
 0x4b5   :  { %2103 = vmatprep.subr.mxu0 %v6468_v58  ;;  %2174 = vmatprep.subr.mxu1 %v6469_v11  ;;  %v1767_v58 = vpop.f32.mrf.mxu1 }
 0x4b6   :  { %2104 = vmatpush1.msra.mxu0 %v6470_v13  ;;  %2175 = vmatpush1.msra.mxu1 %v6471_v8 }
 0x4b7   :  { %2105 = vmatprep.subr.mxu0 %v6472_v23  ;;  %2176 = vmatprep.subr.mxu1 %v6473_v10  ;;  %v1769_v23 = vpop.f32.mrf.mxu1 }
 0x4b8   :  { %2106 = vmatpush1.msra.mxu0 %v6474_v14  ;;  %2177 = vmatpush1.msra.mxu1 %v6475_v12  ;;  %v1768_v14 = vadd.f32 %v1767_v58, %v4191_v55  ;;  %v5121_v58 = vld [vmem:[#allocation11 + $0x118] sm:$0xff] }
 0x4b9   :  { %2107 = vmatprep.subr.mxu0 %v6476_v32  ;;  %2178 = vmatprep.subr.mxu1 %v6477_v33  ;;  %v1770_v33 = vadd.f32 %v1769_v23, %v4194_v62  ;;  %v5133_v23 = vld [vmem:[#allocation11 + $0xf8] sm:$0xff] }
 0x4ba   :  { %2108 = vmatpush1.msra.mxu0 %v6478_v36  ;;  %2179 = vmatpush1.msra.mxu1 %v6479_v50 }
 0x4bb   :  { %2109 = vmatprep.subr.mxu0 %v6480_v4  ;;  %2180 = vmatprep.subr.mxu1 %v6481_v16 }
 0x4bc   :  { %2110 = vmatpush1.msra.mxu0 %v6482_v15  ;;  %2181 = vmatpush1.msra.mxu1 %v6483_v44 }
 0x4bd   :  { %2111 = vmatprep.subr.mxu0 %v6484_v57  ;;  %2182 = vmatprep.subr.mxu1 %v6485_v17 }
 0x4be   :  { %2112 = vmatpush1.msra.mxu0 %v6486_v56  ;;  %2183 = vmatpush1.msra.mxu1 %v6487_v18 }
 0x4bf   :  { %2113 = vmatprep.subr.mxu0 %v6488_v19  ;;  %2184 = vmatprep.subr.mxu1 %v6489_v20 }
 0x4c0   :  { %2114 = vmatpush1.msra.mxu0 %v6490_v21  ;;  %2185 = vmatpush1.msra.mxu1 %v6491_v45 }
 0x4c1   :  { %2115 = vmatprep.subr.mxu0 %v6492_v22  ;;  %2186 = vmatprep.subr.mxu1 %v6493_v53 }
 0x4c2   :  { %2116 = vmatpush1.msra.mxu0 %v6494_v24  ;;  %2187 = vmatpush1.msra.mxu1 %v6495_v49  ;;  %v2990_v24 = vld [vmem:[#allocation15 + $0x4] ss:$0 sm:$0xff] }
 0x4c3   :  { %2117 = vmatprep.subr.mxu0 %v6496_v25  ;;  %2188 = vmatprep.subr.mxu1 %v6497_v26  ;;  %v5037_v26 = vld [vmem:[#allocation11 + $0x1e0] sm:$0xff] }
 0x4c4   :  { %2118 = vmatpush1.msra.mxu0 %v6498_v27  ;;  %2189 = vmatpush1.msra.mxu1 %v6499_v28  ;;  %v5040_v27 = vld [vmem:[#allocation11 + $0x1f0] sm:$0xff]  ;;  %v5046_v28 = vld [vmem:[#allocation11 + $0x1d8] sm:$0xff] }
 0x4c5   :  { %2119 = vmatprep.subr.mxu0 %v6500_v29  ;;  %2190 = vmatprep.subr.mxu1 %v6501_v30  ;;  %v5052_v30 = vld [vmem:[#allocation11 + $0x1c0] sm:$0xff] }
 0x4c6   :  { %2120 = vmatpush1.msra.mxu0 %v6502_v31  ;;  %2191 = vmatpush1.msra.mxu1 %v6503_v34  ;;  %v5055_v31 = vld [vmem:[#allocation11 + $0x1d0] sm:$0xff]  ;;  %v5058_v34 = vld [vmem:[#allocation11 + $0x1a8] sm:$0xff] }
 0x4c7   :  { %2121 = vmatprep.subr.mxu0 %v6504_v37  ;;  %2192 = vmatprep.subr.mxu1 %v6505_v38  ;;  %v5061_v37 = vld [vmem:[#allocation11 + $0x1b8] sm:$0xff]  ;;  %v5064_v38 = vld [vmem:[#allocation11 + $0x1a0] sm:$0xff] }
 0x4c8   :  { %2122 = vmatpush1.msra.mxu0 %v6506_v40  ;;  %2193 = vmatpush1.msra.mxu1 %v6507_v41  ;;  %v5070_v40 = vld [vmem:[#allocation11 + $0x188] sm:$0xff]  ;;  %v5073_v41 = vld [vmem:[#allocation11 + $0x198] sm:$0xff] }
 0x4c9   :  { %2123 = vmatprep.subr.mxu0 %v6508_v42  ;;  %2194 = vmatprep.subr.mxu1 %v6509_v43  ;;  %v5076_v42 = vld [vmem:[#allocation11 + $0x180] sm:$0xff]  ;;  %v5079_v43 = vld [vmem:[#allocation11 + $0x190] sm:$0xff] }
 0x4ca   :  { %2124 = vmatpush1.msra.mxu0 %v6510_v54  ;;  %2195 = vmatpush1.msra.mxu1 %v6511_v0  ;;  %v5082_v54 = vld [vmem:[#allocation11 + $0x168] sm:$0xff]  ;;  %v5085_v0 = vld [vmem:[#allocation11 + $0x178] sm:$0xff] }
 0x4cb   :  { %2125 = vmatprep.subr.mxu0 %v6512_v51  ;;  %2196 = vmatprep.subr.mxu1 %v6513_v52  ;;  %v5088_v51 = vld [vmem:[#allocation11 + $0x160] sm:$0xff]  ;;  %v5091_v52 = vld [vmem:[#allocation11 + $0x170] sm:$0xff] }
 0x4cc   :  { %2126 = vmatpush1.msra.mxu0 %v6514_v1  ;;  %2159 = vmatprep.mubr.f32.mxu0 %v4950_v35  ;;  %v5094_v1 = vld [vmem:[#allocation11 + $0x148] sm:$0xff] }
 0x4cd   :  { %2197 = vmatpush1.msra.mxu1 %v6515_v48  ;;  %2230 = vmatprep.mubr.f32.mxu1 %v4950_v35  ;;  %v5097_v48 = vld [vmem:[#allocation11 + $0x158] sm:$0xff] }
 0x4ce   :  { %2276 = vmatprep.subr.mxu0 %v5023_v47  ;;  %2347 = vmatprep.subr.mxu1 %v5026_v59 }
 0x54b   :  { %v1838_v63 = vpop.f32.mrf.mxu0  ;;  %v1909_v10 = vpop.f32.mrf.mxu1 }
 0x54c   :  { %v1914_v9 = vadd.f32 %v1838_v63, %v1697_v3  ;;  %v1916_v12 = vadd.f32 %v1909_v10, %v1768_v14  ;;  %v5106_v3 = vld [vmem:[#allocation11 + $0x128] sm:$0xff]  ;;  %v5109_v63 = vld [vmem:[#allocation11 + $0x138] sm:$0xff]  ;;  %v5136_v10 = vld [vmem:[#allocation11 + $0xe0] sm:$0xff] }
 0x54d   :  { %v1840_v5 = vpop.f32.mrf.mxu0  ;;  %v1911_v32 = vpop.f32.mrf.mxu1  ;;  %v5139_v14 = vld [vmem:[#allocation11 + $0xf0] sm:$0xff] }
 0x54e   :  { %v2987_v11 = vmul.f32 -1.442695, %v1914_v9  ;;  %v1915_v13 = vadd.f32 %v1840_v5, %v1699_v61  ;;  %v2989_v36 = vmul.f32 -1.442695, %v1916_v12  ;;  %v1917_v4 = vadd.f32 %v1911_v32, %v1770_v33  ;;  %v5112_v61 = vld [vmem:[#allocation11 + $0x120] sm:$0xff]  ;;  %v5115_v9 = vld [vmem:[#allocation11 + $0x130] sm:$0xff] }
 0x54f   :  { %v5118_v5 = vld [vmem:[#allocation11 + $0x108] sm:$0xff]  ;;  %v5145_v32 = vld [vmem:[#allocation11 + $0xd8] sm:$0xff]  ;;  %v5148_v33 = vld [vmem:[#allocation11 + $0xc0] sm:$0xff] }
 0x550   :  { %3081 = vpow2.f32 %v2987_v11  ;;  %v2988_v8 = vmul.f32 -1.442695, %v1915_v13  ;;  %v5124_v11 = vld [vmem:[#allocation11 + $0x100] sm:$0xff]  ;;  %v5127_v13 = vld [vmem:[#allocation11 + $0x110] sm:$0xff]  ;;  %v5142_v12 = vld [vmem:[#allocation11 + $0xc8] sm:$0xff] }
 0x552   :  { %3083 = vpow2.f32 %v2988_v8  ;;  %v5130_v8 = vld [vmem:[#allocation11 + $0xe8] sm:$0xff] }
 0x553   :  { %3085 = vpow2.f32 %v2989_v36  ;;  %v5151_v36 = vld [vmem:[#allocation11 + $0xd0] sm:$0xff] }
 0x55d   :  { %v3082_v50 = vpop.eup %3081 }
 0x55e   :  { %v1927_v16 = vadd.f32 1.0, %v3082_v50  ;;  %v5154_v50 = vld [vmem:[#allocation11 + $0xa8] sm:$0xff] }
 0x55f   :  { %v3084_v15 = vpop.eup %3083 }
 0x560   :  { %3087 = vrcp.f32 %v1927_v16  ;;  %v1928_v44 = vadd.f32 1.0, %v3084_v15  ;;  %v3086_v57 = vpop.eup %3085  ;;  %v5160_v16 = vld [vmem:[#allocation11 + $0xa0] sm:$0xff]  ;;  %v5163_v15 = vld [vmem:[#allocation11 + $0xb0] sm:$0xff] }
 0x561   :  { %3089 = vtanh.f32 %v1917_v4  ;;  %v1929_v19 = vadd.f32 1.0, %v3086_v57  ;;  %v5157_v4 = vld [vmem:[#allocation11 + $0xb8] sm:$0xff]  ;;  %6517 = vst [vmem:[#allocation22_spill] sm:$0xff] %v5160_v16  ;;  %6518 = vst [vmem:[#allocation23_spill] sm:$0xff] %v5163_v15 }
 0x562   :  { %3091 = vrcp.f32 %v1928_v44  ;;  %v5166_v44 = vld [vmem:[#allocation11 + $0x88] sm:$0xff]  ;;  %v5169_v57 = vld [vmem:[#allocation11 + $0x98] sm:$0xff] }
 0x563   :  { %3093 = vrcp.f32 %v1929_v19  ;;  %6519 = vst [vmem:[#allocation24_spill] sm:$0xff] %v5166_v44  ;;  %6520 = vst [vmem:[#allocation25_spill] sm:$0xff] %v5169_v57  ;;  %v5181_v19 = vld [vmem:[#allocation11 + $0x78] sm:$0xff] }
 0x564   :  { %6524 = vst [vmem:[#allocation29_spill] sm:$0xff] %v5181_v19 }
 0x56d   :  { %v3088_v17 = vpop.eup %3087 }
 0x56e   :  { %v3090_v56 = vpop.eup %3089 }
 0x56f   :  { %v3092_v18 = vpop.eup %3091  ;;  %v1938_v21 = vmul.f32 %v3090_v56, %v3088_v17  ;;  %v5172_v17 = vld [vmem:[#allocation11 + $0x80] sm:$0xff]  ;;  %v5175_v56 = vld [vmem:[#allocation11 + $0x90] sm:$0xff] }
 0x570   :  { %v1937_v20 = vmul.f32 %v3092_v18, %v4885_v6  ;;  %v3094_v22 = vpop.eup %3093  ;;  %v5043_v6 = vld [vmem:[#allocation11 + $0x1c8] sm:$0xff]  ;;  %6521 = vst [vmem:[#allocation26_spill] sm:$0xff] %v5172_v17  ;;  %6522 = vst [vmem:[#allocation27_spill] sm:$0xff] %v5175_v56 }
 0x571   :  { %v5178_v18 = vld [vmem:[#allocation11 + $0x68] sm:$0xff] }
 0x572   :  { %v5034_v45 = vadd.f32 %v1938_v21, %v1937_v20  ;;  %6523 = vst [vmem:[#allocation28_spill] sm:$0xff] %v5178_v18  ;;  %v5184_v20 = vld [vmem:[#allocation11 + $0x60] sm:$0xff]  ;;  %v5187_v21 = vld [vmem:[#allocation11 + $0x70] sm:$0xff] }
 0x573   :  { %6525 = vst [vmem:[#allocation30_spill] sm:$0xff] %v5184_v20  ;;  %6526 = vst [vmem:[#allocation31_spill] sm:$0xff] %v5187_v21 }
 0x574   :  { %3095 = vtanh.f32 %v5034_v45 }
 0x581   :  { %v3096_v53 = vpop.eup %3095 }
 0x582   :  { %v1941_v49 = vmul.f32 %v3096_v53, %v3094_v22  ;;  %v5190_v22 = vld [vmem:[#allocation11 + $0x48] sm:$0xff]  ;;  %v5193_v53 = vld [vmem:[#allocation11 + $0x58] sm:$0xff] }
 0x583   :  { %6527 = vst [vmem:[#allocation32_spill] sm:$0xff] %v5190_v22  ;;  %6528 = vst [vmem:[#allocation33_spill] sm:$0xff] %v5193_v53 }
 0x584   :  { %2160 = vmatmul.mubr.f32.vlgmr.msra.gmra.mxu0 %v1941_v49  ;;  %2231 = vmatmul.mubr.f32.vlgmr.msra.gmra.mxu1 %v1941_v49  ;;  %v1950_v25 = vmul.f32 %v2990_v24, %v1941_v49  ;;  %v5196_v24 = vld [vmem:[#allocation11 + $0x40] sm:$0xff]  ;;  %v5199_v49 = vld [vmem:[#allocation11 + $0x50] sm:$0xff] }
 0x585   :  { %2277 = vmatpush1.msra.mxu0 %v5037_v26  ;;  %2348 = vmatpush1.msra.mxu1 %v5040_v27  ;;  %6529 = vst [vmem:[#allocation34_spill] sm:$0xff] %v5196_v24  ;;  %6530 = vst [vmem:[#allocation35_spill] sm:$0xff] %v5199_v49 }
 0x586   :  { %2278 = vmatprep.subr.mxu0 %v5043_v6  ;;  %2349 = vmatprep.subr.mxu1 %v5046_v28  ;;  %v5050_v29 = vadd.f32 %v1950_v25, %v4893_v7  ;;  %v5067_v7 = vld [vmem:[#allocation11 + $0x1b0] sm:$0xff]  ;;  %v5202_v25 = vld [vmem:[#allocation11 + $0x28] sm:$0xff] }
 0x587   :  { %2279 = vmatpush1.msra.mxu0 %v5052_v30  ;;  %2350 = vmatpush1.msra.mxu1 %v5055_v31  ;;  %6531 = vst [vmem:[#allocation36_spill] sm:$0xff] %v5202_v25 }
 0x588   :  { %2280 = vmatprep.subr.mxu0 %v5058_v34  ;;  %2351 = vmatprep.subr.mxu1 %v5061_v37 }
 0x589   :  { %2281 = vmatpush1.msra.mxu0 %v5064_v38  ;;  %2352 = vmatpush1.msra.mxu1 %v5067_v7 }
 0x58a   :  { %2282 = vmatprep.subr.mxu0 %v5070_v40  ;;  %2353 = vmatprep.subr.mxu1 %v5073_v41 }
 0x58b   :  { %2283 = vmatpush1.msra.mxu0 %v5076_v42  ;;  %2354 = vmatpush1.msra.mxu1 %v5079_v43 }
 0x58c   :  { %2284 = vmatprep.subr.mxu0 %v5082_v54  ;;  %2355 = vmatprep.subr.mxu1 %v5085_v0 }
 0x58d   :  { %2285 = vmatpush1.msra.mxu0 %v5088_v51  ;;  %2356 = vmatpush1.msra.mxu1 %v5091_v52 }
 0x58e   :  { %2286 = vmatprep.subr.mxu0 %v5094_v1  ;;  %2357 = vmatprep.subr.mxu1 %v5097_v48 }
 0x58f   :  { %2287 = vmatpush1.msra.mxu0 %v5100_v46  ;;  %2358 = vmatpush1.msra.mxu1 %v5103_v60 }
 0x590   :  { %2288 = vmatprep.subr.mxu0 %v5106_v3  ;;  %2359 = vmatprep.subr.mxu1 %v5109_v63 }
 0x591   :  { %2289 = vmatpush1.msra.mxu0 %v5112_v61  ;;  %2360 = vmatpush1.msra.mxu1 %v5115_v9 }
 0x592   :  { %2290 = vmatprep.subr.mxu0 %v5118_v5  ;;  %2361 = vmatprep.subr.mxu1 %v5121_v58 }
 0x593   :  { %2291 = vmatpush1.msra.mxu0 %v5124_v11  ;;  %2362 = vmatpush1.msra.mxu1 %v5127_v13 }
 0x594   :  { %2292 = vmatprep.subr.mxu0 %v5130_v8  ;;  %2363 = vmatprep.subr.mxu1 %v5133_v23 }
 0x595   :  { %2293 = vmatpush1.msra.mxu0 %v5136_v10  ;;  %2364 = vmatpush1.msra.mxu1 %v5139_v14 }
 0x596   :  { %2294 = vmatprep.subr.mxu0 %v5142_v12  ;;  %2365 = vmatprep.subr.mxu1 %v5145_v32 }
 0x597   :  { %2295 = vmatpush1.msra.mxu0 %v5148_v33  ;;  %2366 = vmatpush1.msra.mxu1 %v5151_v36 }
 0x598   :  { %2296 = vmatprep.subr.mxu0 %v5154_v50  ;;  %2367 = vmatprep.subr.mxu1 %v5157_v4 }
 0x599   :  { %2297 = vmatpush1.msra.mxu0 %v5160_v16  ;;  %2368 = vmatpush1.msra.mxu1 %v5163_v15 }
 0x59a   :  { %2298 = vmatprep.subr.mxu0 %v5166_v44  ;;  %2369 = vmatprep.subr.mxu1 %v5169_v57 }
 0x59b   :  { %2299 = vmatpush1.msra.mxu0 %v5172_v17  ;;  %2370 = vmatpush1.msra.mxu1 %v5175_v56 }
 0x59c   :  { %2300 = vmatprep.subr.mxu0 %v5178_v18  ;;  %2371 = vmatprep.subr.mxu1 %v5181_v19  ;;  %v2090_v18 = vpop.f32.mrf.mxu1 }
 0x59d   :  { %2301 = vmatpush1.msra.mxu0 %v5184_v20  ;;  %2372 = vmatpush1.msra.mxu1 %v5187_v21  ;;  %v5205_v21 = vld [vmem:[#allocation11 + $0x38] sm:$0xff] }
 0x59e   :  { %2302 = vmatprep.subr.mxu0 %v5190_v22  ;;  %2373 = vmatprep.subr.mxu1 %v5193_v53  ;;  %6532 = vst [vmem:[#allocation37_spill] sm:$0xff] %v5205_v21  ;;  %v5208_v22 = vld [vmem:[#allocation11 + $0x20] sm:$0xff]  ;;  %v5211_v53 = vld [vmem:[#allocation11 + $0x30] sm:$0xff]  ;;  %v5243_v20 = vld [vmem:[#allocation12 + $0x1d8] sm:$0xff]  ;;  %v2092_v57 = vpop.f32.mrf.mxu1 }
 0x59f   :  { %2303 = vmatpush1.msra.mxu0 %v5196_v24  ;;  %2374 = vmatpush1.msra.mxu1 %v5199_v49  ;;  %6533 = vst [vmem:[#allocation38_spill] sm:$0xff] %v5208_v22  ;;  %6534 = vst [vmem:[#allocation39_spill] sm:$0xff] %v5211_v53  ;;  %v5214_v24 = vld [vmem:[#allocation11 + $0x8] sm:$0xff]  ;;  %v5218_v49 = vld [vmem:[#allocation11] sm:$0xff]  ;;  %v2093_v15 = vadd.f32 %v2092_v57, %v4194_v62 }
 0x5a0   :  { %2304 = vmatprep.subr.mxu0 %v5202_v25  ;;  %2375 = vmatprep.subr.mxu1 %v5205_v21  ;;  %6535 = vst [vmem:[#allocation40_spill] sm:$0xff] %v5214_v24  ;;  %6536 = vst [vmem:[#allocation42_spill] sm:$0xff] %v5218_v49  ;;  %v5221_v25 = vld [vmem:[#allocation11 + $0x18] sm:$0xff]  ;;  %v5224_v21 = vld [vmem:[#allocation11 + $0x10] sm:$0xff] }
 0x5a1   :  { %2305 = vmatpush1.msra.mxu0 %v5208_v22  ;;  %2376 = vmatpush1.msra.mxu1 %v5211_v53  ;;  %6537 = vst [vmem:[#allocation41_spill] sm:$0xff] %v5221_v25  ;;  %6538 = vst [vmem:[#allocation43_spill] sm:$0xff] %v5224_v21  ;;  %v5228_v53 = vld [vmem:[#allocation12 + $0x1e8] sm:$0xff] }
 0x5a2   :  { %2306 = vmatprep.subr.mxu0 %v5214_v24  ;;  %2340 = vmatprep.mubr.f32.mxu0 %v4950_v35  ;;  %6539 = vst [vmem:[#allocation44_spill] sm:$0xff] %v5228_v53  ;;  %v5231_v24 = vld [vmem:[#allocation12 + $0x1f8] sm:$0xff]  ;;  %6544 = vst [vmem:[#allocation49_spill] sm:$0xff] %v5243_v20 }
 0x5a3   :  { %2307 = vmatpush1.msra.mxu0 %v5218_v49  ;;  %2377 = vmatprep.subr.mxu1 %v5221_v25  ;;  %6540 = vst [vmem:[#allocation45_spill] sm:$0xff] %v5231_v24  ;;  %v174_v49 = vld [vmem:[%s173_s4] sm:$0x1] }
 0x5a4   :  { %2378 = vmatpush1.msra.mxu1 %v5224_v21  ;;  %2411 = vmatprep.mubr.f32.mxu1 %v4950_v35  ;;  %175 = vst [vmem:[#allocation2 + $0x30] sm:$0x1] %v174_v49  ;;  %v178_v25 = vld [vmem:[%s177_s21] sm:$0x1]  ;;  %v5234_v21 = vld [vmem:[#allocation12 + $0x1e0] sm:$0xff] }
 0x5a5   :  { %2418 = vmatprep.subr.mxu0 %v5228_v53  ;;  %2489 = vmatprep.subr.mxu1 %v5231_v24  ;;  %179 = vst [vmem:[#allocation2 + $0x31] sm:$0x1] %v178_v25  ;;  %6541 = vst [vmem:[#allocation46_spill] sm:$0xff] %v5234_v21  ;;  %v5237_v53 = vld [vmem:[#allocation12 + $0x1f0] sm:$0xff]  ;;  %v5240_v24 = vld [vmem:[#allocation12 + $0x1c8] sm:$0xff] }
 0x5a6   :  { %6542 = vst [vmem:[#allocation47_spill] sm:$0xff] %v5237_v53  ;;  %6543 = vst [vmem:[#allocation48_spill] sm:$0xff] %v5240_v24  ;;  %v5246_v49 = vld [vmem:[#allocation12 + $0x1c0] sm:$0xff]  ;;  %v5252_v25 = vld [vmem:[#allocation12 + $0x1a8] sm:$0xff] }
 0x5a7   :  { %6545 = vst [vmem:[#allocation50_spill] sm:$0xff] %v5246_v49  ;;  %6547 = vst [vmem:[#allocation52_spill] sm:$0xff] %v5252_v25 }
 0x5ac   :  { %v2275_v22 = vld [vmem:[#allocation2 + $0x30] sm:$0xff] }
 0x5ad   :  { %2341 = vmatmul.mubr.f32.vlgmr.msra.gmra.mxu0 %v2275_v22  ;;  %2412 = vmatmul.mubr.f32.vlgmr.msra.gmra.mxu1 %v2275_v22  ;;  %v5249_v22 = vld [vmem:[#allocation12 + $0x1d0] sm:$0xff] }
 0x5ae   :  { %2419 = vmatpush1.msra.mxu0 %v5234_v21  ;;  %2490 = vmatpush1.msra.mxu1 %v5237_v53  ;;  %6546 = vst [vmem:[#allocation51_spill] sm:$0xff] %v5249_v22  ;;  %v5255_v53 = vld [vmem:[#allocation12 + $0x1b8] sm:$0xff] }
 0x5af   :  { %2420 = vmatprep.subr.mxu0 %v5240_v24  ;;  %2491 = vmatprep.subr.mxu1 %v5243_v20  ;;  %6548 = vst [vmem:[#allocation53_spill] sm:$0xff] %v5255_v53  ;;  %v5258_v24 = vld [vmem:[#allocation12 + $0x1a0] sm:$0xff]  ;;  %v5261_v20 = vld [vmem:[#allocation12 + $0x1b0] sm:$0xff] }
 0x5b0   :  { %2421 = vmatpush1.msra.mxu0 %v5246_v49  ;;  %2492 = vmatpush1.msra.mxu1 %v5249_v22  ;;  %6549 = vst [vmem:[#allocation54_spill] sm:$0xff] %v5258_v24  ;;  %6550 = vst [vmem:[#allocation55_spill] sm:$0xff] %v5261_v20  ;;  %v5264_v49 = vld [vmem:[#allocation12 + $0x188] sm:$0xff]  ;;  %v5267_v22 = vld [vmem:[#allocation12 + $0x198] sm:$0xff] }
 0x5b1   :  { %2422 = vmatprep.subr.mxu0 %v5252_v25  ;;  %2493 = vmatprep.subr.mxu1 %v5255_v53  ;;  %6551 = vst [vmem:[#allocation56_spill] sm:$0xff] %v5264_v49  ;;  %6552 = vst [vmem:[#allocation57_spill] sm:$0xff] %v5267_v22  ;;  %v5270_v25 = vld [vmem:[#allocation12 + $0x180] sm:$0xff]  ;;  %v5273_v53 = vld [vmem:[#allocation12 + $0x190] sm:$0xff] }
 0x5b2   :  { %2423 = vmatpush1.msra.mxu0 %v5258_v24  ;;  %2494 = vmatpush1.msra.mxu1 %v5261_v20  ;;  %6553 = vst [vmem:[#allocation58_spill] sm:$0xff] %v5270_v25  ;;  %6554 = vst [vmem:[#allocation59_spill] sm:$0xff] %v5273_v53  ;;  %v5276_v24 = vld [vmem:[#allocation12 + $0x168] sm:$0xff]  ;;  %v5279_v20 = vld [vmem:[#allocation12 + $0x178] sm:$0xff] }
 0x5b3   :  { %2424 = vmatprep.subr.mxu0 %v5264_v49  ;;  %2495 = vmatprep.subr.mxu1 %v5267_v22  ;;  %6555 = vst [vmem:[#allocation60_spill] sm:$0xff] %v5276_v24  ;;  %6556 = vst [vmem:[#allocation61_spill] sm:$0xff] %v5279_v20  ;;  %v5282_v49 = vld [vmem:[#allocation12 + $0x160] sm:$0xff]  ;;  %v5285_v22 = vld [vmem:[#allocation12 + $0x170] sm:$0xff] }
 0x5b4   :  { %2425 = vmatpush1.msra.mxu0 %v5270_v25  ;;  %2496 = vmatpush1.msra.mxu1 %v5273_v53  ;;  %6557 = vst [vmem:[#allocation62_spill] sm:$0xff] %v5282_v49  ;;  %6558 = vst [vmem:[#allocation63_spill] sm:$0xff] %v5285_v22  ;;  %v5288_v25 = vld [vmem:[#allocation12 + $0x148] sm:$0xff]  ;;  %v5291_v53 = vld [vmem:[#allocation12 + $0x158] sm:$0xff] }
 0x5b5   :  { %2426 = vmatprep.subr.mxu0 %v5276_v24  ;;  %2497 = vmatprep.subr.mxu1 %v5279_v20  ;;  %6559 = vst [vmem:[#allocation64_spill] sm:$0xff] %v5288_v25  ;;  %6560 = vst [vmem:[#allocation65_spill] sm:$0xff] %v5291_v53  ;;  %v5294_v24 = vld [vmem:[#allocation12 + $0x140] sm:$0xff]  ;;  %v5297_v20 = vld [vmem:[#allocation12 + $0x150] sm:$0xff] }
 0x5b6   :  { %2427 = vmatpush1.msra.mxu0 %v5282_v49  ;;  %2498 = vmatpush1.msra.mxu1 %v5285_v22  ;;  %6561 = vst [vmem:[#allocation66_spill] sm:$0xff] %v5294_v24  ;;  %6562 = vst [vmem:[#allocation67_spill] sm:$0xff] %v5297_v20  ;;  %v5300_v49 = vld [vmem:[#allocation12 + $0x128] sm:$0xff]  ;;  %v5303_v22 = vld [vmem:[#allocation12 + $0x138] sm:$0xff] }
 0x5b7   :  { %2428 = vmatprep.subr.mxu0 %v5288_v25  ;;  %2499 = vmatprep.subr.mxu1 %v5291_v53  ;;  %6563 = vst [vmem:[#allocation68_spill] sm:$0xff] %v5300_v49  ;;  %6564 = vst [vmem:[#allocation69_spill] sm:$0xff] %v5303_v22  ;;  %v5306_v25 = vld [vmem:[#allocation12 + $0x120] sm:$0xff]  ;;  %v5309_v53 = vld [vmem:[#allocation12 + $0x130] sm:$0xff] }
 0x5b8   :  { %2429 = vmatpush1.msra.mxu0 %v5294_v24  ;;  %2500 = vmatpush1.msra.mxu1 %v5297_v20  ;;  %6565 = vst [vmem:[#allocation70_spill] sm:$0xff] %v5306_v25  ;;  %6566 = vst [vmem:[#allocation71_spill] sm:$0xff] %v5309_v53  ;;  %v5312_v24 = vld [vmem:[#allocation12 + $0x108] sm:$0xff]  ;;  %v5315_v20 = vld [vmem:[#allocation12 + $0x118] sm:$0xff] }
 0x5b9   :  { %2430 = vmatprep.subr.mxu0 %v5300_v49  ;;  %2501 = vmatprep.subr.mxu1 %v5303_v22  ;;  %6567 = vst [vmem:[#allocation72_spill] sm:$0xff] %v5312_v24  ;;  %6568 = vst [vmem:[#allocation73_spill] sm:$0xff] %v5315_v20  ;;  %v5318_v49 = vld [vmem:[#allocation12 + $0x100] sm:$0xff]  ;;  %v5321_v22 = vld [vmem:[#allocation12 + $0x110] sm:$0xff] }
 0x5ba   :  { %2431 = vmatpush1.msra.mxu0 %v5306_v25  ;;  %2502 = vmatpush1.msra.mxu1 %v5309_v53  ;;  %6569 = vst [vmem:[#allocation74_spill] sm:$0xff] %v5318_v49  ;;  %6570 = vst [vmem:[#allocation75_spill] sm:$0xff] %v5321_v22  ;;  %v5324_v25 = vld [vmem:[#allocation12 + $0xe8] sm:$0xff]  ;;  %v5327_v53 = vld [vmem:[#allocation12 + $0xf8] sm:$0xff] }
 0x5bb   :  { %2432 = vmatprep.subr.mxu0 %v5312_v24  ;;  %2503 = vmatprep.subr.mxu1 %v5315_v20  ;;  %6571 = vst [vmem:[#allocation76_spill] sm:$0xff] %v5324_v25  ;;  %6572 = vst [vmem:[#allocation77_spill] sm:$0xff] %v5327_v53  ;;  %v5330_v24 = vld [vmem:[#allocation12 + $0xe0] sm:$0xff]  ;;  %v5333_v20 = vld [vmem:[#allocation12 + $0xf0] sm:$0xff] }
 0x5bc   :  { %2433 = vmatpush1.msra.mxu0 %v5318_v49  ;;  %2504 = vmatpush1.msra.mxu1 %v5321_v22  ;;  %6573 = vst [vmem:[#allocation78_spill] sm:$0xff] %v5330_v24  ;;  %6574 = vst [vmem:[#allocation79_spill] sm:$0xff] %v5333_v20  ;;  %v5336_v49 = vld [vmem:[#allocation12 + $0xc8] sm:$0xff]  ;;  %v5339_v22 = vld [vmem:[#allocation12 + $0xd8] sm:$0xff] }
 0x5bd   :  { %2434 = vmatprep.subr.mxu0 %v5324_v25  ;;  %2505 = vmatprep.subr.mxu1 %v5327_v53  ;;  %6575 = vst [vmem:[#allocation80_spill] sm:$0xff] %v5336_v49  ;;  %6576 = vst [vmem:[#allocation81_spill] sm:$0xff] %v5339_v22  ;;  %v5342_v25 = vld [vmem:[#allocation12 + $0xc0] sm:$0xff]  ;;  %v5345_v53 = vld [vmem:[#allocation12 + $0xd0] sm:$0xff] }
 0x5be   :  { %2435 = vmatpush1.msra.mxu0 %v5330_v24  ;;  %2506 = vmatpush1.msra.mxu1 %v5333_v20  ;;  %6577 = vst [vmem:[#allocation82_spill] sm:$0xff] %v5342_v25  ;;  %6578 = vst [vmem:[#allocation83_spill] sm:$0xff] %v5345_v53  ;;  %v5348_v24 = vld [vmem:[#allocation12 + $0xa8] sm:$0xff]  ;;  %v5351_v20 = vld [vmem:[#allocation12 + $0xb8] sm:$0xff] }
 0x5bf   :  { %2436 = vmatprep.subr.mxu0 %v5336_v49  ;;  %2507 = vmatprep.subr.mxu1 %v5339_v22  ;;  %6579 = vst [vmem:[#allocation84_spill] sm:$0xff] %v5348_v24  ;;  %6580 = vst [vmem:[#allocation86_spill] sm:$0xff] %v5351_v20  ;;  %v5354_v49 = vld [vmem:[#allocation12 + $0xa0] sm:$0xff]  ;;  %v5357_v22 = vld [vmem:[#allocation12 + $0xb0] sm:$0xff] }
 0x5c0   :  { %2437 = vmatpush1.msra.mxu0 %v5342_v25  ;;  %2508 = vmatpush1.msra.mxu1 %v5345_v53  ;;  %6581 = vst [vmem:[#allocation88_spill] sm:$0xff] %v5354_v49  ;;  %6582 = vst [vmem:[#allocation90_spill] sm:$0xff] %v5357_v22  ;;  %v5360_v25 = vld [vmem:[#allocation12 + $0x88] sm:$0xff]  ;;  %v5363_v53 = vld [vmem:[#allocation12 + $0x98] sm:$0xff] }
 0x5c1   :  { %2438 = vmatprep.subr.mxu0 %v5348_v24  ;;  %2509 = vmatprep.subr.mxu1 %v5351_v20  ;;  %6583 = vst [vmem:[#allocation91_spill] sm:$0xff] %v5360_v25  ;;  %6584 = vst [vmem:[#allocation92_spill] sm:$0xff] %v5363_v53  ;;  %v5366_v24 = vld [vmem:[#allocation12 + $0x80] sm:$0xff]  ;;  %v5369_v20 = vld [vmem:[#allocation12 + $0x90] sm:$0xff] }
 0x5c2   :  { %2439 = vmatpush1.msra.mxu0 %v5354_v49  ;;  %2510 = vmatpush1.msra.mxu1 %v5357_v22  ;;  %6585 = vst [vmem:[#allocation93_spill] sm:$0xff] %v5366_v24  ;;  %6586 = vst [vmem:[#allocation94_spill] sm:$0xff] %v5369_v20  ;;  %v5372_v49 = vld [vmem:[#allocation12 + $0x68] sm:$0xff]  ;;  %v5375_v22 = vld [vmem:[#allocation12 + $0x78] sm:$0xff] }
 0x5c3   :  { %2440 = vmatprep.subr.mxu0 %v5360_v25  ;;  %2511 = vmatprep.subr.mxu1 %v5363_v53  ;;  %6587 = vst [vmem:[#allocation95_spill] sm:$0xff] %v5372_v49  ;;  %6588 = vst [vmem:[#allocation96_spill] sm:$0xff] %v5375_v22  ;;  %v5378_v25 = vld [vmem:[#allocation12 + $0x60] sm:$0xff]  ;;  %v5381_v53 = vld [vmem:[#allocation12 + $0x70] sm:$0xff] }
 0x5c4   :  { %2441 = vmatpush1.msra.mxu0 %v5366_v24  ;;  %2512 = vmatpush1.msra.mxu1 %v5369_v20  ;;  %6589 = vst [vmem:[#allocation97_spill] sm:$0xff] %v5378_v25  ;;  %6590 = vst [vmem:[#allocation98_spill] sm:$0xff] %v5381_v53  ;;  %v5384_v24 = vld [vmem:[#allocation12 + $0x48] sm:$0xff]  ;;  %v5387_v20 = vld [vmem:[#allocation12 + $0x58] sm:$0xff] }
 0x5c5   :  { %2442 = vmatprep.subr.mxu0 %v5372_v49  ;;  %2513 = vmatprep.subr.mxu1 %v5375_v22  ;;  %6591 = vst [vmem:[#allocation99_spill] sm:$0xff] %v5384_v24  ;;  %6592 = vst [vmem:[#allocation100_spill] sm:$0xff] %v5387_v20  ;;  %v5390_v49 = vld [vmem:[#allocation12 + $0x40] sm:$0xff]  ;;  %v5393_v22 = vld [vmem:[#allocation12 + $0x50] sm:$0xff] }
 0x5c6   :  { %2443 = vmatpush1.msra.mxu0 %v5378_v25  ;;  %2514 = vmatpush1.msra.mxu1 %v5381_v53  ;;  %6593 = vst [vmem:[#allocation101_spill] sm:$0xff] %v5390_v49  ;;  %6594 = vst [vmem:[#allocation102_spill] sm:$0xff] %v5393_v22  ;;  %v5396_v25 = vld [vmem:[#allocation12 + $0x28] sm:$0xff]  ;;  %v5399_v53 = vld [vmem:[#allocation12 + $0x38] sm:$0xff] }
 0x5c7   :  { %2444 = vmatprep.subr.mxu0 %v5384_v24  ;;  %2515 = vmatprep.subr.mxu1 %v5387_v20  ;;  %6595 = vst [vmem:[#allocation103_spill] sm:$0xff] %v5396_v25  ;;  %6596 = vst [vmem:[#allocation104_spill] sm:$0xff] %v5399_v53  ;;  %v5402_v24 = vld [vmem:[#allocation12 + $0x20] sm:$0xff]  ;;  %v5405_v20 = vld [vmem:[#allocation12 + $0x30] sm:$0xff] }
 0x5c8   :  { %2445 = vmatpush1.msra.mxu0 %v5390_v49  ;;  %2516 = vmatpush1.msra.mxu1 %v5393_v22  ;;  %6597 = vst [vmem:[#allocation105_spill] sm:$0xff] %v5402_v24  ;;  %6598 = vst [vmem:[#allocation106_spill] sm:$0xff] %v5405_v20  ;;  %v5408_v49 = vld [vmem:[#allocation12 + $0x8] sm:$0xff]  ;;  %v5411_v22 = vld [vmem:[#allocation12 + $0x18] sm:$0xff] }
 0x5c9   :  { %2446 = vmatprep.subr.mxu0 %v5396_v25  ;;  %2517 = vmatprep.subr.mxu1 %v5399_v53  ;;  %6599 = vst [vmem:[#allocation107_spill] sm:$0xff] %v5408_v49  ;;  %6600 = vst [vmem:[#allocation87_spill] sm:$0xff] %v5411_v22  ;;  %v5414_v25 = vld [vmem:[#allocation12] sm:$0xff]  ;;  %v5418_v53 = vld [vmem:[#allocation12 + $0x10] sm:$0xff] }
 0x5ca   :  { %2447 = vmatpush1.msra.mxu0 %v5402_v24  ;;  %2518 = vmatpush1.msra.mxu1 %v5405_v20  ;;  %6601 = vst [vmem:[#allocation108_spill] sm:$0xff] %v5414_v25  ;;  %6602 = vst [vmem:[#allocation109_spill] sm:$0xff] %v5418_v53 }
 0x5cb   :  { %2448 = vmatprep.subr.mxu0 %v5408_v49  ;;  %2519 = vmatprep.subr.mxu1 %v5411_v22  ;;  %v2019_v49 = vpop.f32.mrf.mxu0 }
 0x5cc   :  { %2449 = vmatpush1.msra.mxu0 %v5414_v25  ;;  %2482 = vmatprep.mubr.f32.mxu0 %v4950_v35  ;;  %v2020_v22 = vadd.f32 %v2019_v49, %v6516_v2 }
 0x5cd   :  { %2520 = vmatpush1.msra.mxu1 %v5418_v53  ;;  %2553 = vmatprep.mubr.f32.mxu1 %v4950_v35  ;;  %v2021_v20 = vpop.f32.mrf.mxu0 }
 0x5ce   :  { %2599 = vmatprep.subr.mxu0 %v5023_v47  ;;  %2670 = vmatprep.subr.mxu1 %v5026_v59  ;;  %v2022_v21 = vadd.f32 %v2021_v20, %v6252_v39  ;;  %v2091_v47 = vadd.f32 %v2090_v18, %v4191_v55 }
 0x644   :  { %v2161_v24 = vpop.f32.mrf.mxu0  ;;  %v2232_v35 = vpop.f32.mrf.mxu1 }
 0x645   :  { %v2237_v25 = vadd.f32 %v2161_v24, %v2020_v22  ;;  %v2239_v59 = vadd.f32 %v2232_v35, %v2091_v47  ;;  %v6641_v47 = vld [vmem:[#allocation59_spill] sm:$0xff] }
 0x646   :  { %v2163_v19 = vpop.f32.mrf.mxu0  ;;  %v2234_v44 = vpop.f32.mrf.mxu1 }
 0x647   :  { %v2991_v56 = vmul.f32 -1.442695, %v2237_v25  ;;  %v2238_v17 = vadd.f32 %v2163_v19, %v2022_v21  ;;  %v2993_v49 = vmul.f32 -1.442695, %v2239_v59  ;;  %v2240_v16 = vadd.f32 %v2234_v44, %v2093_v15  ;;  %v2994_v44 = vld [vmem:[#allocation15 + $0x5] ss:$0 sm:$0xff] }
 0x648   :  { %v6642_v59 = vld [vmem:[#allocation60_spill] sm:$0xff] }
 0x649   :  { %3097 = vpow2.f32 %v2991_v56  ;;  %v2992_v53 = vmul.f32 -1.442695, %v2238_v17 }
 0x64b   :  { %3099 = vpow2.f32 %v2992_v53 }
 0x64c   :  { %3101 = vpow2.f32 %v2993_v49  ;;  %v6643_v49 = vld [vmem:[#allocation61_spill] sm:$0xff] }
 0x656   :  { %v3098_v2 = vpop.eup %3097 }
 0x657   :  { %v2250_v20 = vadd.f32 1.0, %v3098_v2 }
 0x658   :  { %v3100_v24 = vpop.eup %3099 }
 0x659   :  { %3103 = vrcp.f32 %v2250_v20  ;;  %v2251_v22 = vadd.f32 1.0, %v3100_v24  ;;  %v3102_v17 = vpop.eup %3101  ;;  %v6644_v20 = vld [vmem:[#allocation62_spill] sm:$0xff]  ;;  %v6645_v24 = vld [vmem:[#allocation63_spill] sm:$0xff] }
 0x65a   :  { %3105 = vtanh.f32 %v2240_v16  ;;  %v2252_v53 = vadd.f32 1.0, %v3102_v17  ;;  %v6647_v17 = vld [vmem:[#allocation65_spill] sm:$0xff] }
 0x65b   :  { %3107 = vrcp.f32 %v2251_v22  ;;  %v6646_v22 = vld [vmem:[#allocation64_spill] sm:$0xff] }
 0x65c   :  { %3109 = vrcp.f32 %v2252_v53  ;;  %v6651_v53 = vld [vmem:[#allocation69_spill] sm:$0xff] }
 0x666   :  { %v3104_v56 = vpop.eup %3103 }
 0x667   :  { %v3106_v19 = vpop.eup %3105 }
 0x668   :  { %v3108_v21 = vpop.eup %3107  ;;  %v2261_v18 = vmul.f32 %v3106_v19, %v3104_v56  ;;  %v6648_v56 = vld [vmem:[#allocation66_spill] sm:$0xff]  ;;  %v6649_v19 = vld [vmem:[#allocation67_spill] sm:$0xff] }
 0x669   :  { %v2260_v35 = vmul.f32 %v3108_v21, %v5034_v45  ;;  %v3110_v2 = vpop.eup %3109  ;;  %v6650_v21 = vld [vmem:[#allocation68_spill] sm:$0xff] }
 0x66b   :  { %v5429_v25 = vadd.f32 %v2261_v18, %v2260_v35  ;;  %v6652_v35 = vld [vmem:[#allocation70_spill] sm:$0xff]  ;;  %v6653_v18 = vld [vmem:[#allocation71_spill] sm:$0xff] }
 0x66d   :  { %3111 = vtanh.f32 %v5429_v25 }
 0x67a   :  { %v3112_v15 = vpop.eup %3111 }
 0x67b   :  { %v2264_v57 = vmul.f32 %v3112_v15, %v3110_v2  ;;  %v6654_v2 = vld [vmem:[#allocation72_spill] sm:$0xff]  ;;  %v6655_v15 = vld [vmem:[#allocation73_spill] sm:$0xff] }
 0x67d   :  { %2483 = vmatmul.mubr.f32.vlgmr.msra.gmra.mxu0 %v2264_v57  ;;  %2554 = vmatmul.mubr.f32.vlgmr.msra.gmra.mxu1 %v2264_v57  ;;  %v2273_v16 = vmul.f32 %v2994_v44, %v2264_v57  ;;  %v6656_v44 = vld [vmem:[#allocation74_spill] sm:$0xff]  ;;  %v6657_v57 = vld [vmem:[#allocation75_spill] sm:$0xff] }
 0x67e   :  { %2600 = vmatpush1.msra.mxu0 %v5037_v26  ;;  %2671 = vmatpush1.msra.mxu1 %v5040_v27  ;;  %v6603_v26 = vld [vmem:[#allocation22_spill] sm:$0xff]  ;;  %v6604_v27 = vld [vmem:[#allocation23_spill] sm:$0xff] }
 0x67f   :  { %2601 = vmatprep.subr.mxu0 %v5043_v6  ;;  %2672 = vmatprep.subr.mxu1 %v5046_v28  ;;  %v5437_v45 = vadd.f32 %v2273_v16, %v5050_v29  ;;  %v6605_v6 = vld [vmem:[#allocation24_spill] sm:$0xff]  ;;  %v6606_v28 = vld [vmem:[#allocation25_spill] sm:$0xff]  ;;  %v6607_v29 = vld [vmem:[#allocation26_spill] sm:$0xff] }
 0x680   :  { %2602 = vmatpush1.msra.mxu0 %v5052_v30  ;;  %2673 = vmatpush1.msra.mxu1 %v5055_v31  ;;  %v6608_v30 = vld [vmem:[#allocation27_spill] sm:$0xff]  ;;  %v6609_v31 = vld [vmem:[#allocation28_spill] sm:$0xff] }
 0x681   :  { %2603 = vmatprep.subr.mxu0 %v5058_v34  ;;  %2674 = vmatprep.subr.mxu1 %v5061_v37  ;;  %v6610_v34 = vld [vmem:[#allocation29_spill] sm:$0xff]  ;;  %v6611_v37 = vld [vmem:[#allocation30_spill] sm:$0xff]  ;;  %v6658_v16 = vld [vmem:[#allocation76_spill] sm:$0xff] }
 0x682   :  { %2604 = vmatpush1.msra.mxu0 %v5064_v38  ;;  %2675 = vmatpush1.msra.mxu1 %v5067_v7  ;;  %v6612_v38 = vld [vmem:[#allocation31_spill] sm:$0xff]  ;;  %v6613_v7 = vld [vmem:[#allocation32_spill] sm:$0xff] }
 0x683   :  { %2605 = vmatprep.subr.mxu0 %v5070_v40  ;;  %2676 = vmatprep.subr.mxu1 %v5073_v41  ;;  %v6614_v40 = vld [vmem:[#allocation33_spill] sm:$0xff]  ;;  %v6615_v41 = vld [vmem:[#allocation34_spill] sm:$0xff] }
 0x684   :  { %2606 = vmatpush1.msra.mxu0 %v5076_v42  ;;  %2677 = vmatpush1.msra.mxu1 %v5079_v43  ;;  %v6616_v42 = vld [vmem:[#allocation35_spill] sm:$0xff]  ;;  %v6617_v43 = vld [vmem:[#allocation36_spill] sm:$0xff] }
 0x685   :  { %2607 = vmatprep.subr.mxu0 %v5082_v54  ;;  %2678 = vmatprep.subr.mxu1 %v5085_v0  ;;  %v6618_v54 = vld [vmem:[#allocation37_spill] sm:$0xff]  ;;  %v6619_v0 = vld [vmem:[#allocation38_spill] sm:$0xff] }
 0x686   :  { %2608 = vmatpush1.msra.mxu0 %v5088_v51  ;;  %2679 = vmatpush1.msra.mxu1 %v5091_v52  ;;  %v6620_v51 = vld [vmem:[#allocation39_spill] sm:$0xff]  ;;  %v6621_v52 = vld [vmem:[#allocation40_spill] sm:$0xff] }
 0x687   :  { %2609 = vmatprep.subr.mxu0 %v5094_v1  ;;  %2680 = vmatprep.subr.mxu1 %v5097_v48  ;;  %v6622_v1 = vld [vmem:[#allocation89_spill] sm:$0xff]  ;;  %v6623_v48 = vld [vmem:[#allocation42_spill] sm:$0xff] }
 0x688   :  { %2610 = vmatpush1.msra.mxu0 %v5100_v46  ;;  %2681 = vmatpush1.msra.mxu1 %v5103_v60  ;;  %v6624_v46 = vld [vmem:[#allocation41_spill] sm:$0xff]  ;;  %v6625_v60 = vld [vmem:[#allocation43_spill] sm:$0xff] }
 0x689   :  { %2611 = vmatprep.subr.mxu0 %v5106_v3  ;;  %2682 = vmatprep.subr.mxu1 %v5109_v63  ;;  %v6626_v3 = vld [vmem:[#allocation44_spill] sm:$0xff]  ;;  %v6627_v63 = vld [vmem:[#allocation45_spill] sm:$0xff] }
 0x68a   :  { %2612 = vmatpush1.msra.mxu0 %v5112_v61  ;;  %2683 = vmatpush1.msra.mxu1 %v5115_v9  ;;  %v182_v61 = vld [vmem:[%s181_s6] sm:$0x1] }
 0x68b   :  { %2613 = vmatprep.subr.mxu0 %v5118_v5  ;;  %2684 = vmatprep.subr.mxu1 %v5121_v58  ;;  %183 = vst [vmem:[#allocation2 + $0x38] sm:$0x1] %v182_v61  ;;  %v186_v9 = vld [vmem:[%s185_s7] sm:$0x1]  ;;  %v6683_v61 = vld [vmem:[#allocation104_spill] sm:$0xff] }
 0x68c   :  { %2614 = vmatpush1.msra.mxu0 %v5124_v11  ;;  %2685 = vmatpush1.msra.mxu1 %v5127_v13  ;;  %187 = vst [vmem:[#allocation2 + $0x39] sm:$0x1] %v186_v9  ;;  %v6628_v58 = vld [vmem:[#allocation46_spill] sm:$0xff]  ;;  %v6629_v11 = vld [vmem:[#allocation47_spill] sm:$0xff]  ;;  %v6630_v13 = vld [vmem:[#allocation48_spill] sm:$0xff] }
 0x68d   :  { %2615 = vmatprep.subr.mxu0 %v5130_v8  ;;  %2686 = vmatprep.subr.mxu1 %v5133_v23  ;;  %v6631_v8 = vld [vmem:[#allocation49_spill] sm:$0xff]  ;;  %v6632_v23 = vld [vmem:[#allocation50_spill] sm:$0xff] }
 0x68e   :  { %2616 = vmatpush1.msra.mxu0 %v5136_v10  ;;  %2687 = vmatpush1.msra.mxu1 %v5139_v14  ;;  %v6633_v10 = vld [vmem:[#allocation51_spill] sm:$0xff]  ;;  %v6634_v14 = vld [vmem:[#allocation52_spill] sm:$0xff]  ;;  %v6684_v9 = vld [vmem:[#allocation105_spill] sm:$0xff] }
 0x68f   :  { %2617 = vmatprep.subr.mxu0 %v5142_v12  ;;  %2688 = vmatprep.subr.mxu1 %v5145_v32  ;;  %v6635_v12 = vld [vmem:[#allocation53_spill] sm:$0xff]  ;;  %v6636_v32 = vld [vmem:[#allocation54_spill] sm:$0xff] }
 0x690   :  { %2618 = vmatpush1.msra.mxu0 %v5148_v33  ;;  %2689 = vmatpush1.msra.mxu1 %v5151_v36  ;;  %v6637_v33 = vld [vmem:[#allocation55_spill] sm:$0xff]  ;;  %v6638_v36 = vld [vmem:[#allocation56_spill] sm:$0xff] }
 0x691   :  { %2619 = vmatprep.subr.mxu0 %v5154_v50  ;;  %2690 = vmatprep.subr.mxu1 %v5157_v4  ;;  %v6639_v50 = vld [vmem:[#allocation57_spill] sm:$0xff]  ;;  %v6640_v4 = vld [vmem:[#allocation58_spill] sm:$0xff] }
 0x692   :  { %2620 = vmatpush1.msra.mxu0 %v6603_v26  ;;  %2691 = vmatpush1.msra.mxu1 %v6604_v27  ;;  %v6659_v26 = vld [vmem:[#allocation77_spill] sm:$0xff]  ;;  %v6660_v27 = vld [vmem:[#allocation78_spill] sm:$0xff] }
 0x693   :  { %2621 = vmatprep.subr.mxu0 %v6605_v6  ;;  %2692 = vmatprep.subr.mxu1 %v6606_v28  ;;  %v2598_v5 = vld [vmem:[#allocation2 + $0x38] sm:$0xff]  ;;  %v6661_v6 = vld [vmem:[#allocation79_spill] sm:$0xff]  ;;  %v6662_v28 = vld [vmem:[#allocation80_spill] sm:$0xff] }
 0x694   :  { %2622 = vmatpush1.msra.mxu0 %v6607_v29  ;;  %2693 = vmatpush1.msra.mxu1 %v6608_v30  ;;  %v6663_v29 = vld [vmem:[#allocation81_spill] sm:$0xff]  ;;  %v6664_v30 = vld [vmem:[#allocation82_spill] sm:$0xff] }
 0x695   :  { %2623 = vmatprep.subr.mxu0 %v6609_v31  ;;  %2694 = vmatprep.subr.mxu1 %v6610_v34  ;;  %v6665_v31 = vld [vmem:[#allocation83_spill] sm:$0xff]  ;;  %v6666_v34 = vld [vmem:[#allocation84_spill] sm:$0xff] }
 0x696   :  { %2624 = vmatpush1.msra.mxu0 %v6611_v37  ;;  %2695 = vmatpush1.msra.mxu1 %v6612_v38  ;;  %v6667_v37 = vld [vmem:[#allocation86_spill] sm:$0xff]  ;;  %v6668_v38 = vld [vmem:[#allocation88_spill] sm:$0xff] }
 0x697   :  { %2625 = vmatprep.subr.mxu0 %v6613_v7  ;;  %2696 = vmatprep.subr.mxu1 %v6614_v40  ;;  %v6669_v7 = vld [vmem:[#allocation90_spill] sm:$0xff]  ;;  %v6670_v40 = vld [vmem:[#allocation91_spill] sm:$0xff] }
 0x698   :  { %2626 = vmatpush1.msra.mxu0 %v6615_v41  ;;  %2697 = vmatpush1.msra.mxu1 %v6616_v42  ;;  %v6671_v41 = vld [vmem:[#allocation92_spill] sm:$0xff]  ;;  %v6672_v42 = vld [vmem:[#allocation93_spill] sm:$0xff] }
 0x699   :  { %2627 = vmatprep.subr.mxu0 %v6617_v43  ;;  %2698 = vmatprep.subr.mxu1 %v6618_v54  ;;  %v6673_v43 = vld [vmem:[#allocation94_spill] sm:$0xff]  ;;  %v6674_v54 = vld [vmem:[#allocation95_spill] sm:$0xff] }
 0x69a   :  { %2628 = vmatpush1.msra.mxu0 %v6619_v0  ;;  %2699 = vmatpush1.msra.mxu1 %v6620_v51  ;;  %v6675_v0 = vld [vmem:[#allocation96_spill] sm:$0xff]  ;;  %v6676_v51 = vld [vmem:[#allocation97_spill] sm:$0xff] }
 0x69b   :  { %2629 = vmatprep.subr.mxu0 %v6621_v52  ;;  %2663 = vmatprep.mubr.f32.mxu0 %v6622_v1  ;;  %v6677_v52 = vld [vmem:[#allocation98_spill] sm:$0xff] }
 0x69c   :  { %2630 = vmatpush1.msra.mxu0 %v6623_v48  ;;  %2700 = vmatprep.subr.mxu1 %v6624_v46  ;;  %v6678_v48 = vld [vmem:[#allocation99_spill] sm:$0xff]  ;;  %v6679_v46 = vld [vmem:[#allocation100_spill] sm:$0xff] }
 0x69d   :  { %2701 = vmatpush1.msra.mxu1 %v6625_v60  ;;  %2734 = vmatprep.mubr.f32.mxu1 %v6622_v1  ;;  %v6680_v60 = vld [vmem:[#allocation101_spill] sm:$0xff] }
 0x69e   :  { %2741 = vmatprep.subr.mxu0 %v6626_v3  ;;  %2812 = vmatprep.subr.mxu1 %v6627_v63  ;;  %v6681_v3 = vld [vmem:[#allocation102_spill] sm:$0xff]  ;;  %v6682_v63 = vld [vmem:[#allocation103_spill] sm:$0xff] }
 0x69f   :  { %2664 = vmatmul.mubr.f32.vlgmr.msra.gmra.mxu0 %v2598_v5  ;;  %2735 = vmatmul.mubr.f32.vlgmr.msra.gmra.mxu1 %v2598_v5  ;;  %v6685_v5 = vld [vmem:[#allocation106_spill] sm:$0xff] }
 0x6a0   :  { %2742 = vmatpush1.msra.mxu0 %v6628_v58  ;;  %2813 = vmatpush1.msra.mxu1 %v6629_v11  ;;  %v6686_v58 = vld [vmem:[#allocation107_spill] sm:$0xff] }
 0x6a1   :  { %2743 = vmatprep.subr.mxu0 %v6630_v13  ;;  %2814 = vmatprep.subr.mxu1 %v6631_v8  ;;  %v6687_v11 = vld [vmem:[#allocation87_spill] sm:$0xff]  ;;  %v6688_v13 = vld [vmem:[#allocation108_spill] sm:$0xff]  ;;  %v6689_v8 = vld [vmem:[#allocation109_spill] sm:$0xff] }
 0x6a2   :  { %2744 = vmatpush1.msra.mxu0 %v6632_v23  ;;  %2815 = vmatpush1.msra.mxu1 %v6633_v10  ;;  %v2342_v23 = vpop.f32.mrf.mxu0 }
 0x6a3   :  { %2745 = vmatprep.subr.mxu0 %v6634_v14  ;;  %2816 = vmatprep.subr.mxu1 %v6635_v12  ;;  %v6690_v14 = vld [vmem:[#allocation85_spill] sm:$0xff] }
 0x6a4   :  { %2746 = vmatpush1.msra.mxu0 %v6636_v32  ;;  %2817 = vmatpush1.msra.mxu1 %v6637_v33  ;;  %v2344_v10 = vpop.f32.mrf.mxu0  ;;  %v2343_v12 = vadd.f32 %v2342_v23, %v6690_v14 }
 0x6a5   :  { %2747 = vmatprep.subr.mxu0 %v6638_v36  ;;  %2818 = vmatprep.subr.mxu1 %v6639_v50  ;;  %v2345_v33 = vadd.f32 %v2344_v10, %v6252_v39 }
 0x6a6   :  { %2748 = vmatpush1.msra.mxu0 %v6640_v4  ;;  %2819 = vmatpush1.msra.mxu1 %v6641_v47  ;;  %v2413_v4 = vpop.f32.mrf.mxu1 }
 0x6a7   :  { %2749 = vmatprep.subr.mxu0 %v6642_v59  ;;  %2820 = vmatprep.subr.mxu1 %v6643_v49 }
 0x6a8   :  { %2750 = vmatpush1.msra.mxu0 %v6644_v20  ;;  %2821 = vmatpush1.msra.mxu1 %v6645_v24  ;;  %v2415_v20 = vpop.f32.mrf.mxu1 }
 0x6a9   :  { %2751 = vmatprep.subr.mxu0 %v6646_v22  ;;  %2822 = vmatprep.subr.mxu1 %v6647_v17  ;;  %v2414_v22 = vadd.f32 %v2413_v4, %v4191_v55 }
 0x6aa   :  { %2752 = vmatpush1.msra.mxu0 %v6648_v56  ;;  %2823 = vmatpush1.msra.mxu1 %v6649_v19  ;;  %v2416_v56 = vadd.f32 %v2415_v20, %v4194_v62 }
 0x6ab   :  { %2753 = vmatprep.subr.mxu0 %v6650_v21  ;;  %2824 = vmatprep.subr.mxu1 %v6651_v53 }
 0x6ac   :  { %2754 = vmatpush1.msra.mxu0 %v6652_v35  ;;  %2825 = vmatpush1.msra.mxu1 %v6653_v18 }
 0x6ad   :  { %2755 = vmatprep.subr.mxu0 %v6654_v2  ;;  %2826 = vmatprep.subr.mxu1 %v6655_v15 }
 0x6ae   :  { %2756 = vmatpush1.msra.mxu0 %v6656_v44  ;;  %2827 = vmatpush1.msra.mxu1 %v6657_v57 }
 0x6af   :  { %2757 = vmatprep.subr.mxu0 %v6658_v16  ;;  %2828 = vmatprep.subr.mxu1 %v6659_v26 }
 0x6b0   :  { %2758 = vmatpush1.msra.mxu0 %v6660_v27  ;;  %2829 = vmatpush1.msra.mxu1 %v6661_v6 }
 0x6b1   :  { %2759 = vmatprep.subr.mxu0 %v6662_v28  ;;  %2830 = vmatprep.subr.mxu1 %v6663_v29 }
 0x6b2   :  { %2760 = vmatpush1.msra.mxu0 %v6664_v30  ;;  %2831 = vmatpush1.msra.mxu1 %v6665_v31  ;;  %v2998_v31 = vld [vmem:[#allocation15 + $0x6] ss:$0 sm:$0xff] }
 0x6b3   :  { %2761 = vmatprep.subr.mxu0 %v6666_v34  ;;  %2832 = vmatprep.subr.mxu1 %v6667_v37 }
 0x6b4   :  { %2762 = vmatpush1.msra.mxu0 %v6668_v38  ;;  %2833 = vmatpush1.msra.mxu1 %v6669_v7 }
 0x6b5   :  { %2763 = vmatprep.subr.mxu0 %v6670_v40  ;;  %2834 = vmatprep.subr.mxu1 %v6671_v41 }
 0x6b6   :  { %2764 = vmatpush1.msra.mxu0 %v6672_v42  ;;  %2835 = vmatpush1.msra.mxu1 %v6673_v43 }
 0x6b7   :  { %2765 = vmatprep.subr.mxu0 %v6674_v54  ;;  %2836 = vmatprep.subr.mxu1 %v6675_v0 }
 0x6b8   :  { %2766 = vmatpush1.msra.mxu0 %v6676_v51  ;;  %2837 = vmatpush1.msra.mxu1 %v6677_v52 }
 0x6b9   :  { %2767 = vmatprep.subr.mxu0 %v6678_v48  ;;  %2838 = vmatprep.subr.mxu1 %v6679_v46 }
 0x6ba   :  { %2768 = vmatpush1.msra.mxu0 %v6680_v60  ;;  %2839 = vmatpush1.msra.mxu1 %v6681_v3 }
 0x6bb   :  { %2769 = vmatprep.subr.mxu0 %v6682_v63  ;;  %2840 = vmatprep.subr.mxu1 %v6683_v61 }
 0x6bc   :  { %2770 = vmatpush1.msra.mxu0 %v6684_v9  ;;  %2841 = vmatpush1.msra.mxu1 %v6685_v5 }
 0x6bd   :  { %2771 = vmatprep.subr.mxu0 %v6686_v58  ;;  %2842 = vmatprep.subr.mxu1 %v6687_v11 }
 0x6be   :  { %2772 = vmatpush1.msra.mxu0 %v6688_v13  ;;  %2805 = vmatprep.mubr.f32.mxu0 %v6622_v1 }
 0x6bf   :  { %2843 = vmatpush1.msra.mxu1 %v6689_v8  ;;  %2876 = vmatprep.mubr.f32.mxu1 %v6622_v1 }
 0x73d   :  { %v2484_v32 = vpop.f32.mrf.mxu0  ;;  %v2555_v24 = vpop.f32.mrf.mxu1 }
 0x73e   :  { %v2560_v36 = vadd.f32 %v2484_v32, %v2343_v12  ;;  %v2562_v1 = vadd.f32 %v2555_v24, %v2414_v22 }
 0x73f   :  { %v2486_v50 = vpop.f32.mrf.mxu0  ;;  %v2557_v17 = vpop.f32.mrf.mxu1 }
 0x740   :  { %v2995_v47 = vmul.f32 -1.442695, %v2560_v36  ;;  %v2561_v59 = vadd.f32 %v2486_v50, %v2345_v33  ;;  %v2997_v19 = vmul.f32 -1.442695, %v2562_v1  ;;  %v2563_v53 = vadd.f32 %v2557_v17, %v2416_v56  ;;  %v3002_v50 = vld [vmem:[#allocation15 + $0x7] ss:$0 sm:$0xff] }
 0x742   :  { %3113 = vpow2.f32 %v2995_v47  ;;  %v2996_v49 = vmul.f32 -1.442695, %v2561_v59 }
 0x744   :  { %3115 = vpow2.f32 %v2996_v49  ;;  %v3003_v49 = vld [vmem:[#allocation6] ss:$0 sm:$0xff] }
 0x745   :  { %3117 = vpow2.f32 %v2997_v19 }
 0x74f   :  { %v3114_v21 = vpop.eup %3113 }
 0x750   :  { %v2573_v35 = vadd.f32 1.0, %v3114_v21 }
 0x751   :  { %v3116_v18 = vpop.eup %3115 }
 0x752   :  { %3119 = vrcp.f32 %v2573_v35  ;;  %v2574_v2 = vadd.f32 1.0, %v3116_v18  ;;  %v3118_v15 = vpop.eup %3117 }
 0x753   :  { %3121 = vtanh.f32 %v2563_v53  ;;  %v2575_v26 = vadd.f32 1.0, %v3118_v15 }
 0x754   :  { %3123 = vrcp.f32 %v2574_v2 }
 0x755   :  { %3125 = vrcp.f32 %v2575_v26 }
 0x75f   :  { %v3120_v44 = vpop.eup %3119  ;;  %v2665_v7 = vpop.f32.mrf.mxu0 }
 0x760   :  { %v3122_v57 = vpop.eup %3121  ;;  %v2666_v41 = vadd.f32 %v2665_v7, %v6690_v14  ;;  %v2736_v0 = vpop.f32.mrf.mxu1 }
 0x761   :  { %v3124_v16 = vpop.eup %3123  ;;  %v2584_v6 = vmul.f32 %v3122_v57, %v3120_v44  ;;  %v2667_v40 = vpop.f32.mrf.mxu0  ;;  %v2737_v3 = vadd.f32 %v2736_v0, %v4191_v55 }
 0x762   :  { %v2583_v27 = vmul.f32 %v3124_v16, %v5429_v25  ;;  %v3126_v29 = vpop.eup %3125  ;;  %v2668_v25 = vadd.f32 %v2667_v40, %v6252_v39  ;;  %v2738_v46 = vpop.f32.mrf.mxu1 }
 0x763   :  { %v2739_v61 = vadd.f32 %v2738_v46, %v4194_v62 }
 0x764   :  { %v2585_v28 = vadd.f32 %v2584_v6, %v2583_v27 }
 0x766   :  { %3127 = vtanh.f32 %v2585_v28 }
 0x773   :  { %v3128_v30 = vpop.eup %3127 }
 0x774   :  { %v2587_v34 = vmul.f32 %v3128_v30, %v3126_v29 }
 0x776   :  { %2806 = vmatmul.mubr.f32.vlgmr.msra.gmra.mxu0 %v2587_v34  ;;  %2877 = vmatmul.mubr.f32.vlgmr.msra.gmra.mxu1 %v2587_v34  ;;  %v2596_v37 = vmul.f32 %v2998_v31, %v2587_v34 }
 0x778   :  { %v2597_v38 = vadd.f32 %v2596_v37, %v5437_v45 }
 0x836   :  { %v2807_v42 = vpop.f32.mrf.mxu0  ;;  %v2878_v60 = vpop.f32.mrf.mxu1 }
 0x837   :  { %v2883_v43 = vadd.f32 %v2807_v42, %v2666_v41  ;;  %v2885_v45 = vadd.f32 %v2878_v60, %v2737_v3 }
 0x838   :  { %v2809_v54 = vpop.f32.mrf.mxu0  ;;  %v2880_v63 = vpop.f32.mrf.mxu1 }
 0x839   :  { %v2999_v51 = vmul.f32 -1.442695, %v2883_v43  ;;  %v2884_v52 = vadd.f32 %v2809_v54, %v2668_v25  ;;  %v3001_v9 = vmul.f32 -1.442695, %v2885_v45  ;;  %v2886_v58 = vadd.f32 %v2880_v63, %v2739_v61 }
 0x83b   :  { %3129 = vpow2.f32 %v2999_v51  ;;  %v3000_v48 = vmul.f32 -1.442695, %v2884_v52 }
 0x83d   :  { %3131 = vpow2.f32 %v3000_v48 }
 0x83e   :  { %3133 = vpow2.f32 %v3001_v9 }
 0x848   :  { %v3130_v5 = vpop.eup %3129 }
 0x849   :  { %v2896_v39 = vadd.f32 1.0, %v3130_v5 }
 0x84a   :  { %v3132_v11 = vpop.eup %3131 }
 0x84b   :  { %3135 = vrcp.f32 %v2896_v39  ;;  %v2897_v13 = vadd.f32 1.0, %v3132_v11  ;;  %v3134_v8 = vpop.eup %3133 }
 0x84c   :  { %3137 = vtanh.f32 %v2886_v58  ;;  %v2898_v12 = vadd.f32 1.0, %v3134_v8 }
 0x84d   :  { %3139 = vrcp.f32 %v2897_v13 }
 0x84e   :  { %3141 = vrcp.f32 %v2898_v12 }
 0x858   :  { %v3136_v23 = vpop.eup %3135 }
 0x859   :  { %v3138_v10 = vpop.eup %3137 }
 0x85a   :  { %v3140_v14 = vpop.eup %3139  ;;  %v2907_v32 = vmul.f32 %v3138_v10, %v3136_v23 }
 0x85b   :  { %v2906_v55 = vmul.f32 %v3140_v14, %v2585_v28  ;;  %v3142_v62 = vpop.eup %3141 }
 0x85d   :  { %v2908_v33 = vadd.f32 %v2907_v32, %v2906_v55 }
 0x85f   :  { %3143 = vtanh.f32 %v2908_v33 }
 0x86c   :  { %v3144_v36 = vpop.eup %3143 }
 0x86d   :  { %v2910_v4 = vmul.f32 %v3144_v36, %v3142_v62 }
 0x86f   :  { %v2919_v47 = vmul.f32 %v3002_v50, %v2910_v4 }
 0x871   :  { %v2920_v59 = vadd.f32 %v2919_v47, %v2597_v38 }
 0x873   :  { %2921 = vadd.xlane.f32.xlu0 %v2920_v59 }
 0x8fc   :  { %v2922_v20 = vpop.xlane.xlu0 %2921 }
 0x8fd   :  { %v2930_v24 = vadd.f32 %v3003_v49, %v2922_v20 }
 0x8ff   :  { %2932 = vst.msk [vmem:[%s5585_s9] sm:$0xff] %vm2931_vm0, %v2930_v24 }
 0x900   :  { %2937 = vsyncpa [#allocation8], 1 }
 0x901   :  { %2938 = vsyncpa [#allocation10], 1 }
 0x902   :  { %2939 = vsyncpa [#allocation13], 1 }
 0x903   :  { %2940 = vsyncpa [#allocation16], 1 }

</bundles_post_ra>
